<compile_context>
chip_gen: v7x
topology: tpu7x:2x2x1
jax: 0.10.0
libtpu: 0.0.40
codegen_flags: <defaults>
</compile_context>

<pallas_src>
import jax
import jax.numpy as jnp
from jax.experimental import pallas as pl
from jax.experimental.pallas import tpu as pltpu

LN_EPS = 1e-5
LANE = 128


def _layer_dims(input_dim, output_dim):
    return [
        (input_dim, 1024),  # fc1
        (1024, 512),        # fc2
        (512, 256),         # fc3
        (256, 128),         # fc4
        (128, 64),          # fc5
        (64, 32),           # fc6
        (32, 16),           # fc7
        (16, output_dim),   # fc_out
    ]


def _round_up(v, m):
    return ((v + m - 1) // m) * m


def _pad_axis(a, target, axis):
    pad = target - a.shape[axis]
    if pad <= 0:
        return a
    widths = [(0, 0)] * a.ndim
    widths[axis] = (0, pad)
    return jnp.pad(a, widths)


def _layernorm(x, gamma, beta):
    # PyTorch LayerNorm: biased variance over the last axis, eps inside rsqrt.
    mean = jnp.mean(x, axis=-1, keepdims=True)
    xc = x - mean
    var = jnp.mean(xc * xc, axis=-1, keepdims=True)
    inv = jax.lax.rsqrt(var + LN_EPS)
    return xc * inv * gamma + beta


def mlp_kernel(
    x_ref,
    w1, b1, w2, b2, w3, b3, w4, b4, w5, b5, w6, b6, w7, b7, w8, b8,
    ln1_g, ln1_b, ln2_g, ln2_b,
    o_ref,
):
    relu = lambda v: jnp.maximum(v, 0.0)

    def dense(h, w_ref, b_ref):
        # bf16 x bf16 MXU matmul with f32 accumulation; bias add in f32.
        return jnp.dot(
            h.astype(jnp.bfloat16), w_ref[...],
            preferred_element_type=jnp.float32,
        ) + b_ref[...]

    x = x_ref[...]                               # [bm, K_pad] f32
    h = relu(dense(x, w1, b1))                   # fc1 + relu  -> [bm, 1024]
    h = relu(dense(h, w2, b2))                   # fc2 + relu  -> [bm, 512]
    h = _layernorm(h, ln1_g[...], ln1_b[...])    # ln1
    h = relu(dense(h, w3, b3))                   # fc3 + relu  -> [bm, 256]
    h = relu(dense(h, w4, b4))                   # fc4 + relu  -> [bm, 128]
    h = _layernorm(h, ln2_g[...], ln2_b[...])    # ln2
    h = relu(dense(h, w5, b5))                   # fc5 + relu  -> [bm, 64]
    h = relu(dense(h, w6, b6))                   # fc6 + relu  -> [bm, 32]
    h = relu(dense(h, w7, b7))                   # fc7 + relu  -> [bm, 16]
    h = dense(h, w8, b8)                         # fc_out      -> [bm, N_pad]

    o_ref[...] = h.astype(o_ref.dtype)           # lane-dense (N_pad % 128 == 0)


def mlp_forward(x, params, *, block_m=128):
    """x: [B, input_dim] float32. params: dict of f32 weights/biases."""
    B, input_dim = x.shape
    output_dim = params["w8"].shape[1]

    k_pad = _round_up(input_dim, LANE)   # lane-dense x tile / fc1 K dim
    n_pad = _round_up(output_dim, LANE)  # lane-dense output store
    b_pad = _round_up(B, block_m)        # whole number of batch tiles

    x_p = _pad_axis(_pad_axis(x.astype(jnp.float32), k_pad, 1), b_pad, 0)

    # Weights -> bf16 (MXU-native, halves weight DMA/VMEM); biases & LN stay f32.
    prepared = {}
    for i in range(1, 9):
        w = params[f"w{i}"]
        b = params[f"b{i}"]
        if i == 1:
            w = _pad_axis(w, k_pad, 0)           # zero rows for padded inputs
        if i == 8:
            w = _pad_axis(w, n_pad, 1)           # zero cols -> padded outputs = 0
            b = _pad_axis(b, n_pad, 1)
        prepared[f"w{i}"] = w.astype(jnp.bfloat16)
        prepared[f"b{i}"] = b.astype(jnp.float32)
    for k in ("ln1_g", "ln1_b", "ln2_g", "ln2_b"):
        prepared[k] = params[k].astype(jnp.float32)

    param_order = [
        "w1", "b1", "w2", "b2", "w3", "b3", "w4", "b4",
        "w5", "b5", "w6", "b6", "w7", "b7", "w8", "b8",
        "ln1_g", "ln1_b", "ln2_g", "ln2_b",
    ]
    param_arrays = [prepared[k] for k in param_order]

    def full_spec(arr):
        nd = arr.ndim
        return pl.BlockSpec(arr.shape, lambda i, _nd=nd: (0,) * _nd)

    in_specs = [pl.BlockSpec((block_m, k_pad), lambda i: (i, 0))]
    in_specs += [full_spec(a) for a in param_arrays]
    out_spec = pl.BlockSpec((block_m, n_pad), lambda i: (i, 0))

    # Advisory cost estimate for the XLA scheduler.
    dims_padded = _layer_dims(k_pad, n_pad)
    flops = 2 * b_pad * sum(din * dout for din, dout in dims_padded)
    bytes_weights = sum(din * dout * 2 + dout * 4 for din, dout in dims_padded)
    bytes_accessed = (bytes_weights
                      + b_pad * (k_pad + n_pad) * 4
                      + 4 * (512 + 512 + 128 + 128))
    cost = pl.CostEstimate(flops=flops, transcendentals=0,
                           bytes_accessed=bytes_accessed)

    out_padded = pl.pallas_call(
        mlp_kernel,
        out_shape=jax.ShapeDtypeStruct((b_pad, n_pad), jnp.float32),
        grid_spec=pltpu.PrefetchScalarGridSpec(
            num_scalar_prefetch=0,
            grid=(b_pad // block_m,),
            in_specs=in_specs,
            out_specs=out_spec,
        ),
        compiler_params=pltpu.CompilerParams(
            dimension_semantics=("parallel",),
            vmem_limit_bytes=48 * 1024 * 1024,
        ),
        cost_estimate=cost,
    )(x_p, *param_arrays)

    return out_padded[:B, :output_dim]


def init_params(key, input_dim, output_dim):
    """Deterministic synthetic init matching nn.Linear / nn.LayerNorm shapes."""
    dims = _layer_dims(input_dim, output_dim)
    params = {}
    keys = jax.random.split(key, 2 * len(dims))
    for idx, (din, dout) in enumerate(dims):
        kw, kb = keys[2 * idx], keys[2 * idx + 1]
        bound = 1.0 / jnp.sqrt(jnp.float32(din))
        # weights stored as [in, out] (transposed vs. torch nn.Linear.weight)
        params[f"w{idx + 1}"] = jax.random.uniform(
            kw, (din, dout), jnp.float32, -bound, bound)
        params[f"b{idx + 1}"] = jax.random.uniform(
            kb, (1, dout), jnp.float32, -bound, bound)
    # LayerNorm affine params (torch default: gamma=1, beta=0)
    params["ln1_g"] = jnp.ones((1, 512), jnp.float32)
    params["ln1_b"] = jnp.zeros((1, 512), jnp.float32)
    params["ln2_g"] = jnp.ones((1, 128), jnp.float32)
    params["ln2_b"] = jnp.zeros((1, 128), jnp.float32)
    return params


def mlp_reference(x, params):
    """Pure-JAX reference mirroring the kernel's bf16-in / f32-accumulate dots."""
    relu = lambda v: jnp.maximum(v, 0.0)

    def dense(h, w, b):
        return jnp.dot(h.astype(jnp.bfloat16), w.astype(jnp.bfloat16),
                       preferred_element_type=jnp.float32) + b

    h = relu(dense(x, params["w1"], params["b1"]))
    h = relu(dense(h, params["w2"], params["b2"]))
    h = _layernorm(h, params["ln1_g"], params["ln1_b"])
    h = relu(dense(h, params["w3"], params["b3"]))
    h = relu(dense(h, params["w4"], params["b4"]))
    h = _layernorm(h, params["ln2_g"], params["ln2_b"])
    h = relu(dense(h, params["w5"], params["b5"]))
    h = relu(dense(h, params["w6"], params["b6"]))
    h = relu(dense(h, params["w7"], params["b7"]))
    return dense(h, params["w8"], params["b8"])


if __name__ == "__main__":
    input_dim = 64
    output_dim = 8
    batch = 8

    key = jax.random.PRNGKey(0)
    k_x, k_p = jax.random.split(key)
    x = jax.random.normal(k_x, (batch, input_dim), jnp.float32)
    params = init_params(k_p, input_dim, output_dim)

    out = mlp_forward(x, params)      # block_m=128; batch is padded internally
    out = jax.block_until_ready(out)

    ref = mlp_reference(x, params)
    assert out.shape == (batch, output_dim)
    assert jnp.allclose(out, ref, atol=1e-2, rtol=1e-2), "mismatch vs reference"

    print("KERNEL_OK")
</pallas_src>

<mosaic_0001>
module attributes {stable_mosaic.version = 11 : i64} {
  func.func @mlp_kernel(%arg0: i32, %arg1: memref<128x128xf32, #tpu.memory_space<vmem>>, %arg2: memref<128x1024xbf16, #tpu.memory_space<vmem>>, %arg3: memref<1x1024xf32, #tpu.memory_space<vmem>>, %arg4: memref<1024x512xbf16, #tpu.memory_space<vmem>>, %arg5: memref<1x512xf32, #tpu.memory_space<vmem>>, %arg6: memref<512x256xbf16, #tpu.memory_space<vmem>>, %arg7: memref<1x256xf32, #tpu.memory_space<vmem>>, %arg8: memref<256x128xbf16, #tpu.memory_space<vmem>>, %arg9: memref<1x128xf32, #tpu.memory_space<vmem>>, %arg10: memref<128x64xbf16, #tpu.memory_space<vmem>>, %arg11: memref<1x64xf32, #tpu.memory_space<vmem>>, %arg12: memref<64x32xbf16, #tpu.memory_space<vmem>>, %arg13: memref<1x32xf32, #tpu.memory_space<vmem>>, %arg14: memref<32x16xbf16, #tpu.memory_space<vmem>>, %arg15: memref<1x16xf32, #tpu.memory_space<vmem>>, %arg16: memref<16x128xbf16, #tpu.memory_space<vmem>>, %arg17: memref<1x128xf32, #tpu.memory_space<vmem>>, %arg18: memref<1x512xf32, #tpu.memory_space<vmem>>, %arg19: memref<1x512xf32, #tpu.memory_space<vmem>>, %arg20: memref<1x128xf32, #tpu.memory_space<vmem>>, %arg21: memref<1x128xf32, #tpu.memory_space<vmem>>, %arg22: memref<128x128xf32, #tpu.memory_space<vmem>>) attributes {dimension_semantics = [#tpu.dimension_semantics<parallel>], iteration_bounds = array<i64: 1>, scalar_prefetch = 0 : i64, scratch_operands = 0 : i64, tpu.core_type = #tpu.core_type<tc>, window_params = [{transform_indices = @transform_0, window_bounds = array<i64: 128, 128>}, {pipeline_mode = #tpu.pipeline_mode<synchronous>, transform_indices = @transform_1, window_bounds = array<i64: 128, 1024>}, {pipeline_mode = #tpu.pipeline_mode<synchronous>, transform_indices = @transform_2, window_bounds = array<i64: 1, 1024>}, {pipeline_mode = #tpu.pipeline_mode<synchronous>, transform_indices = @transform_3, window_bounds = array<i64: 1024, 512>}, {pipeline_mode = #tpu.pipeline_mode<synchronous>, transform_indices = @transform_4, window_bounds = array<i64: 1, 512>}, {pipeline_mode = #tpu.pipeline_mode<synchronous>, transform_indices = @transform_5, window_bounds = array<i64: 512, 256>}, {pipeline_mode = #tpu.pipeline_mode<synchronous>, transform_indices = @transform_6, window_bounds = array<i64: 1, 256>}, {pipeline_mode = #tpu.pipeline_mode<synchronous>, transform_indices = @transform_7, window_bounds = array<i64: 256, 128>}, {pipeline_mode = #tpu.pipeline_mode<synchronous>, transform_indices = @transform_8, window_bounds = array<i64: 1, 128>}, {pipeline_mode = #tpu.pipeline_mode<synchronous>, transform_indices = @transform_9, window_bounds = array<i64: 128, 64>}, {pipeline_mode = #tpu.pipeline_mode<synchronous>, transform_indices = @transform_10, window_bounds = array<i64: 1, 64>}, {pipeline_mode = #tpu.pipeline_mode<synchronous>, transform_indices = @transform_11, window_bounds = array<i64: 64, 32>}, {pipeline_mode = #tpu.pipeline_mode<synchronous>, transform_indices = @transform_12, window_bounds = array<i64: 1, 32>}, {pipeline_mode = #tpu.pipeline_mode<synchronous>, transform_indices = @transform_13, window_bounds = array<i64: 32, 16>}, {pipeline_mode = #tpu.pipeline_mode<synchronous>, transform_indices = @transform_14, window_bounds = array<i64: 1, 16>}, {pipeline_mode = #tpu.pipeline_mode<synchronous>, transform_indices = @transform_15, window_bounds = array<i64: 16, 128>}, {pipeline_mode = #tpu.pipeline_mode<synchronous>, transform_indices = @transform_16, window_bounds = array<i64: 1, 128>}, {pipeline_mode = #tpu.pipeline_mode<synchronous>, transform_indices = @transform_17, window_bounds = array<i64: 1, 512>}, {pipeline_mode = #tpu.pipeline_mode<synchronous>, transform_indices = @transform_18, window_bounds = array<i64: 1, 512>}, {pipeline_mode = #tpu.pipeline_mode<synchronous>, transform_indices = @transform_19, window_bounds = array<i64: 1, 128>}, {pipeline_mode = #tpu.pipeline_mode<synchronous>, transform_indices = @transform_20, window_bounds = array<i64: 1, 128>}, {transform_indices = @transform_21, window_bounds = array<i64: 128, 128>}]} {
    %c0 = arith.constant 0 : index
    %c0_0 = arith.constant 0 : index
    %0 = vector.load %arg1[%c0, %c0_0] : memref<128x128xf32, #tpu.memory_space<vmem>>, vector<128x128xf32>
    %1 = arith.truncf %0 : vector<128x128xf32> to vector<128x128xbf16>
    %c0_1 = arith.constant 0 : index
    %c0_2 = arith.constant 0 : index
    %2 = vector.load %arg2[%c0_1, %c0_2] : memref<128x1024xbf16, #tpu.memory_space<vmem>>, vector<128x1024xbf16>
    %cst = arith.constant dense<0.000000e+00> : vector<128x1024xf32>
    %3 = tpu.matmul %1, %2, %cst {dimension_numbers = #tpu.dot_dimension_numbers<[1], [0], [0], [1], [0, 0, 1, 1], [], []>} : vector<128x128xbf16>, vector<128x1024xbf16>, vector<128x1024xf32> -> vector<128x1024xf32>
    %c0_3 = arith.constant 0 : index
    %c0_4 = arith.constant 0 : index
    %4 = vector.load %arg3[%c0_3, %c0_4] : memref<1x1024xf32, #tpu.memory_space<vmem>>, vector<1x1024xf32>
    %5 = vector.broadcast %4 : vector<1x1024xf32> to vector<128x1024xf32>
    %6 = arith.addf %3, %5 : vector<128x1024xf32>
    %cst_5 = arith.constant 0.000000e+00 : f32
    %7 = vector.broadcast %cst_5 : f32 to vector<128x1024xf32>
    %8 = arith.maximumf %6, %7 : vector<128x1024xf32>
    %9 = arith.truncf %8 : vector<128x1024xf32> to vector<128x1024xbf16>
    %c0_6 = arith.constant 0 : index
    %c0_7 = arith.constant 0 : index
    %10 = vector.load %arg4[%c0_6, %c0_7] : memref<1024x512xbf16, #tpu.memory_space<vmem>>, vector<1024x512xbf16>
    %cst_8 = arith.constant dense<0.000000e+00> : vector<128x512xf32>
    %11 = tpu.matmul %9, %10, %cst_8 {dimension_numbers = #tpu.dot_dimension_numbers<[1], [0], [0], [1], [0, 0, 1, 1], [], []>} : vector<128x1024xbf16>, vector<1024x512xbf16>, vector<128x512xf32> -> vector<128x512xf32>
    %c0_9 = arith.constant 0 : index
    %c0_10 = arith.constant 0 : index
    %12 = vector.load %arg5[%c0_9, %c0_10] : memref<1x512xf32, #tpu.memory_space<vmem>>, vector<1x512xf32>
    %13 = vector.broadcast %12 : vector<1x512xf32> to vector<128x512xf32>
    %14 = arith.addf %11, %13 : vector<128x512xf32>
    %cst_11 = arith.constant 0.000000e+00 : f32
    %15 = vector.broadcast %cst_11 : f32 to vector<128x512xf32>
    %16 = arith.maximumf %14, %15 : vector<128x512xf32>
    %c0_12 = arith.constant 0 : index
    %c0_13 = arith.constant 0 : index
    %17 = vector.load %arg18[%c0_12, %c0_13] : memref<1x512xf32, #tpu.memory_space<vmem>>, vector<1x512xf32>
    %c0_14 = arith.constant 0 : index
    %c0_15 = arith.constant 0 : index
    %18 = vector.load %arg19[%c0_14, %c0_15] : memref<1x512xf32, #tpu.memory_space<vmem>>, vector<1x512xf32>
    %cst_16 = arith.constant dense<0.000000e+00> : vector<128xf32>
    %19 = vector.multi_reduction <add>, %16, %cst_16 [1] : vector<128x512xf32> to vector<128xf32>
    %20 = vector.shape_cast %19 : vector<128xf32> to vector<128x1xf32>
    %cst_17 = arith.constant 5.120000e+02 : f32
    %21 = vector.broadcast %cst_17 : f32 to vector<128x1xf32>
    %22 = arith.divf %20, %21 : vector<128x1xf32>
    %23 = vector.broadcast %22 : vector<128x1xf32> to vector<128x512xf32>
    %24 = arith.subf %16, %23 : vector<128x512xf32>
    %25 = arith.mulf %24, %24 : vector<128x512xf32>
    %cst_18 = arith.constant dense<0.000000e+00> : vector<128xf32>
    %26 = vector.multi_reduction <add>, %25, %cst_18 [1] : vector<128x512xf32> to vector<128xf32>
    %27 = vector.shape_cast %26 : vector<128xf32> to vector<128x1xf32>
    %cst_19 = arith.constant 5.120000e+02 : f32
    %28 = vector.broadcast %cst_19 : f32 to vector<128x1xf32>
    %29 = arith.divf %27, %28 : vector<128x1xf32>
    %cst_20 = arith.constant 9.99999974E-6 : f32
    %30 = vector.broadcast %cst_20 : f32 to vector<128x1xf32>
    %31 = arith.addf %29, %30 : vector<128x1xf32>
    %32 = math.rsqrt %31 : vector<128x1xf32>
    %33 = vector.broadcast %32 : vector<128x1xf32> to vector<128x512xf32>
    %34 = arith.mulf %24, %33 : vector<128x512xf32>
    %35 = vector.broadcast %17 : vector<1x512xf32> to vector<128x512xf32>
    %36 = arith.mulf %34, %35 : vector<128x512xf32>
    %37 = vector.broadcast %18 : vector<1x512xf32> to vector<128x512xf32>
    %38 = arith.addf %36, %37 : vector<128x512xf32>
    %39 = arith.truncf %38 : vector<128x512xf32> to vector<128x512xbf16>
    %c0_21 = arith.constant 0 : index
    %c0_22 = arith.constant 0 : index
    %40 = vector.load %arg6[%c0_21, %c0_22] : memref<512x256xbf16, #tpu.memory_space<vmem>>, vector<512x256xbf16>
    %cst_23 = arith.constant dense<0.000000e+00> : vector<128x256xf32>
    %41 = tpu.matmul %39, %40, %cst_23 {dimension_numbers = #tpu.dot_dimension_numbers<[1], [0], [0], [1], [0, 0, 1, 1], [], []>} : vector<128x512xbf16>, vector<512x256xbf16>, vector<128x256xf32> -> vector<128x256xf32>
    %c0_24 = arith.constant 0 : index
    %c0_25 = arith.constant 0 : index
    %42 = vector.load %arg7[%c0_24, %c0_25] : memref<1x256xf32, #tpu.memory_space<vmem>>, vector<1x256xf32>
    %43 = vector.broadcast %42 : vector<1x256xf32> to vector<128x256xf32>
    %44 = arith.addf %41, %43 : vector<128x256xf32>
    %cst_26 = arith.constant 0.000000e+00 : f32
    %45 = vector.broadcast %cst_26 : f32 to vector<128x256xf32>
    %46 = arith.maximumf %44, %45 : vector<128x256xf32>
    %47 = arith.truncf %46 : vector<128x256xf32> to vector<128x256xbf16>
    %c0_27 = arith.constant 0 : index
    %c0_28 = arith.constant 0 : index
    %48 = vector.load %arg8[%c0_27, %c0_28] : memref<256x128xbf16, #tpu.memory_space<vmem>>, vector<256x128xbf16>
    %cst_29 = arith.constant dense<0.000000e+00> : vector<128x128xf32>
    %49 = tpu.matmul %47, %48, %cst_29 {dimension_numbers = #tpu.dot_dimension_numbers<[1], [0], [0], [1], [0, 0, 1, 1], [], []>} : vector<128x256xbf16>, vector<256x128xbf16>, vector<128x128xf32> -> vector<128x128xf32>
    %c0_30 = arith.constant 0 : index
    %c0_31 = arith.constant 0 : index
    %50 = vector.load %arg9[%c0_30, %c0_31] : memref<1x128xf32, #tpu.memory_space<vmem>>, vector<1x128xf32>
    %51 = vector.broadcast %50 : vector<1x128xf32> to vector<128x128xf32>
    %52 = arith.addf %49, %51 : vector<128x128xf32>
    %cst_32 = arith.constant 0.000000e+00 : f32
    %53 = vector.broadcast %cst_32 : f32 to vector<128x128xf32>
    %54 = arith.maximumf %52, %53 : vector<128x128xf32>
    %c0_33 = arith.constant 0 : index
    %c0_34 = arith.constant 0 : index
    %55 = vector.load %arg20[%c0_33, %c0_34] : memref<1x128xf32, #tpu.memory_space<vmem>>, vector<1x128xf32>
    %c0_35 = arith.constant 0 : index
    %c0_36 = arith.constant 0 : index
    %56 = vector.load %arg21[%c0_35, %c0_36] : memref<1x128xf32, #tpu.memory_space<vmem>>, vector<1x128xf32>
    %cst_37 = arith.constant dense<0.000000e+00> : vector<128xf32>
    %57 = vector.multi_reduction <add>, %54, %cst_37 [1] : vector<128x128xf32> to vector<128xf32>
    %58 = vector.shape_cast %57 : vector<128xf32> to vector<128x1xf32>
    %cst_38 = arith.constant 1.280000e+02 : f32
    %59 = vector.broadcast %cst_38 : f32 to vector<128x1xf32>
    %60 = arith.divf %58, %59 : vector<128x1xf32>
    %61 = vector.broadcast %60 : vector<128x1xf32> to vector<128x128xf32>
    %62 = arith.subf %54, %61 : vector<128x128xf32>
    %63 = arith.mulf %62, %62 : vector<128x128xf32>
    %cst_39 = arith.constant dense<0.000000e+00> : vector<128xf32>
    %64 = vector.multi_reduction <add>, %63, %cst_39 [1] : vector<128x128xf32> to vector<128xf32>
    %65 = vector.shape_cast %64 : vector<128xf32> to vector<128x1xf32>
    %cst_40 = arith.constant 1.280000e+02 : f32
    %66 = vector.broadcast %cst_40 : f32 to vector<128x1xf32>
    %67 = arith.divf %65, %66 : vector<128x1xf32>
    %cst_41 = arith.constant 9.99999974E-6 : f32
    %68 = vector.broadcast %cst_41 : f32 to vector<128x1xf32>
    %69 = arith.addf %67, %68 : vector<128x1xf32>
    %70 = math.rsqrt %69 : vector<128x1xf32>
    %71 = vector.broadcast %70 : vector<128x1xf32> to vector<128x128xf32>
    %72 = arith.mulf %62, %71 : vector<128x128xf32>
    %73 = vector.broadcast %55 : vector<1x128xf32> to vector<128x128xf32>
    %74 = arith.mulf %72, %73 : vector<128x128xf32>
    %75 = vector.broadcast %56 : vector<1x128xf32> to vector<128x128xf32>
    %76 = arith.addf %74, %75 : vector<128x128xf32>
    %77 = arith.truncf %76 : vector<128x128xf32> to vector<128x128xbf16>
    %c0_42 = arith.constant 0 : index
    %c0_43 = arith.constant 0 : index
    %78 = vector.load %arg10[%c0_42, %c0_43] : memref<128x64xbf16, #tpu.memory_space<vmem>>, vector<128x64xbf16>
    %cst_44 = arith.constant dense<0.000000e+00> : vector<128x64xf32>
    %79 = tpu.matmul %77, %78, %cst_44 {dimension_numbers = #tpu.dot_dimension_numbers<[1], [0], [0], [1], [0, 0, 1, 1], [], []>} : vector<128x128xbf16>, vector<128x64xbf16>, vector<128x64xf32> -> vector<128x64xf32>
    %c0_45 = arith.constant 0 : index
    %c0_46 = arith.constant 0 : index
    %80 = vector.load %arg11[%c0_45, %c0_46] : memref<1x64xf32, #tpu.memory_space<vmem>>, vector<1x64xf32>
    %81 = vector.broadcast %80 : vector<1x64xf32> to vector<128x64xf32>
    %82 = arith.addf %79, %81 : vector<128x64xf32>
    %cst_47 = arith.constant 0.000000e+00 : f32
    %83 = vector.broadcast %cst_47 : f32 to vector<128x64xf32>
    %84 = arith.maximumf %82, %83 : vector<128x64xf32>
    %85 = arith.truncf %84 : vector<128x64xf32> to vector<128x64xbf16>
    %c0_48 = arith.constant 0 : index
    %c0_49 = arith.constant 0 : index
    %86 = vector.load %arg12[%c0_48, %c0_49] : memref<64x32xbf16, #tpu.memory_space<vmem>>, vector<64x32xbf16>
    %cst_50 = arith.constant dense<0.000000e+00> : vector<128x32xf32>
    %87 = tpu.matmul %85, %86, %cst_50 {dimension_numbers = #tpu.dot_dimension_numbers<[1], [0], [0], [1], [0, 0, 1, 1], [], []>} : vector<128x64xbf16>, vector<64x32xbf16>, vector<128x32xf32> -> vector<128x32xf32>
    %c0_51 = arith.constant 0 : index
    %c0_52 = arith.constant 0 : index
    %88 = vector.load %arg13[%c0_51, %c0_52] : memref<1x32xf32, #tpu.memory_space<vmem>>, vector<1x32xf32>
    %89 = vector.broadcast %88 : vector<1x32xf32> to vector<128x32xf32>
    %90 = arith.addf %87, %89 : vector<128x32xf32>
    %cst_53 = arith.constant 0.000000e+00 : f32
    %91 = vector.broadcast %cst_53 : f32 to vector<128x32xf32>
    %92 = arith.maximumf %90, %91 : vector<128x32xf32>
    %93 = arith.truncf %92 : vector<128x32xf32> to vector<128x32xbf16>
    %c0_54 = arith.constant 0 : index
    %c0_55 = arith.constant 0 : index
    %94 = vector.load %arg14[%c0_54, %c0_55] : memref<32x16xbf16, #tpu.memory_space<vmem>>, vector<32x16xbf16>
    %cst_56 = arith.constant dense<0.000000e+00> : vector<128x16xf32>
    %95 = tpu.matmul %93, %94, %cst_56 {dimension_numbers = #tpu.dot_dimension_numbers<[1], [0], [0], [1], [0, 0, 1, 1], [], []>} : vector<128x32xbf16>, vector<32x16xbf16>, vector<128x16xf32> -> vector<128x16xf32>
    %c0_57 = arith.constant 0 : index
    %c0_58 = arith.constant 0 : index
    %96 = vector.load %arg15[%c0_57, %c0_58] : memref<1x16xf32, #tpu.memory_space<vmem>>, vector<1x16xf32>
    %97 = vector.broadcast %96 : vector<1x16xf32> to vector<128x16xf32>
    %98 = arith.addf %95, %97 : vector<128x16xf32>
    %cst_59 = arith.constant 0.000000e+00 : f32
    %99 = vector.broadcast %cst_59 : f32 to vector<128x16xf32>
    %100 = arith.maximumf %98, %99 : vector<128x16xf32>
    %101 = arith.truncf %100 : vector<128x16xf32> to vector<128x16xbf16>
    %c0_60 = arith.constant 0 : index
    %c0_61 = arith.constant 0 : index
    %102 = vector.load %arg16[%c0_60, %c0_61] : memref<16x128xbf16, #tpu.memory_space<vmem>>, vector<16x128xbf16>
    %cst_62 = arith.constant dense<0.000000e+00> : vector<128x128xf32>
    %103 = tpu.matmul %101, %102, %cst_62 {dimension_numbers = #tpu.dot_dimension_numbers<[1], [0], [0], [1], [0, 0, 1, 1], [], []>} : vector<128x16xbf16>, vector<16x128xbf16>, vector<128x128xf32> -> vector<128x128xf32>
    %c0_63 = arith.constant 0 : index
    %c0_64 = arith.constant 0 : index
    %104 = vector.load %arg17[%c0_63, %c0_64] : memref<1x128xf32, #tpu.memory_space<vmem>>, vector<1x128xf32>
    %105 = vector.broadcast %104 : vector<1x128xf32> to vector<128x128xf32>
    %106 = arith.addf %103, %105 : vector<128x128xf32>
    %c0_65 = arith.constant 0 : index
    %c0_66 = arith.constant 0 : index
    %107 = vector.load %arg22[%c0_65, %c0_66] : memref<128x128xf32, #tpu.memory_space<vmem>>, vector<128x128xf32>
    tpu.vector_store %arg22[%c0_65, %c0_66], %106 {strides = array<i32>} : memref<128x128xf32, #tpu.memory_space<vmem>>, vector<128x128xf32>,
    return
  }
  func.func @transform_0(%arg0: i32) -> (i32, i32) {
    %c0_i32 = arith.constant 0 : i32
    %c0_i32_0 = arith.constant 0 : i32
    return %arg0, %c0_i32 : i32, i32
  }
  func.func @transform_1(%arg0: i32) -> (i32, i32) {
    %c0_i32 = arith.constant 0 : i32
    %c0_i32_0 = arith.constant 0 : i32
    %c0_i32_1 = arith.constant 0 : i32
    return %c0_i32, %c0_i32_0 : i32, i32
  }
  func.func @transform_2(%arg0: i32) -> (i32, i32) {
    %c0_i32 = arith.constant 0 : i32
    %c0_i32_0 = arith.constant 0 : i32
    %c0_i32_1 = arith.constant 0 : i32
    return %c0_i32, %c0_i32_0 : i32, i32
  }
  func.func @transform_3(%arg0: i32) -> (i32, i32) {
    %c0_i32 = arith.constant 0 : i32
    %c0_i32_0 = arith.constant 0 : i32
    %c0_i32_1 = arith.constant 0 : i32
    return %c0_i32, %c0_i32_0 : i32, i32
  }
  func.func @transform_4(%arg0: i32) -> (i32, i32) {
    %c0_i32 = arith.constant 0 : i32
    %c0_i32_0 = arith.constant 0 : i32
    %c0_i32_1 = arith.constant 0 : i32
    return %c0_i32, %c0_i32_0 : i32, i32
  }
  func.func @transform_5(%arg0: i32) -> (i32, i32) {
    %c0_i32 = arith.constant 0 : i32
    %c0_i32_0 = arith.constant 0 : i32
    %c0_i32_1 = arith.constant 0 : i32
    return %c0_i32, %c0_i32_0 : i32, i32
  }
  func.func @transform_6(%arg0: i32) -> (i32, i32) {
    %c0_i32 = arith.constant 0 : i32
    %c0_i32_0 = arith.constant 0 : i32
    %c0_i32_1 = arith.constant 0 : i32
    return %c0_i32, %c0_i32_0 : i32, i32
  }
  func.func @transform_7(%arg0: i32) -> (i32, i32) {
    %c0_i32 = arith.constant 0 : i32
    %c0_i32_0 = arith.constant 0 : i32
    %c0_i32_1 = arith.constant 0 : i32
    return %c0_i32, %c0_i32_0 : i32, i32
  }
  func.func @transform_8(%arg0: i32) -> (i32, i32) {
    %c0_i32 = arith.constant 0 : i32
    %c0_i32_0 = arith.constant 0 : i32
    %c0_i32_1 = arith.constant 0 : i32
    return %c0_i32, %c0_i32_0 : i32, i32
  }
  func.func @transform_9(%arg0: i32) -> (i32, i32) {
    %c0_i32 = arith.constant 0 : i32
    %c0_i32_0 = arith.constant 0 : i32
    %c0_i32_1 = arith.constant 0 : i32
    return %c0_i32, %c0_i32_0 : i32, i32
  }
  func.func @transform_10(%arg0: i32) -> (i32, i32) {
    %c0_i32 = arith.constant 0 : i32
    %c0_i32_0 = arith.constant 0 : i32
    %c0_i32_1 = arith.constant 0 : i32
    return %c0_i32, %c0_i32_0 : i32, i32
  }
  func.func @transform_11(%arg0: i32) -> (i32, i32) {
    %c0_i32 = arith.constant 0 : i32
    %c0_i32_0 = arith.constant 0 : i32
    %c0_i32_1 = arith.constant 0 : i32
    return %c0_i32, %c0_i32_0 : i32, i32
  }
  func.func @transform_12(%arg0: i32) -> (i32, i32) {
    %c0_i32 = arith.constant 0 : i32
    %c0_i32_0 = arith.constant 0 : i32
    %c0_i32_1 = arith.constant 0 : i32
    return %c0_i32, %c0_i32_0 : i32, i32
  }
  func.func @transform_13(%arg0: i32) -> (i32, i32) {
    %c0_i32 = arith.constant 0 : i32
    %c0_i32_0 = arith.constant 0 : i32
    %c0_i32_1 = arith.constant 0 : i32
    return %c0_i32, %c0_i32_0 : i32, i32
  }
  func.func @transform_14(%arg0: i32) -> (i32, i32) {
    %c0_i32 = arith.constant 0 : i32
    %c0_i32_0 = arith.constant 0 : i32
    %c0_i32_1 = arith.constant 0 : i32
    return %c0_i32, %c0_i32_0 : i32, i32
  }
  func.func @transform_15(%arg0: i32) -> (i32, i32) {
    %c0_i32 = arith.constant 0 : i32
    %c0_i32_0 = arith.constant 0 : i32
    %c0_i32_1 = arith.constant 0 : i32
    return %c0_i32, %c0_i32_0 : i32, i32
  }
  func.func @transform_16(%arg0: i32) -> (i32, i32) {
    %c0_i32 = arith.constant 0 : i32
    %c0_i32_0 = arith.constant 0 : i32
    %c0_i32_1 = arith.constant 0 : i32
    return %c0_i32, %c0_i32_0 : i32, i32
  }
  func.func @transform_17(%arg0: i32) -> (i32, i32) {
    %c0_i32 = arith.constant 0 : i32
    %c0_i32_0 = arith.constant 0 : i32
    %c0_i32_1 = arith.constant 0 : i32
    return %c0_i32, %c0_i32_0 : i32, i32
  }
  func.func @transform_18(%arg0: i32) -> (i32, i32) {
    %c0_i32 = arith.constant 0 : i32
    %c0_i32_0 = arith.constant 0 : i32
    %c0_i32_1 = arith.constant 0 : i32
    return %c0_i32, %c0_i32_0 : i32, i32
  }
  func.func @transform_19(%arg0: i32) -> (i32, i32) {
    %c0_i32 = arith.constant 0 : i32
    %c0_i32_0 = arith.constant 0 : i32
    %c0_i32_1 = arith.constant 0 : i32
    return %c0_i32, %c0_i32_0 : i32, i32
  }
  func.func @transform_20(%arg0: i32) -> (i32, i32) {
    %c0_i32 = arith.constant 0 : i32
    %c0_i32_0 = arith.constant 0 : i32
    %c0_i32_1 = arith.constant 0 : i32
    return %c0_i32, %c0_i32_0 : i32, i32
  }
  func.func @transform_21(%arg0: i32) -> (i32, i32) {
    %c0_i32 = arith.constant 0 : i32
    %c0_i32_0 = arith.constant 0 : i32
    return %arg0, %c0_i32 : i32, i32
  }
}

</mosaic_0001>

<bundles_post_ra>
// kernel: tpu_custom_call.1
= control target key start
LH: loop header
LB: loop body
LE: loop exit
PB: predicated region body
PF: predicated region fallthrough
CT: control target
= control target key end

     0   :  { %s10260_s0 = inlined_call_operand.vmem [shape: f32[128,128], index: 0, kind: input, shape index: {}]   ;;  %s10261_s1 = inlined_call_operand.hbm [shape: bf16[128,1024], index: 1, kind: input, shape index: {}]   ;;  %s10262_s2 = inlined_call_operand.hbm [shape: f32[1,1024], index: 2, kind: input, shape index: {}]   ;;  %s10263_s3 = inlined_call_operand.hbm [shape: bf16[1024,512], index: 3, kind: input, shape index: {}]   ;;  %s10264_s4 = inlined_call_operand.hbm [shape: f32[1,512], index: 4, kind: input, shape index: {}]   ;;  %s10265_s5 = inlined_call_operand.hbm [shape: bf16[512,256], index: 5, kind: input, shape index: {}]   ;;  %s10266_s6 = inlined_call_operand.vmem [shape: f32[1,256], index: 6, kind: input, shape index: {}]   ;;  %s10267_s7 = inlined_call_operand.hbm [shape: bf16[256,128], index: 7, kind: input, shape index: {}]   ;;  %s10268_s8 = inlined_call_operand.hbm [shape: f32[1,128], index: 8, kind: input, shape index: {}]   ;;  %s10269_s9 = inlined_call_operand.vmem [shape: bf16[128,64], index: 9, kind: input, shape index: {}]   ;;  %s10270_s10 = inlined_call_operand.vmem [shape: f32[1,64], index: 10, kind: input, shape index: {}]   ;;  %s10271_s11 = inlined_call_operand.vmem [shape: bf16[64,32], index: 11, kind: input, shape index: {}]   ;;  %s10272_s12 = inlined_call_operand.vmem [shape: f32[1,32], index: 12, kind: input, shape index: {}]   ;;  %s10273_s13 = inlined_call_operand.vmem [shape: bf16[32,16], index: 13, kind: input, shape index: {}]   ;;  %s10274_s14 = inlined_call_operand.vmem [shape: f32[1,16], index: 14, kind: input, shape index: {}]   ;;  %s10275_s15 = inlined_call_operand.vmem [shape: bf16[16,128], index: 15, kind: input, shape index: {}]   ;;  %s10276_s16 = inlined_call_operand.vmem [shape: f32[1,128], index: 16, kind: input, shape index: {}]   ;;  %s10277_s17 = inlined_call_operand.vmem [shape: f32[1,512], index: 17, kind: input, shape index: {}]   ;;  %s10278_s18 = inlined_call_operand.vmem [shape: f32[1,512], index: 18, kind: input, shape index: {}]   ;;  %s10279_s19 = inlined_call_operand.vmem [shape: f32[1,128], index: 19, kind: input, shape index: {}]   ;;  %s10280_s20 = inlined_call_operand.vmem [shape: f32[1,128], index: 20, kind: input, shape index: {}]   ;;  %s10281_s21 = inlined_call_operand.hbm [shape: f32[128,128], index: 21, kind: output, shape index: {}]  }
   0x1   :  { %10402 = sst [smem:[#allocation52_spill]] %s10260_s0 }
   0x2   :  { %10403 = sst [smem:[#allocation53_spill]] %s10261_s1 }
   0x3   :  { %10404 = sst [smem:[#allocation54_spill]] %s10262_s2 }
   0x4   :  { %10405 = sst [smem:[#allocation55_spill]] %s10263_s3 }
   0x5   :  { %10406 = sst [smem:[#allocation56_spill]] %s10264_s4 }
   0x6   :  { %10407 = sst [smem:[#allocation57_spill]] %s10265_s5 }
   0x7   :  { %10408 = sst [smem:[#allocation58_spill]] %s10281_s21 }
   0x8   :  { %26 = vsyncpa [#allocation3], 0 }
   0x9   :  { %27 = vsyncpa [#allocation6], 0 }
   0xa   :  { %28 = vsyncpa [#allocation9], 0 }
   0xb   :  { %29 = vsyncpa [#allocation12], 0 }
   0xc   :  { %30 = vsyncpa [#allocation4], 0  ;;  %s8017_s2 = smov [#allocation5]   ;;  %s8018_s26 = smov [#allocation8]  }
   0xd   :  { %s51_s25 = sshll.u32 %s8017_s2, 4  ;;  %s73_s27 = sshll.u32 %s8018_s26, 4  ;;  %s52_s25 = int_to_ptr.vmem [resolvable:$true] %s51_s25  ;;  %s74_s27 = int_to_ptr.vmem [resolvable:$true] %s73_s27 }
   0xe   :  { %s10409_s29 = sld [smem:[#allocation54_spill]] }
  0x14   :  { %s7831_s0 = scalar_lea.hbm %s10409_s29, 128 }
  0x15   :  { %p7832_p0 = scmp.ne.s32.totalorder %s10409_s29, %s7831_s0  ;;  %p7835_p1 = scmp.lt.u32.totalorder %s7831_s0, %s10409_s29 }
  0x17   :  { %p7837_p2 = pnand %p7835_p1, %p7832_p0 }
  0x19   :  { %7840 = shalt.err (!%p7837_p2)
}
  0x1a   :  { %s7841_s23 = scalar_lea.vmem %s52_s25, 128  ;;  %p7846_p4 = scmp.lt.s32.totalorder %s52_s25, %s52_s25 }
  0x1b   :  { %p7842_p3 = scmp.ne.s32.totalorder %s52_s25, %s7841_s23  ;;  %p7847_p5 = scmp.lt.s32.totalorder %s7841_s23, %s7841_s23 }
  0x1d   :  { %p7848_p6 = por %p7847_p5, %p7846_p4 }
  0x1f   :  { %p7849_p7 = pnand %p7848_p6, %p7842_p3 }
  0x21   :  { %7852 = shalt.err (!%p7849_p7)
}
  0x22   :  { %54 = dma.hbm_to_vmem [thread:$0]  %s10409_s29, 128, %s52_s25, [#allocation6]  }
  0x23   :  { %s10410_s3 = sld [smem:[#allocation56_spill]] }
  0x29   :  { %s7853_s28 = scalar_lea.hbm %s10410_s3, 64 }
  0x2a   :  { %p7854_p8 = scmp.ne.s32.totalorder %s10410_s3, %s7853_s28  ;;  %p7857_p9 = scmp.lt.u32.totalorder %s7853_s28, %s10410_s3 }
  0x2c   :  { %p7859_p10 = pnand %p7857_p9, %p7854_p8 }
  0x2e   :  { %7862 = shalt.err (!%p7859_p10)
}
  0x2f   :  { %s7863_s22 = scalar_lea.vmem %s74_s27, 64  ;;  %p7868_p12 = scmp.lt.s32.totalorder %s74_s27, %s74_s27 }
  0x30   :  { %p7864_p11 = scmp.ne.s32.totalorder %s74_s27, %s7863_s22  ;;  %p7869_p13 = scmp.lt.s32.totalorder %s7863_s22, %s7863_s22 }
  0x32   :  { %p7870_p0 = por %p7869_p13, %p7868_p12 }
  0x34   :  { %p7871_p1 = pnand %p7870_p0, %p7864_p11 }
  0x36   :  { %7874 = shalt.err (!%p7871_p1)
}
  0x37   :  { %76 = dma.hbm_to_vmem [thread:$0]  %s10410_s3, 64, %s74_s27, [#allocation9]  }
  0x38   :  { %s8019_s23 = smov [#allocation11]   ;;  %s7875_s26 = scalar_lea.hbm %s10267_s7, 2048 }
  0x39   :  { %s96_s1 = sshll.u32 %s8019_s23, 4  ;;  %p7876_p2 = scmp.ne.s32.totalorder %s10267_s7, %s7875_s26  ;;  %s97_s1 = int_to_ptr.vmem [resolvable:$true] %s96_s1 }
  0x3a   :  { %p7879_p3 = scmp.lt.u32.totalorder %s7875_s26, %s10267_s7 }
  0x3c   :  { %p7881_p4 = pnand %p7879_p3, %p7876_p2 }
  0x3e   :  { %7884 = shalt.err (!%p7881_p4)
}
  0x3f   :  { %s7885_s5 = scalar_lea.vmem %s97_s1, 2048  ;;  %p7890_p6 = scmp.lt.s32.totalorder %s97_s1, %s97_s1 }
  0x40   :  { %p7886_p5 = scmp.ne.s32.totalorder %s97_s1, %s7885_s5  ;;  %p7891_p7 = scmp.lt.s32.totalorder %s7885_s5, %s7885_s5 }
  0x42   :  { %p7892_p8 = por %p7891_p7, %p7890_p6 }
  0x44   :  { %p7893_p9 = pnand %p7892_p8, %p7886_p5 }
  0x46   :  { %7896 = shalt.err (!%p7893_p9)
}
  0x47   :  { %s8020_s27 = smov 64   ;;  %s8021_s3 = smov 4  }
  0x48   :  { %102 = dma.hbm_to_vmem [thread:$0]  %s10267_s7, 2048, %s97_s1, [#allocation12], %s8020_s27, %s8020_s27, %s8021_s3  }
  0x49   :  { %s8022_s29 = smov [#allocation2]   ;;  %s10411_s26 = sld [smem:[#allocation53_spill]] }
  0x4a   :  { %s38_s23 = sshll.u32 %s8022_s29, 4  ;;  %s39_s23 = int_to_ptr.vmem [resolvable:$true] %s38_s23 }
  0x4f   :  { %s7897_s28 = scalar_lea.hbm %s10411_s26, 8192 }
  0x50   :  { %p7898_p10 = scmp.ne.s32.totalorder %s10411_s26, %s7897_s28  ;;  %p7901_p11 = scmp.lt.u32.totalorder %s7897_s28, %s10411_s26 }
  0x52   :  { %p7903_p12 = pnand %p7901_p11, %p7898_p10 }
  0x54   :  { %7906 = shalt.err (!%p7903_p12)
}
  0x55   :  { %s7907_s21 = scalar_lea.vmem %s39_s23, 8192  ;;  %p7912_p0 = scmp.lt.s32.totalorder %s39_s23, %s39_s23 }
  0x56   :  { %p7908_p13 = scmp.ne.s32.totalorder %s39_s23, %s7907_s21  ;;  %p7913_p1 = scmp.lt.s32.totalorder %s7907_s21, %s7907_s21 }
  0x58   :  { %p7914_p2 = por %p7913_p1, %p7912_p0 }
  0x5a   :  { %p7915_p3 = pnand %p7914_p2, %p7908_p13 }
  0x5c   :  { %7918 = shalt.err (!%p7915_p3)
}
  0x5d   :  { %s8023_s7 = smov 512   ;;  %s8024_s1 = smov 32  }
  0x5e   :  { %44 = dma.hbm_to_vmem [thread:$0]  %s10411_s26, 8192, %s39_s23, [#allocation3], %s8023_s7, %s8023_s7, %s8024_s1  }
  0x5f   :  { %s8025_s22 = smov [#allocation7]   ;;  %s10412_s2 = sld [smem:[#allocation55_spill]] }
  0x60   :  { %s60_s25 = sshll.u32 %s8025_s22, 4  ;;  %s61_s25 = int_to_ptr.vmem [resolvable:$true] %s60_s25 }
  0x65   :  { %s7919_s28 = scalar_lea.hbm %s10412_s2, 32768 }
  0x66   :  { %p7920_p4 = scmp.ne.s32.totalorder %s10412_s2, %s7919_s28  ;;  %p7923_p5 = scmp.lt.u32.totalorder %s7919_s28, %s10412_s2 }
  0x68   :  { %p7925_p6 = pnand %p7923_p5, %p7920_p4 }
  0x6a   :  { %7928 = shalt.err (!%p7925_p6)
}
  0x6b   :  { %s7929_s5 = scalar_lea.vmem %s61_s25, 32768  ;;  %p7934_p8 = scmp.lt.s32.totalorder %s61_s25, %s61_s25 }
  0x6c   :  { %p7930_p7 = scmp.ne.s32.totalorder %s61_s25, %s7929_s5  ;;  %p7935_p9 = scmp.lt.s32.totalorder %s7929_s5, %s7929_s5 }
  0x6e   :  { %p7936_p10 = por %p7935_p9, %p7934_p8 }
  0x70   :  { %p7937_p11 = pnand %p7936_p10, %p7930_p7 }
  0x72   :  { %7940 = shalt.err (!%p7937_p11)
}
  0x73   :  { %s8026_s23 = smov 256   ;;  %s8027_s26 = smov 16  }
  0x74   :  { %66 = dma.hbm_to_vmem [thread:$0]  %s10412_s2, 32768, %s61_s25, [#allocation6], %s8026_s23, %s8026_s23, %s8027_s26  }
  0x75   :  { %s8028_s27 = smov [#allocation10]   ;;  %s10413_s24 = sld [smem:[#allocation57_spill]] }
  0x76   :  { %s82_s3 = sshll.u32 %s8028_s27, 4  ;;  %s83_s3 = int_to_ptr.vmem [resolvable:$true] %s82_s3 }
  0x7b   :  { %s7941_s28 = scalar_lea.hbm %s10413_s24, 8192 }
  0x7c   :  { %p7942_p12 = scmp.ne.s32.totalorder %s10413_s24, %s7941_s28  ;;  %p7945_p13 = scmp.lt.u32.totalorder %s7941_s28, %s10413_s24 }
  0x7e   :  { %p7947_p0 = pnand %p7945_p13, %p7942_p12 }
  0x80   :  { %7950 = shalt.err (!%p7947_p0)
}
  0x81   :  { %s7951_s5 = scalar_lea.vmem %s83_s3, 8192  ;;  %p7956_p2 = scmp.lt.s32.totalorder %s83_s3, %s83_s3 }
  0x82   :  { %p7952_p1 = scmp.ne.s32.totalorder %s83_s3, %s7951_s5  ;;  %p7957_p3 = scmp.lt.s32.totalorder %s7951_s5, %s7951_s5 }
  0x84   :  { %p7958_p4 = por %p7957_p3, %p7956_p2 }
  0x86   :  { %p7959_p5 = pnand %p7958_p4, %p7952_p1 }
  0x88   :  { %7962 = shalt.err (!%p7959_p5)
}
  0x89   :  { %s8029_s25 = smov 128   ;;  %s8030_s2 = smov 8  }
  0x8a   :  { %88 = dma.hbm_to_vmem [thread:$0]  %s10413_s24, 8192, %s83_s3, [#allocation9], %s8029_s25, %s8029_s25, %s8030_s2  }
  0x8b   :  { %s8031_s7 = smov [#allocation13]   ;;  %s7963_s29 = scalar_lea.hbm %s10268_s8, 16 }
  0x8c   :  { %s109_s1 = sshll.u32 %s8031_s7, 4  ;;  %p7964_p6 = scmp.ne.s32.totalorder %s10268_s8, %s7963_s29  ;;  %s110_s1 = int_to_ptr.vmem [resolvable:$true] %s109_s1 }
  0x8d   :  { %p7967_p7 = scmp.lt.u32.totalorder %s7963_s29, %s10268_s8 }
  0x8f   :  { %p7969_p8 = pnand %p7967_p7, %p7964_p6 }
  0x91   :  { %7972 = shalt.err (!%p7969_p8)
}
  0x92   :  { %s7973_s0 = scalar_lea.vmem %s110_s1, 16  ;;  %s7977_s3 = scalar_lea.vmem %s110_s1, 32 }
  0x93   :  { %p7974_p9 = scmp.ne.s32.totalorder %s110_s1, %s7973_s0  ;;  %p7978_p10 = scmp.lt.s32.totalorder %s110_s1, %s110_s1 }
  0x94   :  { %p7979_p11 = scmp.lt.s32.totalorder %s7977_s3, %s7973_s0 }
  0x96   :  { %p7980_p12 = por %p7979_p11, %p7978_p10 }
  0x98   :  { %p7981_p13 = pnand %p7980_p12, %p7974_p9 }
  0x9a   :  { %7984 = shalt.err (!%p7981_p13)
}
  0x9b   :  { %112 = dma.hbm_to_vmem [thread:$0]  %s10268_s8, 16, %s110_s1, [#allocation12]  }
  0x9c   :  { %8007 = dma.done.wait [#allocation3], 8192  }
  0x9d   :  { %8008 = vsyncadd [#allocation3], 4294959104 }
  0x9e   :  { %8009 = dma.done.wait [#allocation6], 32896  }
  0x9f   :  { %8010 = vsyncadd [#allocation6], 4294934400 }
  0xa0   :  { %8011 = dma.done.wait [#allocation9], 8256  }
  0xa1   :  { %8012 = vsyncadd [#allocation9], 4294959040 }
  0xa2   :  { %8013 = dma.done.wait [#allocation12], 2064  }
  0xa3   :  { %8014 = vsyncadd [#allocation12], 4294965232  ;;  %v8032_v0 = vmov 0   ;;  %v183_v1 = vld [vmem:[#allocation2] sm:$0xff]  ;;  %v184_v15 = vld [vmem:[#allocation2 + $0x8] sm:$0xff]  ;;  %s10414_s26 = sld [smem:[#allocation52_spill]] }
  0xa4   :  { %641 = vmatprep.mubr.bf16.mxu0 %v8032_v0  ;;  %754 = vmatprep.mubr.bf16.mxu1 %v8032_v0  ;;  %v187_v2 = vld [vmem:[#allocation2 + $0x20] sm:$0xff]  ;;  %v188_v16 = vld [vmem:[#allocation2 + $0x28] sm:$0xff]  ;;  %v185_v57 = vld [vmem:[#allocation2 + $0x10] sm:$0xff]  ;;  %vm5780_vm0 = vcmask 523264   ;;  %vm5949_vm1 = vcmask 261120   ;;  %vm6110_vm2 = vcmask 130048  }
  0xa5   :  { %v191_v3 = vld [vmem:[#allocation2 + $0x40] sm:$0xff]  ;;  %v6269_v4 = vcombine.high %v183_v1, %v187_v2  ;;  %v6268_v5 = vcombine.low %v183_v1, %v187_v2  ;;  %v6271_v19 = vcombine.high %v184_v15, %v188_v16  ;;  %v6270_v20 = vcombine.low %v184_v15, %v188_v16  ;;  %v192_v21 = vld [vmem:[#allocation2 + $0x48] sm:$0xff]  ;;  %v189_v58 = vld [vmem:[#allocation2 + $0x30] sm:$0xff] }
  0xa6   :  { %v195_v6 = vld [vmem:[#allocation2 + $0x60] sm:$0xff]  ;;  %v196_v22 = vld [vmem:[#allocation2 + $0x68] sm:$0xff]  ;;  %v6273_v1 = vcombine.high %v185_v57, %v189_v58  ;;  %v205_v15 = vld [vmem:[#allocation2 + $0xb0] sm:$0xff] }
  0xa7   :  { %v6277_v7 = vcombine.high %v191_v3, %v195_v6  ;;  %v199_v8 = vld [vmem:[#allocation2 + $0x80] sm:$0xff]  ;;  %609 = vmatprep.subr.bf16.mxu0 %v6269_v4  ;;  %v6276_v10 = vcombine.low %v191_v3, %v195_v6  ;;  %v6279_v24 = vcombine.high %v192_v21, %v196_v22  ;;  %v200_v25 = vld [vmem:[#allocation2 + $0x88] sm:$0xff]  ;;  %722 = vmatprep.subr.bf16.mxu1 %v6271_v19  ;;  %v197_v6 = vld [vmem:[#allocation2 + $0x70] sm:$0xff] }
  0xa8   :  { %v203_v9 = vld [vmem:[#allocation2 + $0xa0] sm:$0xff]  ;;  %610 = vmatpush1.bf16.msra.mxu0 %v6268_v5  ;;  %v204_v26 = vld [vmem:[#allocation2 + $0xa8] sm:$0xff]  ;;  %723 = vmatpush1.bf16.msra.mxu1 %v6270_v20  ;;  %v6278_v28 = vcombine.low %v192_v21, %v196_v22  ;;  %v193_v5 = vld [vmem:[#allocation2 + $0x50] sm:$0xff] }
  0xa9   :  { %611 = vmatprep.subr.bf16.mxu0 %v6277_v7  ;;  %v6285_v11 = vcombine.high %v199_v8, %v203_v9  ;;  %v207_v12 = vld [vmem:[#allocation2 + $0xc0] sm:$0xff]  ;;  %v6284_v14 = vcombine.low %v199_v8, %v203_v9  ;;  %724 = vmatprep.subr.bf16.mxu1 %v6279_v24  ;;  %v6287_v31 = vcombine.high %v200_v25, %v204_v26  ;;  %v208_v33 = vld [vmem:[#allocation2 + $0xc8] sm:$0xff]  ;;  %v162_v16 = vld [vmem:[%s10414_s26 + $0x18] sm:$0xff] }
  0xaa   :  { %v211_v13 = vld [vmem:[#allocation2 + $0xe0] sm:$0xff]  ;;  %v212_v34 = vld [vmem:[#allocation2 + $0xe8] sm:$0xff]  ;;  %v6286_v36 = vcombine.low %v200_v25, %v204_v26  ;;  %v6272_v9 = vcombine.low %v185_v57, %v189_v58  ;;  %v209_v21 = vld [vmem:[#allocation2 + $0xd0] sm:$0xff] }
  0xab   :  { %v6293_v17 = vcombine.high %v207_v12, %v211_v13  ;;  %v215_v18 = vld [vmem:[#allocation2 + $0x100] sm:$0xff]  ;;  %v6292_v27 = vcombine.low %v207_v12, %v211_v13  ;;  %v6295_v39 = vcombine.high %v208_v33, %v212_v34  ;;  %v216_v41 = vld [vmem:[#allocation2 + $0x108] sm:$0xff]  ;;  %v6294_v44 = vcombine.low %v208_v33, %v212_v34  ;;  %v186_v12 = vld [vmem:[#allocation2 + $0x18] sm:$0xff] }
  0xac   :  { %612 = vmatpush1.bf16.msra.mxu0 %v6276_v10  ;;  %v219_v23 = vld [vmem:[#allocation2 + $0x120] sm:$0xff]  ;;  %725 = vmatpush1.bf16.msra.mxu1 %v6278_v28  ;;  %v220_v42 = vld [vmem:[#allocation2 + $0x128] sm:$0xff]  ;;  %v161_v10 = vld [vmem:[%s10414_s26 + $0x10] sm:$0xff] }
  0xad   :  { %613 = vmatprep.subr.bf16.mxu0 %v6285_v11  ;;  %v6301_v29 = vcombine.high %v215_v18, %v219_v23  ;;  %v223_v30 = vld [vmem:[#allocation2 + $0x140] sm:$0xff]  ;;  %v6300_v35 = vcombine.low %v215_v18, %v219_v23  ;;  %726 = vmatprep.subr.bf16.mxu1 %v6287_v31  ;;  %v6303_v47 = vcombine.high %v216_v41, %v220_v42  ;;  %v224_v49 = vld [vmem:[#allocation2 + $0x148] sm:$0xff]  ;;  %v190_v13 = vld [vmem:[#allocation2 + $0x38] sm:$0xff] }
  0xae   :  { %v227_v32 = vld [vmem:[#allocation2 + $0x160] sm:$0xff]  ;;  %v228_v50 = vld [vmem:[#allocation2 + $0x168] sm:$0xff]  ;;  %v6302_v52 = vcombine.low %v216_v41, %v220_v42  ;;  %v6281_v11 = vcombine.high %v193_v5, %v197_v6  ;;  %v6280_v18 = vcombine.low %v193_v5, %v197_v6  ;;  %v6275_v19 = vcombine.high %v186_v12, %v190_v13  ;;  %v213_v22 = vld [vmem:[#allocation2 + $0xf0] sm:$0xff] }
  0xaf   :  { %v6309_v37 = vcombine.high %v223_v30, %v227_v32  ;;  %v231_v38 = vld [vmem:[#allocation2 + $0x180] sm:$0xff]  ;;  %v6308_v43 = vcombine.low %v223_v30, %v227_v32  ;;  %v6311_v54 = vcombine.high %v224_v49, %v228_v50  ;;  %v232_v55 = vld [vmem:[#allocation2 + $0x188] sm:$0xff]  ;;  %v6310_v62 = vcombine.low %v224_v49, %v228_v50  ;;  %v194_v24 = vld [vmem:[#allocation2 + $0x58] sm:$0xff] }
  0xb0   :  { %614 = vmatpush1.bf16.msra.mxu0 %v6284_v14  ;;  %v235_v40 = vld [vmem:[#allocation2 + $0x1a0] sm:$0xff]  ;;  %727 = vmatpush1.bf16.msra.mxu1 %v6286_v36  ;;  %v236_v56 = vld [vmem:[#allocation2 + $0x1a8] sm:$0xff]  ;;  %v201_v14 = vld [vmem:[#allocation2 + $0x90] sm:$0xff]  ;;  %v8249_v23 = vpack.c.bf16 %v162_v16, %v161_v10  ;;  %v6296_v36 = vcombine.low %v209_v21, %v213_v22 }
  0xb1   :  { %615 = vmatprep.subr.bf16.mxu0 %v6293_v17  ;;  %v6317_v45 = vcombine.high %v231_v38, %v235_v40  ;;  %v239_v46 = vld [vmem:[#allocation2 + $0x1c0] sm:$0xff]  ;;  %728 = vmatprep.subr.bf16.mxu1 %v6295_v39  ;;  %v6316_v51 = vcombine.low %v231_v38, %v235_v40  ;;  %v160_v61 = vld [vmem:[%s10414_s26 + $0x8] sm:$0xff]  ;;  %v6319_v63 = vcombine.high %v232_v55, %v236_v56  ;;  %v198_v25 = vld [vmem:[#allocation2 + $0x78] sm:$0xff] }
  0xb2   :  { %v243_v48 = vld [vmem:[#allocation2 + $0x1e0] sm:$0xff]  ;;  %v240_v2 = vld [vmem:[#allocation2 + $0x1c8] sm:$0xff]  ;;  %v6318_v7 = vcombine.low %v232_v55, %v236_v56  ;;  %v6289_v20 = vcombine.high %v201_v14, %v205_v15  ;;  %v6288_v26 = vcombine.low %v201_v14, %v205_v15  ;;  %v217_v30 = vld [vmem:[#allocation2 + $0x110] sm:$0xff]  ;;  %v6283_v32 = vcombine.high %v194_v24, %v198_v25 }
  0xb3   :  { %v6325_v53 = vcombine.high %v239_v46, %v243_v48  ;;  %v159_v59 = vld [vmem:[%s10414_s26] sm:$0xff]  ;;  %v6324_v60 = vcombine.low %v239_v46, %v243_v48  ;;  %v244_v3 = vld [vmem:[#allocation2 + $0x1e8] sm:$0xff]  ;;  %v221_v31 = vld [vmem:[#allocation2 + $0x130] sm:$0xff] }
  0xb4   :  { %616 = vmatpush1.bf16.msra.mxu0 %v6292_v27  ;;  %729 = vmatpush1.bf16.msra.mxu1 %v6294_v44  ;;  %v8239_v4 = vpack.c.bf16 %v160_v61, %v159_v59  ;;  %v6327_v8 = vcombine.high %v240_v2, %v244_v3  ;;  %v6326_v17 = vcombine.low %v240_v2, %v244_v3  ;;  %v163_v28 = vld [vmem:[%s10414_s26 + $0x20] sm:$0xff]  ;;  %v202_v33 = vld [vmem:[#allocation2 + $0x98] sm:$0xff]  ;;  %v225_v39 = vld [vmem:[#allocation2 + $0x150] sm:$0xff] }
  0xb5   :  { %617 = vmatprep.subr.bf16.mxu0 %v6301_v29  ;;  %730 = vmatprep.subr.bf16.mxu1 %v6303_v47  ;;  %v6274_v27 = vcombine.low %v186_v12, %v190_v13  ;;  %v6297_v29 = vcombine.high %v209_v21, %v213_v22  ;;  %v206_v34 = vld [vmem:[#allocation2 + $0xb8] sm:$0xff]  ;;  %v6305_v38 = vcombine.high %v217_v30, %v221_v31  ;;  %v229_v40 = vld [vmem:[#allocation2 + $0x170] sm:$0xff]  ;;  %v167_v3 = vld [vmem:[%s10414_s26 + $0x40] sm:$0xff] }
  0xb6   :  { %v6291_v41 = vcombine.high %v202_v33, %v206_v34  ;;  %v214_v44 = vld [vmem:[#allocation2 + $0xf8] sm:$0xff]  ;;  %v6290_v46 = vcombine.low %v202_v33, %v206_v34  ;;  %v165_v47 = vld [vmem:[%s10414_s26 + $0x30] sm:$0xff]  ;;  %v6313_v48 = vcombine.high %v225_v39, %v229_v40  ;;  %v6312_v55 = vcombine.low %v225_v39, %v229_v40 }
  0xb7   :  { %v233_v49 = vld [vmem:[#allocation2 + $0x190] sm:$0xff]  ;;  %v7258_v13 = vld [vmem:[#allocation7 + $0x4] ss:$16 sps:$4 sm:$0xff]   ;;  %v7262_v33 = vld [vmem:[#allocation7 + $0x20] ss:$16 sps:$4 sm:$0xff]  }
  0xb8   :  { %618 = vmatpush1.bf16.msra.mxu0 %v6300_v35  ;;  %731 = vmatpush1.bf16.msra.mxu1 %v6302_v52  ;;  %v164_v35 = vld [vmem:[%s10414_s26 + $0x28] sm:$0xff]  ;;  %v237_v50 = vld [vmem:[#allocation2 + $0x1b0] sm:$0xff]  ;;  %v218_v52 = vld [vmem:[#allocation2 + $0x118] sm:$0xff] }
  0xb9   :  { %619 = vmatprep.subr.bf16.mxu0 %v6309_v37  ;;  %732 = vmatprep.subr.bf16.mxu1 %v6311_v54  ;;  %v6282_v37 = vcombine.low %v194_v24, %v198_v25  ;;  %v8261_v42 = vpack.c.bf16 %v164_v35, %v163_v28  ;;  %v166_v54 = vld [vmem:[%s10414_s26 + $0x38] sm:$0xff]  ;;  %v6321_v57 = vcombine.high %v233_v49, %v237_v50  ;;  %v241_v58 = vld [vmem:[#allocation2 + $0x1d0] sm:$0xff]  ;;  %v171_v25 = vld [vmem:[%s10414_s26 + $0x60] sm:$0xff] }
  0xba   :  { %v245_v59 = vld [vmem:[#allocation2 + $0x1f0] sm:$0xff]  ;;  %v8273_v61 = vpack.c.bf16 %v166_v54, %v165_v47  ;;  %v242_v15 = vld [vmem:[#allocation2 + $0x1d8] sm:$0xff] }
  0xbb   :  { %v6329_v5 = vcombine.high %v241_v58, %v245_v59  ;;  %v6328_v10 = vcombine.low %v241_v58, %v245_v59  ;;  %v246_v16 = vld [vmem:[#allocation2 + $0x1f8] sm:$0xff]  ;;  %v7261_v21 = vld [vmem:[#allocation7 + $0xc] ss:$16 sps:$4 sm:$0xff]   ;;  %v7259_v35 = vld [vmem:[#allocation7 + $0x8] ss:$16 sps:$4 sm:$0xff]  }
  0xbc   :  { %620 = vmatpush1.bf16.msra.mxu0 %v6308_v43  ;;  %733 = vmatpush1.bf16.msra.mxu1 %v6310_v62  ;;  %v210_v43 = vld [vmem:[#allocation2 + $0xd8] sm:$0xff]  ;;  %v6330_v22 = vcombine.low %v242_v15, %v246_v16  ;;  %v173_v28 = vld [vmem:[%s10414_s26 + $0x70] sm:$0xff] }
  0xbd   :  { %621 = vmatprep.subr.bf16.mxu0 %v6317_v45  ;;  %734 = vmatprep.subr.bf16.mxu1 %v6319_v63  ;;  %v6304_v45 = vcombine.low %v217_v30, %v221_v31  ;;  %v6298_v56 = vcombine.low %v210_v43, %v214_v44  ;;  %v226_v62 = vld [vmem:[#allocation2 + $0x158] sm:$0xff]  ;;  %v7265_v39 = vld [vmem:[#allocation7 + $0x28] ss:$16 sps:$4 sm:$0xff]   ;;  %v7273_v40 = vld [vmem:[#allocation7 + $0x4c] ss:$16 sps:$4 sm:$0xff]  }
  0xbe   :  { %v230_v63 = vld [vmem:[#allocation2 + $0x178] sm:$0xff]  ;;  %v7277_v47 = vld [vmem:[#allocation7 + $0x68] ss:$16 sps:$4 sm:$0xff]   ;;  %v7297_v54 = vld [vmem:[#allocation7 + $0xcc] ss:$16 sps:$4 sm:$0xff]  }
  0xbf   :  { %v6315_v6 = vcombine.high %v226_v62, %v230_v63  ;;  %v7256_v31 = vld [vmem:[#allocation7] ss:$16 sps:$4 sm:$0xff]   ;;  %v7270_v34 = vld [vmem:[#allocation7 + $0x44] ss:$16 sps:$4 sm:$0xff]   ;;  %v7303_v58 = vld [vmem:[#allocation7 + $0xec] ss:$16 sps:$4 sm:$0xff]  }
  0xc0   :  { %622 = vmatpush1.bf16.msra.mxu0 %v6316_v51  ;;  %735 = vmatpush1.bf16.msra.mxu1 %v6318_v7  ;;  %v6299_v51 = vcombine.high %v210_v43, %v214_v44  ;;  %v234_v7 = vld [vmem:[#allocation2 + $0x198] sm:$0xff]  ;;  %v7271_v43 = vld [vmem:[#allocation7 + $0x48] ss:$16 sps:$4 sm:$0xff]   ;;  %v7279_v44 = vld [vmem:[#allocation7 + $0x6c] ss:$16 sps:$4 sm:$0xff]  }
  0xc1   :  { %623 = vmatprep.subr.bf16.mxu0 %v6325_v53  ;;  %736 = vmatprep.subr.bf16.mxu1 %v6327_v8  ;;  %v222_v53 = vld [vmem:[#allocation2 + $0x138] sm:$0xff] }
  0xc2   :  { %v6306_v2 = vcombine.low %v218_v52, %v222_v53  ;;  %v238_v8 = vld [vmem:[#allocation2 + $0x1b8] sm:$0xff] }
  0xc3   :  { %v6323_v12 = vcombine.high %v234_v7, %v238_v8  ;;  %v7306_v59 = vld [vmem:[#allocation7 + $0x104] ss:$16 sps:$4 sm:$0xff]  }
  0xc4   :  { %624 = vmatpush1.bf16.msra.mxu0 %v6324_v60  ;;  %737 = vmatpush1.bf16.msra.mxu1 %v6326_v17  ;;  %v6307_v60 = vcombine.high %v218_v52, %v222_v53  ;;  %v6322_v17 = vcombine.low %v234_v7, %v238_v8  ;;  %v7294_v52 = vld [vmem:[#allocation7 + $0xc4] ss:$16 sps:$4 sm:$0xff]   ;;  %v7292_v53 = vld [vmem:[#allocation7 + $0xc0] ss:$16 sps:$4 sm:$0xff]   ;;  %v7321_v7 = vld [vmem:[#allocation7 + $0x14c] ss:$16 sps:$4 sm:$0xff]  }
  0xc5   :  { %835 = vmatprep.subr.bf16.mxu0 %v6273_v1  ;;  %948 = vmatprep.subr.bf16.mxu1 %v6275_v19  ;;  %v6320_v1 = vcombine.low %v233_v49, %v237_v50  ;;  %v170_v19 = vld [vmem:[%s10414_s26 + $0x58] sm:$0xff]  ;;  %v7283_v49 = vld [vmem:[#allocation7 + $0x88] ss:$16 sps:$4 sm:$0xff]  }
  0xc6   :  { %v7286_v50 = vld [vmem:[#allocation7 + $0xa0] ss:$16 sps:$4 sm:$0xff]   ;;  %v7324_v8 = vld [vmem:[#allocation7 + $0x164] ss:$16 sps:$4 sm:$0xff]  }
  0xc7   :  { %642 = vmatmul.mubr.bf16.vlgmr.msra.gmra.mrb[0].mxu0 %v8239_v4  ;;  %755 = vmatmul.mubr.bf16.vlgmr.msra.gmra.mrb[0].mxu1 %v8239_v4 }
  0xc8   :  { %651 = vmatprep.mubr.bf16.mxu0 %v8032_v0  ;;  %836 = vmatpush1.bf16.msra.mxu0 %v6272_v9  ;;  %v168_v9 = vld [vmem:[%s10414_s26 + $0x48] sm:$0xff] }
  0xc9   :  { %837 = vmatprep.subr.bf16.mxu0 %v6281_v11  ;;  %764 = vmatprep.mubr.bf16.mxu1 %v8032_v0  ;;  %v6314_v11 = vcombine.low %v226_v62, %v230_v63  ;;  %v8285_v14 = vpack.c.bf16 %v168_v9, %v167_v3  ;;  %v7309_v62 = vld [vmem:[#allocation7 + $0x10c] ss:$16 sps:$4 sm:$0xff]   ;;  %v7312_v63 = vld [vmem:[#allocation7 + $0x124] ss:$16 sps:$4 sm:$0xff]   ;;  %v7319_v9 = vld [vmem:[#allocation7 + $0x148] ss:$16 sps:$4 sm:$0xff]  }
  0xca   :  { %949 = vmatpush1.bf16.msra.mxu1 %v6274_v27  ;;  %v7315_v3 = vld [vmem:[#allocation7 + $0x12c] ss:$16 sps:$4 sm:$0xff]  }
  0xcb   :  { %950 = vmatprep.subr.bf16.mxu1 %v6283_v32  ;;  %v7264_v32 = vld [vmem:[#allocation7 + $0x24] ss:$16 sps:$4 sm:$0xff]  }
  0xcc   :  { %838 = vmatpush1.bf16.msra.mxu0 %v6280_v18  ;;  %v169_v18 = vld [vmem:[%s10414_s26 + $0x50] sm:$0xff] }
  0xcd   :  { %839 = vmatprep.subr.bf16.mxu0 %v6289_v20  ;;  %v6331_v20 = vcombine.high %v242_v15, %v246_v16  ;;  %v8297_v24 = vpack.c.bf16 %v170_v19, %v169_v18  ;;  %v7333_v15 = vld [vmem:[#allocation7 + $0x18c] ss:$16 sps:$4 sm:$0xff]   ;;  %v7336_v16 = vld [vmem:[#allocation7 + $0x1a4] ss:$16 sps:$4 sm:$0xff]   ;;  %v7334_v18 = vld [vmem:[#allocation7 + $0x1a0] ss:$16 sps:$4 sm:$0xff]  }
  0xce   :  { %951 = vmatpush1.bf16.msra.mxu1 %v6282_v37  ;;  %v7268_v37 = vld [vmem:[#allocation7 + $0x40] ss:$16 sps:$4 sm:$0xff]   ;;  %v7339_v19 = vld [vmem:[#allocation7 + $0x1ac] ss:$16 sps:$4 sm:$0xff]  }
  0xcf   :  { %652 = vmatmul.mubr.bf16.gmra.mrb[4].mxu0 %v8249_v23  ;;  %952 = vmatprep.subr.bf16.mxu1 %v6291_v41  ;;  %v7274_v41 = vld [vmem:[#allocation7 + $0x60] ss:$16 sps:$4 sm:$0xff]  }
  0xd0   :  { %661 = vmatprep.mubr.bf16.mxu0 %v8032_v0  ;;  %840 = vmatpush1.bf16.msra.mxu0 %v6288_v26  ;;  %v172_v26 = vld [vmem:[%s10414_s26 + $0x68] sm:$0xff] }
  0xd1   :  { %841 = vmatprep.subr.bf16.mxu0 %v6297_v29  ;;  %765 = vmatmul.mubr.bf16.gmra.mrb[4].mxu1 %v8249_v23  ;;  %v8309_v27 = vpack.c.bf16 %v172_v26, %v171_v25  ;;  %v174_v29 = vld [vmem:[%s10414_s26 + $0x78] sm:$0xff]  ;;  %v7343_v26 = vld [vmem:[#allocation7 + $0x1c8] ss:$16 sps:$4 sm:$0xff]  }
  0xd2   :  { %774 = vmatprep.mubr.bf16.mxu1 %v8032_v0  ;;  %953 = vmatpush1.bf16.msra.mxu1 %v6290_v46  ;;  %v8321_v30 = vpack.c.bf16 %v174_v29, %v173_v28  ;;  %v7280_v46 = vld [vmem:[#allocation7 + $0x80] ss:$16 sps:$4 sm:$0xff]   ;;  %v7348_v25 = vld [vmem:[#allocation7 + $0x1e4] ss:$16 sps:$4 sm:$0xff]   ;;  %v7351_v28 = vld [vmem:[#allocation7 + $0x1ec] ss:$16 sps:$4 sm:$0xff]  }
  0xd3   :  { %954 = vmatprep.subr.bf16.mxu1 %v6299_v51  ;;  %v7291_v51 = vld [vmem:[#allocation7 + $0xac] ss:$16 sps:$4 sm:$0xff]   ;;  %v7346_v29 = vld [vmem:[#allocation7 + $0x1e0] ss:$16 sps:$4 sm:$0xff]  }
  0xd4   :  { %842 = vmatpush1.bf16.msra.mxu0 %v6296_v36  ;;  %v7267_v36 = vld [vmem:[#allocation7 + $0x2c] ss:$16 sps:$4 sm:$0xff]  }
  0xd5   :  { %843 = vmatprep.subr.bf16.mxu0 %v6305_v38  ;;  %v7276_v38 = vld [vmem:[#allocation7 + $0x64] ss:$16 sps:$4 sm:$0xff]  }
  0xd6   :  { %955 = vmatpush1.bf16.msra.mxu1 %v6298_v56  ;;  %v7295_v56 = vld [vmem:[#allocation7 + $0xc8] ss:$16 sps:$4 sm:$0xff]  }
  0xd7   :  { %662 = vmatmul.mubr.bf16.gmra.mrb[8].mxu0 %v8261_v42  ;;  %956 = vmatprep.subr.bf16.mxu1 %v6307_v60  ;;  %v7304_v60 = vld [vmem:[#allocation7 + $0x100] ss:$16 sps:$4 sm:$0xff]  }
  0xd8   :  { %671 = vmatprep.mubr.bf16.mxu0 %v8032_v0  ;;  %844 = vmatpush1.bf16.msra.mxu0 %v6304_v45  ;;  %v7282_v45 = vld [vmem:[#allocation7 + $0x84] ss:$16 sps:$4 sm:$0xff]  }
  0xd9   :  { %845 = vmatprep.subr.bf16.mxu0 %v6313_v48  ;;  %775 = vmatmul.mubr.bf16.gmra.mrb[8].mxu1 %v8261_v42  ;;  %v7288_v48 = vld [vmem:[#allocation7 + $0xa4] ss:$16 sps:$4 sm:$0xff]  }
  0xda   :  { %784 = vmatprep.mubr.bf16.mxu1 %v8032_v0  ;;  %957 = vmatpush1.bf16.msra.mxu1 %v6306_v2  ;;  %v7310_v2 = vld [vmem:[#allocation7 + $0x120] ss:$16 sps:$4 sm:$0xff]  }
  0xdb   :  { %958 = vmatprep.subr.bf16.mxu1 %v6315_v6  ;;  %v7316_v6 = vld [vmem:[#allocation7 + $0x140] ss:$16 sps:$4 sm:$0xff]  }
  0xdc   :  { %846 = vmatpush1.bf16.msra.mxu0 %v6312_v55  ;;  %v7300_v55 = vld [vmem:[#allocation7 + $0xe4] ss:$16 sps:$4 sm:$0xff]  }
  0xdd   :  { %847 = vmatprep.subr.bf16.mxu0 %v6321_v57  ;;  %v7298_v57 = vld [vmem:[#allocation7 + $0xe0] ss:$16 sps:$4 sm:$0xff]  }
  0xde   :  { %959 = vmatpush1.bf16.msra.mxu1 %v6314_v11  ;;  %v7327_v11 = vld [vmem:[#allocation7 + $0x16c] ss:$16 sps:$4 sm:$0xff]  }
  0xdf   :  { %672 = vmatmul.mubr.bf16.gmra.mrb[12].mxu0 %v8273_v61  ;;  %960 = vmatprep.subr.bf16.mxu1 %v6323_v12  ;;  %v7330_v12 = vld [vmem:[#allocation7 + $0x184] ss:$16 sps:$4 sm:$0xff]  }
  0xe0   :  { %681 = vmatprep.mubr.bf16.mxu0 %v8032_v0  ;;  %848 = vmatpush1.bf16.msra.mxu0 %v6320_v1  ;;  %v7307_v1 = vld [vmem:[#allocation7 + $0x108] ss:$16 sps:$4 sm:$0xff]  }
  0xe1   :  { %849 = vmatprep.subr.bf16.mxu0 %v6329_v5  ;;  %785 = vmatmul.mubr.bf16.gmra.mrb[12].mxu1 %v8273_v61  ;;  %v7318_v5 = vld [vmem:[#allocation7 + $0x144] ss:$16 sps:$4 sm:$0xff]  }
  0xe2   :  { %794 = vmatprep.mubr.bf16.mxu1 %v8032_v0  ;;  %961 = vmatpush1.bf16.msra.mxu1 %v6322_v17  ;;  %v7331_v17 = vld [vmem:[#allocation7 + $0x188] ss:$16 sps:$4 sm:$0xff]  }
  0xe3   :  { %962 = vmatprep.subr.bf16.mxu1 %v6331_v20  ;;  %v7342_v20 = vld [vmem:[#allocation7 + $0x1c4] ss:$16 sps:$4 sm:$0xff]  }
  0xe4   :  { %850 = vmatpush1.bf16.msra.mxu0 %v6328_v10  ;;  %v7322_v10 = vld [vmem:[#allocation7 + $0x160] ss:$16 sps:$4 sm:$0xff]  }
  0xe5   :  { %2811 = vmatprep.subr.bf16.mxu0 %v7258_v13  ;;  %v7325_v13 = vld [vmem:[#allocation7 + $0x168] ss:$16 sps:$4 sm:$0xff]  }
  0xe6   :  { %963 = vmatpush1.bf16.msra.mxu1 %v6330_v22  ;;  %v7345_v22 = vld [vmem:[#allocation7 + $0x1cc] ss:$16 sps:$4 sm:$0xff]  }
  0xe7   :  { %682 = vmatmul.mubr.bf16.gmra.mrb[16].mxu0 %v8285_v14  ;;  %3263 = vmatprep.subr.bf16.mxu1 %v7261_v21  ;;  %v7337_v21 = vld [vmem:[#allocation7 + $0x1a8] ss:$16 sps:$4 sm:$0xff]  }
  0xe8   :  { %691 = vmatprep.mubr.bf16.mxu0 %v8032_v0 }
  0xe9   :  { %795 = vmatmul.mubr.bf16.gmra.mrb[16].mxu1 %v8285_v14 }
  0xea   :  { %804 = vmatprep.mubr.bf16.mxu1 %v8032_v0 }
  0xef   :  { %692 = vmatmul.mubr.bf16.gmra.mrb[20].mxu0 %v8297_v24 }
  0xf0   :  { %701 = vmatprep.mubr.bf16.mxu0 %v8032_v0 }
  0xf1   :  { %805 = vmatmul.mubr.bf16.gmra.mrb[20].mxu1 %v8297_v24 }
  0xf2   :  { %814 = vmatprep.mubr.bf16.mxu1 %v8032_v0 }
  0xf7   :  { %702 = vmatmul.mubr.bf16.gmra.mrb[24].mxu0 %v8309_v27 }
  0xf8   :  { %711 = vmatprep.mubr.bf16.mxu0 %v8032_v0 }
  0xf9   :  { %815 = vmatmul.mubr.bf16.gmra.mrb[24].mxu1 %v8309_v27 }
  0xfa   :  { %824 = vmatprep.mubr.bf16.mxu1 %v8032_v0 }
  0xff   :  { %712 = vmatmul.mubr.bf16.gmra.mrb[28].mxu0 %v8321_v30 }
 0x100   :  { %867 = vmatprep.mubr.bf16.mxu0 %v8032_v0 }
 0x101   :  { %825 = vmatmul.mubr.bf16.gmra.mrb[28].mxu1 %v8321_v30 }
 0x102   :  { %980 = vmatprep.mubr.bf16.mxu1 %v8032_v0 }
 0x107   :  { %868 = vmatmul.mubr.bf16.vlgmr.msra.gmra.mrb[32].mxu0 %v8239_v4 }
 0x108   :  { %877 = vmatprep.mubr.bf16.mxu0 %v8032_v0  ;;  %2812 = vmatpush1.bf16.msra.mxu0 %v7256_v31  ;;  %v7354_v31 = vld [vmem:[#allocation7 + $0x204] ss:$16 sps:$4 sm:$0xff]  }
 0x109   :  { %2813 = vmatprep.subr.bf16.mxu0 %v7264_v32  ;;  %981 = vmatmul.mubr.bf16.vlgmr.msra.gmra.mrb[32].mxu1 %v8239_v4  ;;  %v7285_v4 = vld [vmem:[#allocation7 + $0x8c] ss:$16 sps:$4 sm:$0xff]  }
 0x10a   :  { %3264 = vmatpush1.bf16.msra.mxu1 %v7259_v35  ;;  %990 = vmatprep.mubr.bf16.mxu1 %v8032_v0  ;;  %v7357_v32 = vld [vmem:[#allocation7 + $0x20c] ss:$16 sps:$4 sm:$0xff]  }
 0x10b   :  { %3265 = vmatprep.subr.bf16.mxu1 %v7267_v36  ;;  %v8364_v35 = vld [vmem:[#allocation5] sm:$0xff] }
 0x10c   :  { %2814 = vmatpush1.bf16.msra.mxu0 %v7262_v33 }
 0x10d   :  { %2815 = vmatprep.subr.bf16.mxu0 %v7270_v34 }
 0x10e   :  { %3266 = vmatpush1.bf16.msra.mxu1 %v7265_v39 }
 0x10f   :  { %878 = vmatmul.mubr.bf16.gmra.mrb[36].mxu0 %v8249_v23  ;;  %3267 = vmatprep.subr.bf16.mxu1 %v7273_v40 }
 0x110   :  { %887 = vmatprep.mubr.bf16.mxu0 %v8032_v0  ;;  %2816 = vmatpush1.bf16.msra.mxu0 %v7268_v37 }
 0x111   :  { %2817 = vmatprep.subr.bf16.mxu0 %v7276_v38  ;;  %991 = vmatmul.mubr.bf16.gmra.mrb[36].mxu1 %v8249_v23  ;;  %v7289_v23 = vld [vmem:[#allocation7 + $0xa8] ss:$16 sps:$4 sm:$0xff]  }
 0x112   :  { %3268 = vmatpush1.bf16.msra.mxu1 %v7271_v43  ;;  %1000 = vmatprep.mubr.bf16.mxu1 %v8032_v0 }
 0x113   :  { %3269 = vmatprep.subr.bf16.mxu1 %v7279_v44 }
 0x114   :  { %2818 = vmatpush1.bf16.msra.mxu0 %v7274_v41 }
 0x115   :  { %2819 = vmatprep.subr.bf16.mxu0 %v7282_v45 }
 0x116   :  { %3270 = vmatpush1.bf16.msra.mxu1 %v7277_v47 }
 0x117   :  { %888 = vmatmul.mubr.bf16.gmra.mrb[40].mxu0 %v8261_v42  ;;  %3271 = vmatprep.subr.bf16.mxu1 %v7285_v4 }
 0x118   :  { %897 = vmatprep.mubr.bf16.mxu0 %v8032_v0  ;;  %2820 = vmatpush1.bf16.msra.mxu0 %v7280_v46 }
 0x119   :  { %2821 = vmatprep.subr.bf16.mxu0 %v7288_v48  ;;  %1001 = vmatmul.mubr.bf16.gmra.mrb[40].mxu1 %v8261_v42  ;;  %v7301_v42 = vld [vmem:[#allocation7 + $0xe8] ss:$16 sps:$4 sm:$0xff]  }
 0x11a   :  { %3272 = vmatpush1.bf16.msra.mxu1 %v7283_v49  ;;  %1010 = vmatprep.mubr.bf16.mxu1 %v8032_v0 }
 0x11b   :  { %3273 = vmatprep.subr.bf16.mxu1 %v7291_v51 }
 0x11c   :  { %2822 = vmatpush1.bf16.msra.mxu0 %v7286_v50 }
 0x11d   :  { %2823 = vmatprep.subr.bf16.mxu0 %v7294_v52 }
 0x11e   :  { %3274 = vmatpush1.bf16.msra.mxu1 %v7289_v23 }
 0x11f   :  { %898 = vmatmul.mubr.bf16.gmra.mrb[44].mxu0 %v8273_v61  ;;  %3275 = vmatprep.subr.bf16.mxu1 %v7297_v54 }
 0x120   :  { %907 = vmatprep.mubr.bf16.mxu0 %v8032_v0  ;;  %2824 = vmatpush1.bf16.msra.mxu0 %v7292_v53 }
 0x121   :  { %2825 = vmatprep.subr.bf16.mxu0 %v7300_v55  ;;  %1011 = vmatmul.mubr.bf16.gmra.mrb[44].mxu1 %v8273_v61  ;;  %v7313_v61 = vld [vmem:[#allocation7 + $0x128] ss:$16 sps:$4 sm:$0xff]  }
 0x122   :  { %3276 = vmatpush1.bf16.msra.mxu1 %v7295_v56  ;;  %1020 = vmatprep.mubr.bf16.mxu1 %v8032_v0  ;;  %v7352_v56 = vld [vmem:[#allocation7 + $0x200] ss:$16 sps:$4 sm:$0xff]  }
 0x123   :  { %3277 = vmatprep.subr.bf16.mxu1 %v7303_v58 }
 0x124   :  { %2826 = vmatpush1.bf16.msra.mxu0 %v7298_v57  ;;  %v7355_v57 = vld [vmem:[#allocation7 + $0x208] ss:$16 sps:$4 sm:$0xff]  }
 0x125   :  { %2827 = vmatprep.subr.bf16.mxu0 %v7306_v59 }
 0x126   :  { %3278 = vmatpush1.bf16.msra.mxu1 %v7301_v42 }
 0x127   :  { %908 = vmatmul.mubr.bf16.gmra.mrb[48].mxu0 %v8285_v14  ;;  %3279 = vmatprep.subr.bf16.mxu1 %v7309_v62  ;;  %v7363_v62 = vld [vmem:[#allocation7 + $0x22c] ss:$16 sps:$4 sm:$0xff]  }
 0x128   :  { %917 = vmatprep.mubr.bf16.mxu0 %v8032_v0  ;;  %2828 = vmatpush1.bf16.msra.mxu0 %v7304_v60  ;;  %v7360_v60 = vld [vmem:[#allocation7 + $0x224] ss:$16 sps:$4 sm:$0xff]  }
 0x129   :  { %2829 = vmatprep.subr.bf16.mxu0 %v7312_v63  ;;  %1021 = vmatmul.mubr.bf16.gmra.mrb[48].mxu1 %v8285_v14  ;;  %v7328_v14 = vld [vmem:[#allocation7 + $0x180] ss:$16 sps:$4 sm:$0xff]  }
 0x12a   :  { %3280 = vmatpush1.bf16.msra.mxu1 %v7307_v1  ;;  %1030 = vmatprep.mubr.bf16.mxu1 %v8032_v0 }
 0x12b   :  { %3281 = vmatprep.subr.bf16.mxu1 %v7315_v3 }
 0x12c   :  { %2830 = vmatpush1.bf16.msra.mxu0 %v7310_v2 }
 0x12d   :  { %2831 = vmatprep.subr.bf16.mxu0 %v7318_v5 }
 0x12e   :  { %3282 = vmatpush1.bf16.msra.mxu1 %v7313_v61 }
 0x12f   :  { %918 = vmatmul.mubr.bf16.gmra.mrb[52].mxu0 %v8297_v24  ;;  %3283 = vmatprep.subr.bf16.mxu1 %v7321_v7 }
 0x130   :  { %927 = vmatprep.mubr.bf16.mxu0 %v8032_v0  ;;  %2832 = vmatpush1.bf16.msra.mxu0 %v7316_v6 }
 0x131   :  { %2833 = vmatprep.subr.bf16.mxu0 %v7324_v8  ;;  %1031 = vmatmul.mubr.bf16.gmra.mrb[52].mxu1 %v8297_v24  ;;  %v7340_v24 = vld [vmem:[#allocation7 + $0x1c0] ss:$16 sps:$4 sm:$0xff]  }
 0x132   :  { %3284 = vmatpush1.bf16.msra.mxu1 %v7319_v9  ;;  %1040 = vmatprep.mubr.bf16.mxu1 %v8032_v0  ;;  %v7358_v8 = vld [vmem:[#allocation7 + $0x220] ss:$16 sps:$4 sm:$0xff]  }
 0x133   :  { %3285 = vmatprep.subr.bf16.mxu1 %v7327_v11 }
 0x134   :  { %2834 = vmatpush1.bf16.msra.mxu0 %v7322_v10 }
 0x135   :  { %2835 = vmatprep.subr.bf16.mxu0 %v7330_v12 }
 0x136   :  { %3286 = vmatpush1.bf16.msra.mxu1 %v7325_v13  ;;  %v7361_v13 = vld [vmem:[#allocation7 + $0x228] ss:$16 sps:$4 sm:$0xff]  }
 0x137   :  { %928 = vmatmul.mubr.bf16.gmra.mrb[56].mxu0 %v8309_v27  ;;  %3287 = vmatprep.subr.bf16.mxu1 %v7333_v15 }
 0x138   :  { %937 = vmatprep.mubr.bf16.mxu0 %v8032_v0  ;;  %2836 = vmatpush1.bf16.msra.mxu0 %v7328_v14  ;;  %v7366_v14 = vld [vmem:[#allocation7 + $0x244] ss:$16 sps:$4 sm:$0xff]  }
 0x139   :  { %2837 = vmatprep.subr.bf16.mxu0 %v7336_v16  ;;  %1041 = vmatmul.mubr.bf16.gmra.mrb[56].mxu1 %v8309_v27  ;;  %v7349_v27 = vld [vmem:[#allocation7 + $0x1e8] ss:$16 sps:$4 sm:$0xff]  }
 0x13a   :  { %3288 = vmatpush1.bf16.msra.mxu1 %v7331_v17  ;;  %1050 = vmatprep.mubr.bf16.mxu1 %v8032_v0  ;;  %v249_v0 = vlaneseq }
 0x13b   :  { %3289 = vmatprep.subr.bf16.mxu1 %v7339_v19  ;;  %v7369_v19 = vld [vmem:[#allocation7 + $0x24c] ss:$16 sps:$4 sm:$0xff]  }
 0x13c   :  { %2838 = vmatpush1.bf16.msra.mxu0 %v7334_v18  ;;  %v8359_v33 = vshrl.u32 %v249_v0, 7 }
 0x13d   :  { %2839 = vmatprep.subr.bf16.mxu0 %v7342_v20 }
 0x13e   :  { %3290 = vmatpush1.bf16.msra.mxu1 %v7337_v21  ;;  %v8362_v34 = vsub.s32 0, %v8359_v33  ;;  %v8367_v36 = vsub.s32 1, %v8359_v33  ;;  %v8379_v41 = vsub.s32 2, %v8359_v33  ;;  %v8383_v45 = vsub.s32 3, %v8359_v33 }
 0x13f   :  { %938 = vmatmul.mubr.bf16.gmra.mrb[60].mxu0 %v8321_v30  ;;  %3291 = vmatprep.subr.bf16.mxu1 %v7345_v22 }
 0x140   :  { %2840 = vmatpush1.bf16.msra.mxu0 %v7340_v24  ;;  %10415 = vst [vmem:[#allocation20_spill] sm:$0xff] %v8362_v34  ;;  %10416 = vst [vmem:[#allocation21_spill] sm:$0xff] %v8367_v36  ;;  %v8375_v37 = vrot.slane %v8364_v35, %v8367_v36  ;;  %v8389_v50 = vrot.slane %v8364_v35, %v8379_v41  ;;  %v8393_v23 = vrot.slane %v8364_v35, %v8383_v45 }
 0x141   :  { %2841 = vmatprep.subr.bf16.mxu0 %v7348_v25  ;;  %1051 = vmatmul.mubr.bf16.gmra.mrb[60].mxu1 %v8321_v30  ;;  %v8371_v30 = vrot.slane %v8364_v35, %v8362_v34  ;;  %10417 = vst [vmem:[#allocation22_spill] sm:$0xff] %v8379_v41  ;;  %10418 = vst [vmem:[#allocation23_spill] sm:$0xff] %v8383_v45 }
 0x142   :  { %3292 = vmatpush1.bf16.msra.mxu1 %v7343_v26 }
 0x143   :  { %3293 = vmatprep.subr.bf16.mxu1 %v7351_v28 }
 0x144   :  { %2842 = vmatpush1.bf16.msra.mxu0 %v7346_v29 }
 0x145   :  { %2924 = vmatprep.subr.bf16.mxu0 %v7354_v31  ;;  %v7364_v31 = vld [vmem:[#allocation7 + $0x240] ss:$16 sps:$4 sm:$0xff]  }
 0x146   :  { %3294 = vmatpush1.bf16.msra.mxu1 %v7349_v27  ;;  %v7367_v27 = vld [vmem:[#allocation7 + $0x248] ss:$16 sps:$4 sm:$0xff]  }
 0x147   :  { %3376 = vmatprep.subr.bf16.mxu1 %v7357_v32 }
 0x19a   :  { %v643_v38 = vpop.f32.mrb[0].mxu0  ;;  %v756_v58 = vpop.f32.mrb[0].mxu1 }
 0x19b   :  { %v644_v39 = vadd.f32 %v643_v38, %v8371_v30  ;;  %v645_v40 = vpop.f32.mrb[1].mxu0  ;;  %v757_v63 = vadd.f32 %v756_v58, %v8389_v50  ;;  %v758_v1 = vpop.f32.mrb[1].mxu1  ;;  %v7373_v58 = vld [vmem:[#allocation7 + $0x268] ss:$16 sps:$4 sm:$0xff]  }
 0x19c   :  { %v646_v43 = vadd.f32 %v645_v40, %v8375_v37  ;;  %v647_v44 = vpop.f32.mrb[2].mxu0  ;;  %v759_v5 = vadd.f32 %v758_v1, %v8393_v23  ;;  %v760_v61 = vpop.f32.mrb[2].mxu1  ;;  %v7372_v40 = vld [vmem:[#allocation7 + $0x264] ss:$16 sps:$4 sm:$0xff]   ;;  %v7381_v1 = vld [vmem:[#allocation7 + $0x28c] ss:$16 sps:$4 sm:$0xff]  }
 0x19d   :  { %v648_v46 = vadd.f32 %v647_v44, %v8371_v30  ;;  %v649_v47 = vpop.f32.mrb[3].mxu0  ;;  %v1061_v4 = vmax.f32 %v644_v39, 0.0  ;;  %v1063_v9 = vmax.f32 %v757_v63, 0.0  ;;  %v761_v10 = vadd.f32 %v760_v61, %v8389_v50  ;;  %v762_v11 = vpop.f32.mrb[3].mxu1 }
 0x19e   :  { %v650_v48 = vadd.f32 %v649_v47, %v8375_v37  ;;  %v1062_v51 = vmax.f32 %v646_v43, 0.0  ;;  %v1064_v15 = vmax.f32 %v759_v5, 0.0  ;;  %v763_v16 = vadd.f32 %v762_v11, %v8393_v23  ;;  %v7375_v43 = vld [vmem:[#allocation7 + $0x26c] ss:$16 sps:$4 sm:$0xff]   ;;  %v7379_v11 = vld [vmem:[#allocation7 + $0x288] ss:$16 sps:$4 sm:$0xff]  }
 0x19f   :  { %v1069_v49 = vmax.f32 %v648_v46, 0.0  ;;  %v1071_v20 = vmax.f32 %v761_v10, 0.0  ;;  %v7376_v10 = vld [vmem:[#allocation7 + $0x280] ss:$16 sps:$4 sm:$0xff]  }
 0x1a0   :  { %v1070_v52 = vmax.f32 %v650_v48, 0.0  ;;  %v1072_v24 = vmax.f32 %v763_v16, 0.0  ;;  %v7384_v16 = vld [vmem:[#allocation7 + $0x2a4] ss:$16 sps:$4 sm:$0xff]  }
 0x1a1   :  { %v1189_v53 = vpack.c.bf16 %v1069_v49, %v1061_v4  ;;  %v8403_v26 = vpack.c.bf16 %v1071_v20, %v1063_v9 }
 0x1a2   :  { %v1190_v54 = vpack.c.bf16 %v1070_v52, %v1062_v51  ;;  %v653_v55 = vpop.f32.mrb[4].mxu0  ;;  %v8405_v32 = vpack.c.bf16 %v1072_v24, %v1064_v15 }
 0x1a3   :  { %v654_v59 = vadd.f32 %v653_v55, %v8371_v30  ;;  %v655_v42 = vpop.f32.mrb[5].mxu0 }
 0x1a4   :  { %v656_v2 = vadd.f32 %v655_v42, %v8375_v37  ;;  %v657_v3 = vpop.f32.mrb[6].mxu0  ;;  %2843 = vmatprep.mubr.bf16.mxu0 %v1190_v54  ;;  %3295 = vmatprep.mubr.bf16.mxu1 %v1190_v54  ;;  %v766_v0 = vpop.f32.mrb[4].mxu1 }
 0x1a5   :  { %v658_v6 = vadd.f32 %v657_v3, %v8371_v30  ;;  %v659_v7 = vpop.f32.mrb[7].mxu0  ;;  %2844 = vmatmul.mubr.bf16.vlgmr.msra.gmra.mrb[64].mxu0 %v1189_v53  ;;  %3296 = vmatmul.mubr.bf16.vlgmr.msra.gmra.mrb[64].mxu1 %v1189_v53  ;;  %v1077_v17 = vmax.f32 %v654_v59, 0.0  ;;  %v767_v44 = vadd.f32 %v766_v0, %v8389_v50  ;;  %v768_v46 = vpop.f32.mrb[5].mxu1  ;;  %v7370_v53 = vld [vmem:[#allocation7 + $0x260] ss:$16 sps:$4 sm:$0xff]  }
 0x1a6   :  { %v660_v12 = vadd.f32 %v659_v7, %v8375_v37  ;;  %2925 = vmatpush1.bf16.msra.mxu0 %v7352_v56  ;;  %3377 = vmatpush1.bf16.msra.mxu1 %v7355_v57  ;;  %v1078_v21 = vmax.f32 %v656_v2, 0.0  ;;  %v769_v4 = vadd.f32 %v768_v46, %v8393_v23  ;;  %v770_v49 = vpop.f32.mrb[6].mxu1  ;;  %v7378_v59 = vld [vmem:[#allocation7 + $0x284] ss:$16 sps:$4 sm:$0xff]  }
 0x1a7   :  { %v1085_v18 = vmax.f32 %v658_v6, 0.0  ;;  %2926 = vmatprep.subr.bf16.mxu0 %v7360_v60  ;;  %3378 = vmatprep.subr.bf16.mxu1 %v7363_v62  ;;  %v1079_v54 = vmax.f32 %v767_v44, 0.0  ;;  %v771_v55 = vadd.f32 %v770_v49, %v8389_v50  ;;  %v772_v56 = vpop.f32.mrb[7].mxu1 }
 0x1a8   :  { %v1086_v22 = vmax.f32 %v660_v12, 0.0  ;;  %v1080_v42 = vmax.f32 %v769_v4, 0.0  ;;  %v773_v60 = vadd.f32 %v772_v56, %v8393_v23 }
 0x1a9   :  { %v1197_v25 = vpack.c.bf16 %v1085_v18, %v1077_v17  ;;  %v1087_v2 = vmax.f32 %v771_v55, 0.0  ;;  %v7387_v17 = vld [vmem:[#allocation7 + $0x2ac] ss:$16 sps:$4 sm:$0xff]  }
 0x1aa   :  { %v1198_v28 = vpack.c.bf16 %v1086_v22, %v1078_v21  ;;  %2927 = vmatpush1.bf16.msra.mxu0 %v7358_v8  ;;  %v663_v29 = vpop.f32.mrb[8].mxu0  ;;  %3379 = vmatpush1.bf16.msra.mxu1 %v7361_v13  ;;  %v1088_v61 = vmax.f32 %v773_v60, 0.0 }
 0x1ab   :  { %v664_v38 = vadd.f32 %v663_v29, %v8371_v30  ;;  %v665_v39 = vpop.f32.mrb[9].mxu0  ;;  %2928 = vmatprep.subr.bf16.mxu0 %v7366_v14  ;;  %3380 = vmatprep.subr.bf16.mxu1 %v7369_v19  ;;  %v8415_v7 = vpack.c.bf16 %v1087_v2, %v1079_v54  ;;  %v7382_v29 = vld [vmem:[#allocation7 + $0x2a0] ss:$16 sps:$4 sm:$0xff]  }
 0x1ac   :  { %v666_v47 = vadd.f32 %v665_v39, %v8375_v37  ;;  %v667_v48 = vpop.f32.mrb[10].mxu0  ;;  %2853 = vmatprep.mubr.bf16.mxu0 %v1198_v28  ;;  %3305 = vmatprep.mubr.bf16.mxu1 %v1198_v28  ;;  %v8417_v12 = vpack.c.bf16 %v1088_v61, %v1080_v42  ;;  %v776_v13 = vpop.f32.mrb[8].mxu1  ;;  %v7385_v39 = vld [vmem:[#allocation7 + $0x2a8] ss:$16 sps:$4 sm:$0xff]  }
 0x1ad   :  { %v668_v51 = vadd.f32 %v667_v48, %v8371_v30  ;;  %v669_v52 = vpop.f32.mrb[11].mxu0  ;;  %2854 = vmatmul.mubr.bf16.gmra.mrb[68].mxu0 %v1197_v25  ;;  %3306 = vmatmul.mubr.bf16.gmra.mrb[68].mxu1 %v1197_v25  ;;  %v1093_v62 = vmax.f32 %v664_v38, 0.0  ;;  %v777_v18 = vadd.f32 %v776_v13, %v8389_v50  ;;  %v778_v19 = vpop.f32.mrb[9].mxu1  ;;  %v7393_v48 = vld [vmem:[#allocation7 + $0x2cc] ss:$16 sps:$4 sm:$0xff]  }
 0x1ae   :  { %v670_v57 = vadd.f32 %v669_v52, %v8375_v37  ;;  %2929 = vmatpush1.bf16.msra.mxu0 %v7364_v31  ;;  %3381 = vmatpush1.bf16.msra.mxu1 %v7367_v27  ;;  %v1094_v3 = vmax.f32 %v666_v47, 0.0  ;;  %v779_v22 = vadd.f32 %v778_v19, %v8393_v23  ;;  %v780_v24 = vpop.f32.mrb[10].mxu1 }
 0x1af   :  { %v1101_v63 = vmax.f32 %v668_v51, 0.0  ;;  %2930 = vmatprep.subr.bf16.mxu0 %v7372_v40  ;;  %3382 = vmatprep.subr.bf16.mxu1 %v7375_v43  ;;  %v1095_v31 = vmax.f32 %v777_v18, 0.0  ;;  %v781_v27 = vadd.f32 %v780_v24, %v8389_v50  ;;  %v782_v0 = vpop.f32.mrb[11].mxu1  ;;  %v7390_v40 = vld [vmem:[#allocation7 + $0x2c4] ss:$16 sps:$4 sm:$0xff]  }
 0x1b0   :  { %v1102_v5 = vmax.f32 %v670_v57, 0.0  ;;  %v1096_v43 = vmax.f32 %v779_v22, 0.0  ;;  %v783_v44 = vadd.f32 %v782_v0, %v8393_v23  ;;  %v7388_v57 = vld [vmem:[#allocation7 + $0x2c0] ss:$16 sps:$4 sm:$0xff]   ;;  %v7402_v18 = vld [vmem:[#allocation7 + $0x304] ss:$16 sps:$4 sm:$0xff]  }
 0x1b1   :  { %v1205_v6 = vpack.c.bf16 %v1101_v63, %v1093_v62  ;;  %v1103_v4 = vmax.f32 %v781_v27, 0.0  ;;  %v7396_v63 = vld [vmem:[#allocation7 + $0x2e4] ss:$16 sps:$4 sm:$0xff]   ;;  %v7405_v24 = vld [vmem:[#allocation7 + $0x30c] ss:$16 sps:$4 sm:$0xff]  }
 0x1b2   :  { %v1206_v8 = vpack.c.bf16 %v1102_v5, %v1094_v3  ;;  %2931 = vmatpush1.bf16.msra.mxu0 %v7370_v53  ;;  %v673_v9 = vpop.f32.mrb[12].mxu0  ;;  %3383 = vmatpush1.bf16.msra.mxu1 %v7373_v58  ;;  %v1104_v52 = vmax.f32 %v783_v44, 0.0  ;;  %v7391_v58 = vld [vmem:[#allocation7 + $0x2c8] ss:$16 sps:$4 sm:$0xff]  }
 0x1b3   :  { %v674_v14 = vadd.f32 %v673_v9, %v8371_v30  ;;  %v675_v15 = vpop.f32.mrb[13].mxu0  ;;  %2932 = vmatprep.subr.bf16.mxu0 %v7378_v59  ;;  %3384 = vmatprep.subr.bf16.mxu1 %v7381_v1  ;;  %v8427_v54 = vpack.c.bf16 %v1103_v4, %v1095_v31  ;;  %v7399_v1 = vld [vmem:[#allocation7 + $0x2ec] ss:$16 sps:$4 sm:$0xff]   ;;  %v7408_v4 = vld [vmem:[#allocation7 + $0x324] ss:$16 sps:$4 sm:$0xff]  }
 0x1b4   :  { %v676_v20 = vadd.f32 %v675_v15, %v8375_v37  ;;  %v677_v21 = vpop.f32.mrb[14].mxu0  ;;  %2863 = vmatprep.mubr.bf16.mxu0 %v1206_v8  ;;  %3315 = vmatprep.mubr.bf16.mxu1 %v1206_v8  ;;  %v8429_v59 = vpack.c.bf16 %v1104_v52, %v1096_v43  ;;  %v786_v42 = vpop.f32.mrb[12].mxu1  ;;  %v7403_v43 = vld [vmem:[#allocation7 + $0x308] ss:$16 sps:$4 sm:$0xff]  }
 0x1b5   :  { %v678_v25 = vadd.f32 %v677_v21, %v8371_v30  ;;  %v679_v28 = vpop.f32.mrb[15].mxu0  ;;  %2864 = vmatmul.mubr.bf16.gmra.mrb[72].mxu0 %v1205_v6  ;;  %3316 = vmatmul.mubr.bf16.gmra.mrb[72].mxu1 %v1205_v6  ;;  %v1109_v46 = vmax.f32 %v674_v14, 0.0  ;;  %v787_v2 = vadd.f32 %v786_v42, %v8389_v50  ;;  %v788_v3 = vpop.f32.mrb[13].mxu1 }
 0x1b6   :  { %v680_v38 = vadd.f32 %v679_v28, %v8375_v37  ;;  %2933 = vmatpush1.bf16.msra.mxu0 %v7376_v10  ;;  %3385 = vmatpush1.bf16.msra.mxu1 %v7379_v11  ;;  %v1110_v49 = vmax.f32 %v676_v20, 0.0  ;;  %v789_v6 = vadd.f32 %v788_v3, %v8393_v23  ;;  %v790_v8 = vpop.f32.mrb[14].mxu1  ;;  %v7394_v11 = vld [vmem:[#allocation7 + $0x2e0] ss:$16 sps:$4 sm:$0xff]   ;;  %v7409_v3 = vld [vmem:[#allocation7 + $0x328] ss:$16 sps:$4 sm:$0xff]  }
 0x1b7   :  { %v1117_v47 = vmax.f32 %v678_v25, 0.0  ;;  %2934 = vmatprep.subr.bf16.mxu0 %v7384_v16  ;;  %3386 = vmatprep.subr.bf16.mxu1 %v7387_v17  ;;  %v1111_v13 = vmax.f32 %v787_v2, 0.0  ;;  %v791_v14 = vadd.f32 %v790_v8, %v8389_v50  ;;  %v792_v15 = vpop.f32.mrb[15].mxu1  ;;  %v7397_v17 = vld [vmem:[#allocation7 + $0x2e8] ss:$16 sps:$4 sm:$0xff]  }
 0x1b8   :  { %v1118_v51 = vmax.f32 %v680_v38, 0.0  ;;  %v1112_v19 = vmax.f32 %v789_v6, 0.0  ;;  %v793_v20 = vadd.f32 %v792_v15, %v8393_v23 }
 0x1b9   :  { %v1213_v53 = vpack.c.bf16 %v1117_v47, %v1109_v46  ;;  %v1119_v25 = vmax.f32 %v791_v14, 0.0 }
 0x1ba   :  { %v1214_v55 = vpack.c.bf16 %v1118_v51, %v1110_v49  ;;  %2935 = vmatpush1.bf16.msra.mxu0 %v7382_v29  ;;  %v683_v56 = vpop.f32.mrb[16].mxu0  ;;  %3387 = vmatpush1.bf16.msra.mxu1 %v7385_v39  ;;  %v1120_v31 = vmax.f32 %v793_v20, 0.0  ;;  %v7411_v49 = vld [vmem:[#allocation7 + $0x32c] ss:$16 sps:$4 sm:$0xff]   ;;  %v7412_v20 = vld [vmem:[#allocation7 + $0x340] ss:$16 sps:$4 sm:$0xff]  }
 0x1bb   :  { %v684_v60 = vadd.f32 %v683_v56, %v8371_v30  ;;  %v685_v62 = vpop.f32.mrb[17].mxu0  ;;  %2936 = vmatprep.subr.bf16.mxu0 %v7390_v40  ;;  %3388 = vmatprep.subr.bf16.mxu1 %v7393_v48  ;;  %v8439_v0 = vpack.c.bf16 %v1119_v25, %v1111_v13  ;;  %v7400_v40 = vld [vmem:[#allocation7 + $0x300] ss:$16 sps:$4 sm:$0xff]  }
 0x1bc   :  { %v686_v5 = vadd.f32 %v685_v62, %v8375_v37  ;;  %v687_v61 = vpop.f32.mrb[18].mxu0  ;;  %2873 = vmatprep.mubr.bf16.mxu0 %v1214_v55  ;;  %3325 = vmatprep.mubr.bf16.mxu1 %v1214_v55  ;;  %v8441_v44 = vpack.c.bf16 %v1120_v31, %v1112_v19  ;;  %v796_v46 = vpop.f32.mrb[16].mxu1  ;;  %v7423_v31 = vld [vmem:[#allocation7 + $0x36c] ss:$16 sps:$4 sm:$0xff]  }
 0x1bd   :  { %v688_v9 = vadd.f32 %v687_v61, %v8371_v30  ;;  %v689_v10 = vpop.f32.mrb[19].mxu0  ;;  %2874 = vmatmul.mubr.bf16.gmra.mrb[76].mxu0 %v1213_v53  ;;  %3326 = vmatmul.mubr.bf16.gmra.mrb[76].mxu1 %v1213_v53  ;;  %v1125_v21 = vmax.f32 %v684_v60, 0.0  ;;  %v797_v51 = vadd.f32 %v796_v46, %v8389_v50  ;;  %v798_v52 = vpop.f32.mrb[17].mxu1  ;;  %v7406_v60 = vld [vmem:[#allocation7 + $0x320] ss:$16 sps:$4 sm:$0xff]  }
 0x1be   :  { %v690_v16 = vadd.f32 %v689_v10, %v8375_v37  ;;  %2937 = vmatpush1.bf16.msra.mxu0 %v7388_v57  ;;  %3389 = vmatpush1.bf16.msra.mxu1 %v7391_v58  ;;  %v1126_v28 = vmax.f32 %v686_v5, 0.0  ;;  %v799_v56 = vadd.f32 %v798_v52, %v8393_v23  ;;  %v800_v57 = vpop.f32.mrb[18].mxu1  ;;  %v7414_v5 = vld [vmem:[#allocation7 + $0x344] ss:$16 sps:$4 sm:$0xff]   ;;  %v7417_v10 = vld [vmem:[#allocation7 + $0x34c] ss:$16 sps:$4 sm:$0xff]  }
 0x1bf   :  { %v1133_v22 = vmax.f32 %v688_v9, 0.0  ;;  %2938 = vmatprep.subr.bf16.mxu0 %v7396_v63  ;;  %3390 = vmatprep.subr.bf16.mxu1 %v7399_v1  ;;  %v1127_v62 = vmax.f32 %v797_v51, 0.0  ;;  %v801_v63 = vadd.f32 %v800_v57, %v8389_v50  ;;  %v802_v1 = vpop.f32.mrb[19].mxu1 }
 0x1c0   :  { %v1134_v29 = vmax.f32 %v690_v16, 0.0  ;;  %v1128_v61 = vmax.f32 %v799_v56, 0.0  ;;  %v803_v6 = vadd.f32 %v802_v1, %v8393_v23  ;;  %v7426_v56 = vld [vmem:[#allocation7 + $0x384] ss:$16 sps:$4 sm:$0xff]  }
 0x1c1   :  { %v1221_v27 = vpack.c.bf16 %v1133_v22, %v1125_v21  ;;  %v7415_v21 = vld [vmem:[#allocation7 + $0x348] ss:$16 sps:$4 sm:$0xff]  }
 0x1c2   :  { %v1222_v38 = vpack.c.bf16 %v1134_v29, %v1126_v28  ;;  %2939 = vmatpush1.bf16.msra.mxu0 %v7394_v11  ;;  %v693_v39 = vpop.f32.mrb[20].mxu0  ;;  %3391 = vmatpush1.bf16.msra.mxu1 %v7397_v17  ;;  %v1135_v11 = vmax.f32 %v801_v63, 0.0  ;;  %v1136_v15 = vmax.f32 %v803_v6, 0.0  ;;  %v7420_v29 = vld [vmem:[#allocation7 + $0x364] ss:$16 sps:$4 sm:$0xff]  }
 0x1c3   :  { %v694_v47 = vadd.f32 %v693_v39, %v8371_v30  ;;  %v695_v48 = vpop.f32.mrb[21].mxu0  ;;  %2940 = vmatprep.subr.bf16.mxu0 %v7402_v18  ;;  %3392 = vmatprep.subr.bf16.mxu1 %v7405_v24 }
 0x1c4   :  { %v696_v53 = vadd.f32 %v695_v48, %v8375_v37  ;;  %v697_v55 = vpop.f32.mrb[22].mxu0  ;;  %2883 = vmatprep.mubr.bf16.mxu0 %v1222_v38  ;;  %3335 = vmatprep.mubr.bf16.mxu1 %v1222_v38  ;;  %v8451_v17 = vpack.c.bf16 %v1135_v11, %v1127_v62  ;;  %v8453_v22 = vpack.c.bf16 %v1136_v15, %v1128_v61  ;;  %v806_v24 = vpop.f32.mrb[20].mxu1  ;;  %v7429_v62 = vld [vmem:[#allocation7 + $0x38c] ss:$16 sps:$4 sm:$0xff]   ;;  %v7424_v61 = vld [vmem:[#allocation7 + $0x380] ss:$16 sps:$4 sm:$0xff]  }
 0x1c5   :  { %v698_v58 = vadd.f32 %v697_v55, %v8371_v30  ;;  %v699_v42 = vpop.f32.mrb[23].mxu0  ;;  %2884 = vmatmul.mubr.bf16.gmra.mrb[80].mxu0 %v1221_v27  ;;  %3336 = vmatmul.mubr.bf16.gmra.mrb[80].mxu1 %v1221_v27  ;;  %v1141_v8 = vmax.f32 %v694_v47, 0.0  ;;  %v807_v27 = vadd.f32 %v806_v24, %v8389_v50  ;;  %v808_v38 = vpop.f32.mrb[21].mxu1  ;;  %v7421_v55 = vld [vmem:[#allocation7 + $0x368] ss:$16 sps:$4 sm:$0xff]  }
 0x1c6   :  { %v700_v2 = vadd.f32 %v699_v42, %v8375_v37  ;;  %2941 = vmatpush1.bf16.msra.mxu0 %v7400_v40  ;;  %3393 = vmatpush1.bf16.msra.mxu1 %v7403_v43  ;;  %v1142_v13 = vmax.f32 %v696_v53, 0.0  ;;  %v809_v43 = vadd.f32 %v808_v38, %v8393_v23  ;;  %v810_v46 = vpop.f32.mrb[22].mxu1  ;;  %v7432_v11 = vld [vmem:[#allocation7 + $0x3a4] ss:$16 sps:$4 sm:$0xff]  }
 0x1c7   :  { %v1149_v9 = vmax.f32 %v698_v58, 0.0  ;;  %2942 = vmatprep.subr.bf16.mxu0 %v7408_v4  ;;  %3394 = vmatprep.subr.bf16.mxu1 %v7411_v49  ;;  %v7418_v4 = vld [vmem:[#allocation7 + $0x360] ss:$16 sps:$4 sm:$0xff]   ;;  %v1143_v49 = vmax.f32 %v807_v27, 0.0  ;;  %v811_v51 = vadd.f32 %v810_v46, %v8389_v50  ;;  %v812_v52 = vpop.f32.mrb[23].mxu1 }
 0x1c8   :  { %v1150_v14 = vmax.f32 %v700_v2, 0.0  ;;  %v1144_v57 = vmax.f32 %v809_v43, 0.0  ;;  %v813_v58 = vadd.f32 %v812_v52, %v8393_v23 }
 0x1c9   :  { %v1229_v16 = vpack.c.bf16 %v1149_v9, %v1141_v8  ;;  %v1151_v63 = vmax.f32 %v811_v51, 0.0 }
 0x1ca   :  { %v1230_v18 = vpack.c.bf16 %v1150_v14, %v1142_v13  ;;  %2943 = vmatpush1.bf16.msra.mxu0 %v7406_v60  ;;  %v703_v19 = vpop.f32.mrb[24].mxu0  ;;  %3395 = vmatpush1.bf16.msra.mxu1 %v7409_v3  ;;  %v1152_v3 = vmax.f32 %v813_v58, 0.0 }
 0x1cb   :  { %v704_v25 = vadd.f32 %v703_v19, %v8371_v30  ;;  %v705_v28 = vpop.f32.mrb[25].mxu0  ;;  %2944 = vmatprep.subr.bf16.mxu0 %v7414_v5  ;;  %3396 = vmatprep.subr.bf16.mxu1 %v7417_v10  ;;  %v8463_v6 = vpack.c.bf16 %v1151_v63, %v1143_v49  ;;  %v7427_v10 = vld [vmem:[#allocation7 + $0x388] ss:$16 sps:$4 sm:$0xff]  }
 0x1cc   :  { %v706_v39 = vadd.f32 %v705_v28, %v8375_v37  ;;  %v707_v40 = vpop.f32.mrb[26].mxu0  ;;  %2893 = vmatprep.mubr.bf16.mxu0 %v1230_v18  ;;  %3345 = vmatprep.mubr.bf16.mxu1 %v1230_v18  ;;  %v8465_v13 = vpack.c.bf16 %v1152_v3, %v1144_v57  ;;  %v816_v14 = vpop.f32.mrb[24].mxu1  ;;  %v7435_v18 = vld [vmem:[#allocation7 + $0x3ac] ss:$16 sps:$4 sm:$0xff]  }
 0x1cd   :  { %v708_v47 = vadd.f32 %v707_v40, %v8371_v30  ;;  %v709_v48 = vpop.f32.mrb[27].mxu0  ;;  %2894 = vmatmul.mubr.bf16.gmra.mrb[84].mxu0 %v1229_v16  ;;  %3346 = vmatmul.mubr.bf16.gmra.mrb[84].mxu1 %v1229_v16  ;;  %v1157_v42 = vmax.f32 %v704_v25, 0.0  ;;  %v817_v19 = vadd.f32 %v816_v14, %v8389_v50 }
 0x1ce   :  { %v710_v53 = vadd.f32 %v709_v48, %v8375_v37  ;;  %2945 = vmatpush1.bf16.msra.mxu0 %v7412_v20  ;;  %3397 = vmatpush1.bf16.msra.mxu1 %v7415_v21  ;;  %v1158_v1 = vmax.f32 %v706_v39, 0.0  ;;  %v818_v20 = vpop.f32.mrb[25].mxu1  ;;  %v267_v21 = vsub.s32 4, %v8359_v33  ;;  %v7430_v39 = vld [vmem:[#allocation7 + $0x3a0] ss:$16 sps:$4 sm:$0xff]  }
 0x1cf   :  { %v1165_v60 = vmax.f32 %v708_v47, 0.0  ;;  %2946 = vmatprep.subr.bf16.mxu0 %v7420_v29  ;;  %3398 = vmatprep.subr.bf16.mxu1 %v7423_v31  ;;  %v819_v28 = vadd.f32 %v818_v20, %v8393_v23  ;;  %v820_v29 = vpop.f32.mrb[26].mxu1  ;;  %v271_v31 = vsub.s32 5, %v8359_v33  ;;  %v1159_v40 = vmax.f32 %v817_v19, 0.0  ;;  %v7433_v48 = vld [vmem:[#allocation7 + $0x3a8] ss:$16 sps:$4 sm:$0xff]  }
 0x1d0   :  { %v1166_v2 = vmax.f32 %v710_v53, 0.0  ;;  %v821_v43 = vadd.f32 %v820_v29, %v8389_v50  ;;  %v822_v46 = vpop.f32.mrb[27].mxu1 }
 0x1d1   :  { %v1237_v5 = vpack.c.bf16 %v1165_v60, %v1157_v42  ;;  %v1160_v49 = vmax.f32 %v819_v28, 0.0  ;;  %v823_v51 = vadd.f32 %v822_v46, %v8393_v23 }
 0x1d2   :  { %v1238_v8 = vpack.c.bf16 %v1166_v2, %v1158_v1  ;;  %2947 = vmatpush1.bf16.msra.mxu0 %v7418_v4  ;;  %v713_v9 = vpop.f32.mrb[28].mxu0  ;;  %3399 = vmatpush1.bf16.msra.mxu1 %v7421_v55  ;;  %v7438_v4 = vld [vmem:[#allocation7 + $0x3c4] ss:$16 sps:$4 sm:$0xff]   ;;  %v1167_v55 = vmax.f32 %v821_v43, 0.0  ;;  %v7436_v1 = vld [vmem:[#allocation7 + $0x3c0] ss:$16 sps:$4 sm:$0xff]  }
 0x1d3   :  { %v714_v15 = vadd.f32 %v713_v9, %v8371_v30  ;;  %v715_v16 = vpop.f32.mrb[29].mxu0  ;;  %2948 = vmatprep.subr.bf16.mxu0 %v7426_v56  ;;  %3400 = vmatprep.subr.bf16.mxu1 %v7429_v62  ;;  %v8478_v56 = vrot.slane %v8364_v35, %v267_v21  ;;  %v1168_v42 = vmax.f32 %v823_v51, 0.0  ;;  %v7439_v2 = vld [vmem:[#allocation7 + $0x3c8] ss:$16 sps:$4 sm:$0xff]  }
 0x1d4   :  { %v716_v24 = vadd.f32 %v715_v16, %v8375_v37  ;;  %v717_v25 = vpop.f32.mrb[30].mxu0  ;;  %2903 = vmatprep.mubr.bf16.mxu0 %v1238_v8  ;;  %3355 = vmatprep.mubr.bf16.mxu1 %v1238_v8  ;;  %v8483_v62 = vpack.c.bf16 %v1167_v55, %v1159_v40  ;;  %v7444_v8 = vld [vmem:[#allocation7 + $0x3e4] ss:$16 sps:$4 sm:$0xff]   ;;  %v7447_v16 = vld [vmem:[#allocation7 + $0x3ec] ss:$16 sps:$4 sm:$0xff]  }
 0x1d5   :  { %v718_v27 = vadd.f32 %v717_v25, %v8371_v30  ;;  %v719_v38 = vpop.f32.mrb[31].mxu0  ;;  %2904 = vmatmul.mubr.bf16.gmra.mrb[88].mxu0 %v1237_v5  ;;  %3356 = vmatmul.mubr.bf16.gmra.mrb[88].mxu1 %v1237_v5  ;;  %v1173_v52 = vmax.f32 %v714_v15, 0.0  ;;  %v7441_v30 = vld [vmem:[#allocation7 + $0x3cc] ss:$16 sps:$4 sm:$0xff]   ;;  %v8485_v3 = vpack.c.bf16 %v1168_v42, %v1160_v49  ;;  %v826_v5 = vpop.f32.mrb[28].mxu1  ;;  %v275_v15 = vsub.s32 6, %v8359_v33 }
 0x1d6   :  { %v720_v47 = vadd.f32 %v719_v38, %v8375_v37  ;;  %2949 = vmatpush1.bf16.msra.mxu0 %v7424_v61  ;;  %3401 = vmatpush1.bf16.msra.mxu1 %v7427_v10  ;;  %v1174_v57 = vmax.f32 %v716_v24, 0.0  ;;  %v8481_v37 = vrot.slane %v8364_v35, %v271_v31  ;;  %v827_v9 = vadd.f32 %v826_v5, %v8389_v50  ;;  %v828_v10 = vpop.f32.mrb[29].mxu1  ;;  %v7445_v40 = vld [vmem:[#allocation7 + $0x3e8] ss:$16 sps:$4 sm:$0xff]  }
 0x1d7   :  { %v1181_v53 = vmax.f32 %v718_v27, 0.0  ;;  %2950 = vmatprep.subr.bf16.mxu0 %v7432_v11  ;;  %3402 = vmatprep.subr.bf16.mxu1 %v7435_v18  ;;  %v829_v18 = vadd.f32 %v828_v10, %v8393_v23  ;;  %v830_v19 = vpop.f32.mrb[30].mxu1  ;;  %v279_v24 = vsub.s32 7, %v8359_v33  ;;  %v8499_v51 = vrot.slane %v8364_v35, %v275_v15 }
 0x1d8   :  { %v1182_v58 = vmax.f32 %v720_v47, 0.0  ;;  %v1175_v25 = vmax.f32 %v827_v9, 0.0  ;;  %v831_v28 = vadd.f32 %v830_v19, %v8389_v50  ;;  %v832_v29 = vpop.f32.mrb[31].mxu1  ;;  %v7453_v50 = vld [vmem:[#allocation7 + $0x40c] ss:$16 sps:$4 sm:$0xff]  }
 0x1d9   :  { %v1245_v60 = vpack.c.bf16 %v1181_v53, %v1173_v52  ;;  %v1176_v43 = vmax.f32 %v829_v18, 0.0  ;;  %v833_v46 = vadd.f32 %v832_v29, %v8393_v23  ;;  %v8503_v23 = vrot.slane %v8364_v35, %v279_v24  ;;  %v7454_v24 = vld [vmem:[#allocation7 + $0x420] ss:$16 sps:$4 sm:$0xff]  }
 0x1da   :  { %v1246_v63 = vpack.c.bf16 %v1182_v58, %v1174_v57  ;;  %2951 = vmatpush1.bf16.msra.mxu0 %v7430_v39  ;;  %3403 = vmatpush1.bf16.msra.mxu1 %v7433_v48  ;;  %v869_v61 = vpop.f32.mrb[32].mxu0  ;;  %v7442_v39 = vld [vmem:[#allocation7 + $0x3e0] ss:$16 sps:$4 sm:$0xff]   ;;  %v7450_v48 = vld [vmem:[#allocation7 + $0x404] ss:$16 sps:$4 sm:$0xff]  }
 0x1db   :  { %2952 = vmatprep.subr.bf16.mxu0 %v7438_v4  ;;  %3404 = vmatprep.subr.bf16.mxu1 %v7441_v30  ;;  %v870_v11 = vadd.f32 %v869_v61, %v8478_v56  ;;  %v871_v14 = vpop.f32.mrb[33].mxu0  ;;  %v1183_v4 = vmax.f32 %v831_v28, 0.0  ;;  %v1184_v52 = vmax.f32 %v833_v46, 0.0  ;;  %v7448_v57 = vld [vmem:[#allocation7 + $0x400] ss:$16 sps:$4 sm:$0xff]  }
 0x1dc   :  { %2913 = vmatprep.mubr.bf16.mxu0 %v1246_v63  ;;  %3365 = vmatprep.mubr.bf16.mxu1 %v1246_v63  ;;  %v872_v20 = vadd.f32 %v871_v14, %v8481_v37  ;;  %v873_v21 = vpop.f32.mrb[34].mxu0  ;;  %v7451_v58 = vld [vmem:[#allocation7 + $0x408] ss:$16 sps:$4 sm:$0xff]  }
 0x1dd   :  { %2914 = vmatmul.mubr.bf16.gmra.mrb[92].mxu0 %v1245_v60  ;;  %3366 = vmatmul.mubr.bf16.gmra.mrb[92].mxu1 %v1245_v60  ;;  %v1065_v31 = vmax.f32 %v870_v11, 0.0  ;;  %v874_v27 = vadd.f32 %v873_v21, %v8478_v56  ;;  %v875_v38 = vpop.f32.mrb[35].mxu0  ;;  %v8505_v30 = vpack.c.bf16 %v1183_v4, %v1175_v25  ;;  %v8509_v42 = vpack.c.bf16 %v1184_v52, %v1176_v43  ;;  %v7457_v25 = vld [vmem:[#allocation7 + $0x428] ss:$16 sps:$4 sm:$0xff]  }
 0x1de   :  { %2953 = vmatpush1.bf16.msra.mxu0 %v7436_v1  ;;  %3405 = vmatpush1.bf16.msra.mxu1 %v7439_v2  ;;  %v1066_v47 = vmax.f32 %v872_v20, 0.0  ;;  %v876_v33 = vadd.f32 %v875_v38, %v8481_v37  ;;  %v982_v1 = vpop.f32.mrb[32].mxu1  ;;  %v7465_v38 = vld [vmem:[#allocation7 + $0x44c] ss:$16 sps:$4 sm:$0xff]  }
 0x1df   :  { %2954 = vmatprep.subr.bf16.mxu0 %v7444_v8  ;;  %2956 = vmatprep.mubr.bf16.mxu0 %v8405_v32  ;;  %v1073_v49 = vmax.f32 %v874_v27, 0.0  ;;  %v983_v5 = vadd.f32 %v982_v1, %v8499_v51  ;;  %v984_v61 = vpop.f32.mrb[33].mxu1  ;;  %v7459_v8 = vld [vmem:[#allocation7 + $0x42c] ss:$16 sps:$4 sm:$0xff]  }
 0x1e0   :  { %3406 = vmatprep.subr.bf16.mxu1 %v7447_v16  ;;  %3408 = vmatprep.mubr.bf16.mxu1 %v8405_v32  ;;  %v1074_v53 = vmax.f32 %v876_v33, 0.0  ;;  %v7456_v32 = vld [vmem:[#allocation7 + $0x424] ss:$16 sps:$4 sm:$0xff]   ;;  %v985_v11 = vadd.f32 %v984_v61, %v8503_v23  ;;  %v986_v14 = vpop.f32.mrb[34].mxu1 }
 0x1e1   :  { %v8507_v55 = vpack.c.bf16 %v1073_v49, %v1065_v31  ;;  %v1067_v19 = vmax.f32 %v983_v5, 0.0  ;;  %v987_v20 = vadd.f32 %v986_v14, %v8499_v51  ;;  %v988_v21 = vpop.f32.mrb[35].mxu1 }
 0x1e2   :  { %2955 = vmatpush1.bf16.msra.mxu0 %v7442_v39  ;;  %3407 = vmatpush1.bf16.msra.mxu1 %v7445_v40  ;;  %v8511_v60 = vpack.c.bf16 %v1074_v53, %v1066_v47  ;;  %v879_v63 = vpop.f32.mrb[36].mxu0  ;;  %v1068_v31 = vmax.f32 %v985_v11, 0.0  ;;  %v989_v27 = vadd.f32 %v988_v21, %v8503_v23 }
 0x1e3   :  { %3037 = vmatprep.subr.bf16.mxu0 %v7450_v48  ;;  %3489 = vmatprep.subr.bf16.mxu1 %v7453_v50  ;;  %v880_v35 = vadd.f32 %v879_v63, %v8478_v56  ;;  %v881_v2 = vpop.f32.mrb[37].mxu0  ;;  %v1075_v40 = vmax.f32 %v987_v20, 0.0  ;;  %v7460_v48 = vld [vmem:[#allocation7 + $0x440] ss:$16 sps:$4 sm:$0xff]   ;;  %v7463_v50 = vld [vmem:[#allocation7 + $0x448] ss:$16 sps:$4 sm:$0xff]  }
 0x1e4   :  { %v882_v9 = vadd.f32 %v881_v2, %v8481_v37  ;;  %v883_v10 = vpop.f32.mrb[38].mxu0  ;;  %v1076_v46 = vmax.f32 %v989_v27, 0.0  ;;  %v992_v53 = vpop.f32.mrb[36].mxu1 }
 0x1e5   :  { %2957 = vmatmul.mubr.bf16.vlgmr.msra.gmra.mrb[64].mxu0 %v8403_v26  ;;  %3409 = vmatmul.mubr.bf16.vlgmr.msra.gmra.mrb[64].mxu1 %v8403_v26  ;;  %v1081_v15 = vmax.f32 %v880_v35, 0.0  ;;  %v884_v16 = vadd.f32 %v883_v10, %v8478_v56  ;;  %v885_v18 = vpop.f32.mrb[39].mxu0  ;;  %v7462_v26 = vld [vmem:[#allocation7 + $0x444] ss:$16 sps:$4 sm:$0xff]   ;;  %v8527_v33 = vpack.c.bf16 %v1075_v40, %v1067_v19  ;;  %v993_v63 = vadd.f32 %v992_v53, %v8499_v51  ;;  %v994_v1 = vpop.f32.mrb[37].mxu1 }
 0x1e6   :  { %3038 = vmatpush1.bf16.msra.mxu0 %v7448_v57  ;;  %3490 = vmatpush1.bf16.msra.mxu1 %v7451_v58  ;;  %v1082_v28 = vmax.f32 %v882_v9, 0.0  ;;  %v886_v29 = vadd.f32 %v885_v18, %v8481_v37  ;;  %v8531_v52 = vpack.c.bf16 %v1076_v46, %v1068_v31  ;;  %v995_v5 = vadd.f32 %v994_v1, %v8503_v23  ;;  %v996_v61 = vpop.f32.mrb[38].mxu1  ;;  %v7469_v18 = vld [vmem:[#allocation7 + $0x468] ss:$16 sps:$4 sm:$0xff]  }
 0x1e7   :  { %3039 = vmatprep.subr.bf16.mxu0 %v7456_v32  ;;  %2966 = vmatprep.mubr.bf16.mxu0 %v8417_v12  ;;  %v1089_v39 = vmax.f32 %v884_v16, 0.0  ;;  %v7471_v32 = vld [vmem:[#allocation7 + $0x46c] ss:$16 sps:$4 sm:$0xff]   ;;  %v1083_v11 = vmax.f32 %v993_v63, 0.0  ;;  %v997_v14 = vadd.f32 %v996_v61, %v8499_v51  ;;  %v7466_v16 = vld [vmem:[#allocation7 + $0x460] ss:$16 sps:$4 sm:$0xff]  }
 0x1e8   :  { %3418 = vmatprep.mubr.bf16.mxu1 %v8417_v12  ;;  %3491 = vmatprep.subr.bf16.mxu1 %v7459_v8  ;;  %v1090_v43 = vmax.f32 %v886_v29, 0.0  ;;  %v7468_v12 = vld [vmem:[#allocation7 + $0x464] ss:$16 sps:$4 sm:$0xff]   ;;  %v1084_v21 = vmax.f32 %v995_v5, 0.0  ;;  %v7475_v40 = vld [vmem:[#allocation7 + $0x488] ss:$16 sps:$4 sm:$0xff]  }
 0x1e9   :  { %v8525_v47 = vpack.c.bf16 %v1089_v39, %v1081_v15  ;;  %v998_v15 = vpop.f32.mrb[39].mxu1  ;;  %v1091_v29 = vmax.f32 %v997_v14, 0.0  ;;  %v7472_v39 = vld [vmem:[#allocation7 + $0x480] ss:$16 sps:$4 sm:$0xff]   ;;  %v7481_v14 = vld [vmem:[#allocation7 + $0x4a8] ss:$16 sps:$4 sm:$0xff]  }
 0x1ea   :  { %3040 = vmatpush1.bf16.msra.mxu0 %v7454_v24  ;;  %3492 = vmatpush1.bf16.msra.mxu1 %v7457_v25  ;;  %v8529_v4 = vpack.c.bf16 %v1090_v43, %v1082_v28  ;;  %v889_v49 = vpop.f32.mrb[40].mxu0  ;;  %v999_v24 = vadd.f32 %v998_v15, %v8503_v23  ;;  %v7477_v25 = vld [vmem:[#allocation7 + $0x48c] ss:$16 sps:$4 sm:$0xff]  }
 0x1eb   :  { %3041 = vmatprep.subr.bf16.mxu0 %v7462_v26  ;;  %3493 = vmatprep.subr.bf16.mxu1 %v7465_v38  ;;  %v890_v57 = vadd.f32 %v889_v49, %v8478_v56  ;;  %v891_v58 = vpop.f32.mrb[41].mxu0  ;;  %v8547_v38 = vpack.c.bf16 %v1091_v29, %v1083_v11  ;;  %v7478_v11 = vld [vmem:[#allocation7 + $0x4a0] ss:$16 sps:$4 sm:$0xff]  }
 0x1ec   :  { %v892_v35 = vadd.f32 %v891_v58, %v8481_v37  ;;  %v893_v2 = vpop.f32.mrb[42].mxu0  ;;  %v1092_v27 = vmax.f32 %v999_v24, 0.0  ;;  %v7483_v58 = vld [vmem:[#allocation7 + $0x4ac] ss:$16 sps:$4 sm:$0xff]  }
 0x1ed   :  { %2967 = vmatmul.mubr.bf16.gmra.mrb[68].mxu0 %v8415_v7  ;;  %3419 = vmatmul.mubr.bf16.gmra.mrb[68].mxu1 %v8415_v7  ;;  %v1097_v8 = vmax.f32 %v890_v57, 0.0  ;;  %v894_v9 = vadd.f32 %v893_v2, %v8478_v56  ;;  %v895_v10 = vpop.f32.mrb[43].mxu0  ;;  %v7474_v7 = vld [vmem:[#allocation7 + $0x484] ss:$16 sps:$4 sm:$0xff]  }
 0x1ee   :  { %3042 = vmatpush1.bf16.msra.mxu0 %v7460_v48  ;;  %3494 = vmatpush1.bf16.msra.mxu1 %v7463_v50  ;;  %v1098_v19 = vmax.f32 %v892_v35, 0.0  ;;  %v896_v20 = vadd.f32 %v895_v10, %v8481_v37  ;;  %v8551_v48 = vpack.c.bf16 %v1092_v27, %v1084_v21  ;;  %v1002_v50 = vpop.f32.mrb[40].mxu1  ;;  %v7487_v27 = vld [vmem:[#allocation7 + $0x4c8] ss:$16 sps:$4 sm:$0xff]  }
 0x1ef   :  { %3043 = vmatprep.subr.bf16.mxu0 %v7468_v12  ;;  %2976 = vmatprep.mubr.bf16.mxu0 %v8429_v59  ;;  %v1105_v28 = vmax.f32 %v894_v9, 0.0  ;;  %v1003_v12 = vadd.f32 %v1002_v50, %v8499_v51  ;;  %v1004_v57 = vpop.f32.mrb[41].mxu1 }
 0x1f0   :  { %3428 = vmatprep.mubr.bf16.mxu1 %v8429_v59  ;;  %3495 = vmatprep.subr.bf16.mxu1 %v7471_v32  ;;  %v1106_v31 = vmax.f32 %v896_v20, 0.0  ;;  %v7480_v59 = vld [vmem:[#allocation7 + $0x4a4] ss:$16 sps:$4 sm:$0xff]   ;;  %v1005_v32 = vadd.f32 %v1004_v57, %v8503_v23  ;;  %v1006_v35 = vpop.f32.mrb[42].mxu1  ;;  %v7489_v20 = vld [vmem:[#allocation7 + $0x4cc] ss:$16 sps:$4 sm:$0xff]  }
 0x1f1   :  { %v8545_v26 = vpack.c.bf16 %v1105_v28, %v1097_v8  ;;  %v1099_v8 = vmax.f32 %v1003_v12, 0.0  ;;  %v1007_v9 = vadd.f32 %v1006_v35, %v8499_v51  ;;  %v1008_v10 = vpop.f32.mrb[43].mxu1  ;;  %v7495_v57 = vld [vmem:[#allocation7 + $0x4ec] ss:$16 sps:$4 sm:$0xff]  }
 0x1f2   :  { %3044 = vmatpush1.bf16.msra.mxu0 %v7466_v16  ;;  %3496 = vmatpush1.bf16.msra.mxu1 %v7469_v18  ;;  %v8549_v43 = vpack.c.bf16 %v1106_v31, %v1098_v19  ;;  %v899_v46 = vpop.f32.mrb[44].mxu0  ;;  %v1100_v18 = vmax.f32 %v1005_v32, 0.0  ;;  %v1009_v19 = vadd.f32 %v1008_v10, %v8503_v23  ;;  %v7484_v31 = vld [vmem:[#allocation7 + $0x4c0] ss:$16 sps:$4 sm:$0xff]  }
 0x1f3   :  { %3045 = vmatprep.subr.bf16.mxu0 %v7474_v7  ;;  %3497 = vmatprep.subr.bf16.mxu1 %v7477_v25  ;;  %v900_v49 = vadd.f32 %v899_v46, %v8478_v56  ;;  %v901_v53 = vpop.f32.mrb[45].mxu0  ;;  %v1107_v24 = vmax.f32 %v1007_v9, 0.0  ;;  %v7490_v10 = vld [vmem:[#allocation7 + $0x4e0] ss:$16 sps:$4 sm:$0xff]  }
 0x1f4   :  { %v902_v63 = vadd.f32 %v901_v53, %v8481_v37  ;;  %v903_v1 = vpop.f32.mrb[46].mxu0  ;;  %v1108_v25 = vmax.f32 %v1009_v19, 0.0  ;;  %v1012_v50 = vpop.f32.mrb[44].mxu1  ;;  %v7501_v19 = vld [vmem:[#allocation7 + $0x50c] ss:$16 sps:$4 sm:$0xff]  }
 0x1f5   :  { %2977 = vmatmul.mubr.bf16.gmra.mrb[72].mxu0 %v8427_v54  ;;  %3429 = vmatmul.mubr.bf16.gmra.mrb[72].mxu1 %v8427_v54  ;;  %v1113_v2 = vmax.f32 %v900_v49, 0.0  ;;  %v904_v5 = vadd.f32 %v903_v1, %v8478_v56  ;;  %v905_v61 = vpop.f32.mrb[47].mxu0  ;;  %v7486_v54 = vld [vmem:[#allocation7 + $0x4c4] ss:$16 sps:$4 sm:$0xff]   ;;  %v8567_v29 = vpack.c.bf16 %v1107_v24, %v1099_v8  ;;  %v1013_v53 = vadd.f32 %v1012_v50, %v8499_v51  ;;  %v1014_v12 = vpop.f32.mrb[45].mxu1 }
 0x1f6   :  { %3046 = vmatpush1.bf16.msra.mxu0 %v7472_v39  ;;  %3498 = vmatpush1.bf16.msra.mxu1 %v7475_v40  ;;  %v1114_v15 = vmax.f32 %v902_v63, 0.0  ;;  %v906_v16 = vadd.f32 %v905_v61, %v8481_v37  ;;  %v8571_v46 = vpack.c.bf16 %v1108_v25, %v1100_v18  ;;  %v1015_v1 = vadd.f32 %v1014_v12, %v8503_v23  ;;  %v1016_v32 = vpop.f32.mrb[46].mxu1 }
 0x1f7   :  { %3047 = vmatprep.subr.bf16.mxu0 %v7480_v59  ;;  %2986 = vmatprep.mubr.bf16.mxu0 %v8441_v44  ;;  %v1121_v21 = vmax.f32 %v904_v5, 0.0  ;;  %v1115_v61 = vmax.f32 %v1013_v53, 0.0  ;;  %v1017_v8 = vadd.f32 %v1016_v32, %v8499_v51  ;;  %v1018_v9 = vpop.f32.mrb[47].mxu1 }
 0x1f8   :  { %3438 = vmatprep.mubr.bf16.mxu1 %v8441_v44  ;;  %3499 = vmatprep.subr.bf16.mxu1 %v7483_v58  ;;  %v1122_v7 = vmax.f32 %v906_v16, 0.0  ;;  %v7492_v44 = vld [vmem:[#allocation7 + $0x4e4] ss:$16 sps:$4 sm:$0xff]   ;;  %v1116_v16 = vmax.f32 %v1015_v1, 0.0  ;;  %v1019_v18 = vadd.f32 %v1018_v9, %v8503_v23 }
 0x1f9   :  { %v8565_v28 = vpack.c.bf16 %v1121_v21, %v1113_v2 }
 0x1fa   :  { %3048 = vmatpush1.bf16.msra.mxu0 %v7478_v11  ;;  %3500 = vmatpush1.bf16.msra.mxu1 %v7481_v14  ;;  %v8569_v39 = vpack.c.bf16 %v1122_v7, %v1114_v15  ;;  %v909_v40 = vpop.f32.mrb[48].mxu0  ;;  %v7493_v11 = vld [vmem:[#allocation7 + $0x4e8] ss:$16 sps:$4 sm:$0xff]   ;;  %v1124_v24 = vmax.f32 %v1019_v18, 0.0 }
 0x1fb   :  { %3049 = vmatprep.subr.bf16.mxu0 %v7486_v54  ;;  %3501 = vmatprep.subr.bf16.mxu1 %v7489_v20  ;;  %v910_v59 = vadd.f32 %v909_v40, %v8478_v56  ;;  %v911_v49 = vpop.f32.mrb[49].mxu0  ;;  %v1123_v20 = vmax.f32 %v1017_v8, 0.0 }
 0x1fc   :  { %v912_v58 = vadd.f32 %v911_v49, %v8481_v37  ;;  %v913_v63 = vpop.f32.mrb[50].mxu0 }
 0x1fd   :  { %2987 = vmatmul.mubr.bf16.gmra.mrb[76].mxu0 %v8439_v0  ;;  %3439 = vmatmul.mubr.bf16.gmra.mrb[76].mxu1 %v8439_v0  ;;  %v1129_v35 = vmax.f32 %v910_v59, 0.0  ;;  %v914_v2 = vadd.f32 %v913_v63, %v8478_v56  ;;  %v915_v5 = vpop.f32.mrb[51].mxu0  ;;  %v7498_v0 = vld [vmem:[#allocation7 + $0x504] ss:$16 sps:$4 sm:$0xff]   ;;  %v8587_v25 = vpack.c.bf16 %v1123_v20, %v1115_v61  ;;  %v1022_v59 = vpop.f32.mrb[48].mxu1 }
 0x1fe   :  { %3050 = vmatpush1.bf16.msra.mxu0 %v7484_v31  ;;  %3502 = vmatpush1.bf16.msra.mxu1 %v7487_v27  ;;  %v1130_v14 = vmax.f32 %v912_v58, 0.0  ;;  %v916_v15 = vadd.f32 %v915_v5, %v8481_v37  ;;  %v7496_v31 = vld [vmem:[#allocation7 + $0x500] ss:$16 sps:$4 sm:$0xff]   ;;  %v7499_v27 = vld [vmem:[#allocation7 + $0x508] ss:$16 sps:$4 sm:$0xff]   ;;  %v1023_v12 = vadd.f32 %v1022_v59, %v8499_v51 }
 0x1ff   :  { %3051 = vmatprep.subr.bf16.mxu0 %v7492_v44  ;;  %2996 = vmatprep.mubr.bf16.mxu0 %v8453_v22  ;;  %v1137_v54 = vmax.f32 %v914_v2, 0.0  ;;  %v8591_v44 = vpack.c.bf16 %v1124_v24, %v1116_v16  ;;  %v7507_v58 = vld [vmem:[#allocation7 + $0x52c] ss:$16 sps:$4 sm:$0xff]   ;;  %v7511_v59 = vld [vmem:[#allocation7 + $0x548] ss:$16 sps:$4 sm:$0xff]  }
 0x200   :  { %3448 = vmatprep.mubr.bf16.mxu1 %v8453_v22  ;;  %3503 = vmatprep.subr.bf16.mxu1 %v7495_v57  ;;  %v1138_v21 = vmax.f32 %v916_v15, 0.0  ;;  %v7504_v22 = vld [vmem:[#allocation7 + $0x524] ss:$16 sps:$4 sm:$0xff]   ;;  %v1024_v57 = vpop.f32.mrb[49].mxu1  ;;  %v1131_v8 = vmax.f32 %v1023_v12, 0.0 }
 0x201   :  { %v8585_v7 = vpack.c.bf16 %v1137_v54, %v1129_v35  ;;  %v1025_v32 = vadd.f32 %v1024_v57, %v8503_v23  ;;  %v1026_v35 = vpop.f32.mrb[50].mxu1 }
 0x202   :  { %3052 = vmatpush1.bf16.msra.mxu0 %v7490_v10  ;;  %3504 = vmatpush1.bf16.msra.mxu1 %v7493_v11  ;;  %v8589_v40 = vpack.c.bf16 %v1138_v21, %v1130_v14  ;;  %v919_v50 = vpop.f32.mrb[52].mxu0  ;;  %v1027_v9 = vadd.f32 %v1026_v35, %v8499_v51  ;;  %v1028_v10 = vpop.f32.mrb[51].mxu1  ;;  %v7502_v11 = vld [vmem:[#allocation7 + $0x520] ss:$16 sps:$4 sm:$0xff]   ;;  %v7505_v14 = vld [vmem:[#allocation7 + $0x528] ss:$16 sps:$4 sm:$0xff]  }
 0x203   :  { %3053 = vmatprep.subr.bf16.mxu0 %v7498_v0  ;;  %3505 = vmatprep.subr.bf16.mxu1 %v7501_v19  ;;  %v920_v49 = vadd.f32 %v919_v50, %v8478_v56  ;;  %v921_v53 = vpop.f32.mrb[53].mxu0  ;;  %v1132_v18 = vmax.f32 %v1025_v32, 0.0  ;;  %v1029_v0 = vadd.f32 %v1028_v10, %v8503_v23  ;;  %v7513_v19 = vld [vmem:[#allocation7 + $0x54c] ss:$16 sps:$4 sm:$0xff]   ;;  %v7508_v50 = vld [vmem:[#allocation7 + $0x540] ss:$16 sps:$4 sm:$0xff]  }
 0x204   :  { %v922_v63 = vadd.f32 %v921_v53, %v8481_v37  ;;  %v923_v1 = vpop.f32.mrb[54].mxu0  ;;  %v1139_v20 = vmax.f32 %v1027_v9, 0.0  ;;  %v1032_v12 = vpop.f32.mrb[52].mxu1  ;;  %v7519_v32 = vld [vmem:[#allocation7 + $0x56c] ss:$16 sps:$4 sm:$0xff]  }
 0x205   :  { %2997 = vmatmul.mubr.bf16.gmra.mrb[80].mxu0 %v8451_v17  ;;  %3449 = vmatmul.mubr.bf16.gmra.mrb[80].mxu1 %v8451_v17  ;;  %v1145_v2 = vmax.f32 %v920_v49, 0.0  ;;  %v924_v5 = vadd.f32 %v923_v1, %v8478_v56  ;;  %v925_v61 = vpop.f32.mrb[55].mxu0  ;;  %v7510_v17 = vld [vmem:[#allocation7 + $0x544] ss:$16 sps:$4 sm:$0xff]   ;;  %v1140_v24 = vmax.f32 %v1029_v0, 0.0  ;;  %v1034_v1 = vpop.f32.mrb[53].mxu1 }
 0x206   :  { %3054 = vmatpush1.bf16.msra.mxu0 %v7496_v31  ;;  %3506 = vmatpush1.bf16.msra.mxu1 %v7499_v27  ;;  %v1146_v15 = vmax.f32 %v922_v63, 0.0  ;;  %v926_v16 = vadd.f32 %v925_v61, %v8481_v37  ;;  %v8607_v27 = vpack.c.bf16 %v1139_v20, %v1131_v8  ;;  %v1033_v63 = vadd.f32 %v1032_v12, %v8499_v51  ;;  %v1036_v61 = vpop.f32.mrb[54].mxu1  ;;  %v7525_v20 = vld [vmem:[#allocation7 + $0x58c] ss:$16 sps:$4 sm:$0xff]  }
 0x207   :  { %3055 = vmatprep.subr.bf16.mxu0 %v7504_v22  ;;  %3006 = vmatprep.mubr.bf16.mxu0 %v8465_v13  ;;  %v1153_v54 = vmax.f32 %v924_v5, 0.0  ;;  %v8611_v53 = vpack.c.bf16 %v1140_v24, %v1132_v18  ;;  %v1035_v5 = vadd.f32 %v1034_v1, %v8503_v23  ;;  %v7517_v18 = vld [vmem:[#allocation7 + $0x568] ss:$16 sps:$4 sm:$0xff]  }
 0x208   :  { %3458 = vmatprep.mubr.bf16.mxu1 %v8465_v13  ;;  %3507 = vmatprep.subr.bf16.mxu1 %v7507_v58  ;;  %v1154_v21 = vmax.f32 %v926_v16, 0.0  ;;  %v7516_v13 = vld [vmem:[#allocation7 + $0x564] ss:$16 sps:$4 sm:$0xff]   ;;  %v7514_v16 = vld [vmem:[#allocation7 + $0x560] ss:$16 sps:$4 sm:$0xff]  }
 0x209   :  { %v8605_v31 = vpack.c.bf16 %v1153_v54, %v1145_v2 }
 0x20a   :  { %3056 = vmatpush1.bf16.msra.mxu0 %v7502_v11  ;;  %3508 = vmatpush1.bf16.msra.mxu1 %v7505_v14  ;;  %v8609_v22 = vpack.c.bf16 %v1154_v21, %v1146_v15  ;;  %v929_v49 = vpop.f32.mrb[56].mxu0  ;;  %v1147_v11 = vmax.f32 %v1033_v63, 0.0  ;;  %v1037_v14 = vadd.f32 %v1036_v61, %v8499_v51  ;;  %v1038_v15 = vpop.f32.mrb[55].mxu1 }
 0x20b   :  { %3057 = vmatprep.subr.bf16.mxu0 %v7510_v17  ;;  %3509 = vmatprep.subr.bf16.mxu1 %v7513_v19  ;;  %v930_v57 = vadd.f32 %v929_v49, %v8478_v56  ;;  %v931_v58 = vpop.f32.mrb[57].mxu0  ;;  %v1148_v19 = vmax.f32 %v1035_v5, 0.0  ;;  %v1039_v54 = vadd.f32 %v1038_v15, %v8503_v23 }
 0x20c   :  { %v932_v35 = vadd.f32 %v931_v58, %v8481_v37  ;;  %v933_v2 = vpop.f32.mrb[58].mxu0  ;;  %v1155_v24 = vmax.f32 %v1037_v14, 0.0  ;;  %v7523_v58 = vld [vmem:[#allocation7 + $0x588] ss:$16 sps:$4 sm:$0xff]  }
 0x20d   :  { %3007 = vmatmul.mubr.bf16.gmra.mrb[84].mxu0 %v8463_v6  ;;  %3459 = vmatmul.mubr.bf16.gmra.mrb[84].mxu1 %v8463_v6  ;;  %v1161_v8 = vmax.f32 %v930_v57, 0.0  ;;  %v934_v9 = vadd.f32 %v933_v2, %v8478_v56  ;;  %v935_v10 = vpop.f32.mrb[59].mxu0  ;;  %v7522_v6 = vld [vmem:[#allocation7 + $0x584] ss:$16 sps:$4 sm:$0xff]   ;;  %v7520_v57 = vld [vmem:[#allocation7 + $0x580] ss:$16 sps:$4 sm:$0xff]  }
 0x20e   :  { %3058 = vmatpush1.bf16.msra.mxu0 %v7508_v50  ;;  %3510 = vmatpush1.bf16.msra.mxu1 %v7511_v59  ;;  %v1162_v0 = vmax.f32 %v932_v35, 0.0  ;;  %v936_v17 = vadd.f32 %v935_v10, %v8481_v37  ;;  %v1156_v59 = vmax.f32 %v1039_v54, 0.0  ;;  %v8627_v12 = vpack.c.bf16 %v1155_v24, %v1147_v11  ;;  %v1042_v35 = vpop.f32.mrb[56].mxu1  ;;  %v7526_v54 = vld [vmem:[#allocation7 + $0x5a0] ss:$16 sps:$4 sm:$0xff]  }
 0x20f   :  { %3059 = vmatprep.subr.bf16.mxu0 %v7516_v13  ;;  %3016 = vmatprep.mubr.bf16.mxu0 %v8485_v3  ;;  %v1169_v21 = vmax.f32 %v934_v9, 0.0  ;;  %v1043_v5 = vadd.f32 %v1042_v35, %v8499_v51  ;;  %v1044_v61 = vpop.f32.mrb[57].mxu1 }
 0x210   :  { %3468 = vmatprep.mubr.bf16.mxu1 %v8485_v3  ;;  %3511 = vmatprep.subr.bf16.mxu1 %v7519_v32  ;;  %v1170_v50 = vmax.f32 %v936_v17, 0.0  ;;  %v8631_v1 = vpack.c.bf16 %v1156_v59, %v1148_v19  ;;  %v7528_v3 = vld [vmem:[#allocation7 + $0x5a4] ss:$16 sps:$4 sm:$0xff]   ;;  %v1045_v11 = vadd.f32 %v1044_v61, %v8503_v23  ;;  %v1046_v14 = vpop.f32.mrb[58].mxu1 }
 0x211   :  { %v8625_v49 = vpack.c.bf16 %v1169_v21, %v1161_v8  ;;  %v7531_v8 = vld [vmem:[#allocation7 + $0x5ac] ss:$16 sps:$4 sm:$0xff]   ;;  %v1047_v17 = vadd.f32 %v1046_v14, %v8499_v51  ;;  %v1048_v19 = vpop.f32.mrb[59].mxu1 }
 0x212   :  { %3060 = vmatpush1.bf16.msra.mxu0 %v7514_v16  ;;  %3512 = vmatpush1.bf16.msra.mxu1 %v7517_v18  ;;  %v8629_v13 = vpack.c.bf16 %v1170_v50, %v1162_v0  ;;  %v939_v63 = vpop.f32.mrb[60].mxu0  ;;  %v1163_v0 = vmax.f32 %v1043_v5, 0.0  ;;  %v1164_v24 = vmax.f32 %v1045_v11, 0.0  ;;  %v1049_v50 = vadd.f32 %v1048_v19, %v8503_v23 }
 0x213   :  { %3061 = vmatprep.subr.bf16.mxu0 %v7522_v6  ;;  %3513 = vmatprep.subr.bf16.mxu1 %v7525_v20  ;;  %v940_v32 = vadd.f32 %v939_v63, %v8478_v56  ;;  %v941_v2 = vpop.f32.mrb[61].mxu0  ;;  %v7529_v6 = vld [vmem:[#allocation7 + $0x5a8] ss:$16 sps:$4 sm:$0xff]   ;;  %v1171_v63 = vmax.f32 %v1047_v17, 0.0 }
 0x214   :  { %v942_v9 = vadd.f32 %v941_v2, %v8481_v37  ;;  %v943_v10 = vpop.f32.mrb[62].mxu0  ;;  %v7535_v2 = vld [vmem:[#allocation7 + $0x5c8] ss:$16 sps:$4 sm:$0xff]   ;;  %v1052_v61 = vpop.f32.mrb[60].mxu1 }
 0x215   :  { %3017 = vmatmul.mubr.bf16.gmra.mrb[88].mxu0 %v8483_v62  ;;  %3469 = vmatmul.mubr.bf16.gmra.mrb[88].mxu1 %v8483_v62  ;;  %v1177_v15 = vmax.f32 %v940_v32, 0.0  ;;  %v944_v16 = vadd.f32 %v943_v10, %v8478_v56  ;;  %v945_v18 = vpop.f32.mrb[63].mxu0  ;;  %v7534_v62 = vld [vmem:[#allocation7 + $0x5c4] ss:$16 sps:$4 sm:$0xff]   ;;  %v7537_v56 = vld [vmem:[#allocation7 + $0x5cc] ss:$16 sps:$4 sm:$0xff]   ;;  %v8647_v32 = vpack.c.bf16 %v1171_v63, %v1163_v0 }
 0x216   :  { %3062 = vmatpush1.bf16.msra.mxu0 %v7520_v57  ;;  %3514 = vmatpush1.bf16.msra.mxu1 %v7523_v58  ;;  %v1178_v20 = vmax.f32 %v942_v9, 0.0  ;;  %v946_v21 = vadd.f32 %v945_v18, %v8481_v37  ;;  %v1172_v58 = vmax.f32 %v1049_v50, 0.0  ;;  %v7532_v37 = vld [vmem:[#allocation7 + $0x5c0] ss:$16 sps:$4 sm:$0xff]   ;;  %v7540_v9 = vld [vmem:[#allocation7 + $0x5e4] ss:$16 sps:$4 sm:$0xff]  }
 0x217   :  { %3063 = vmatprep.subr.bf16.mxu0 %v7528_v3  ;;  %3026 = vmatprep.mubr.bf16.mxu0 %v8509_v42  ;;  %v1185_v59 = vmax.f32 %v944_v16, 0.0  ;;  %v7543_v10 = vld [vmem:[#allocation7 + $0x5ec] ss:$16 sps:$4 sm:$0xff]   ;;  %v7538_v0 = vld [vmem:[#allocation7 + $0x5e0] ss:$16 sps:$4 sm:$0xff]  }
 0x218   :  { %3478 = vmatprep.mubr.bf16.mxu1 %v8509_v42  ;;  %3515 = vmatprep.subr.bf16.mxu1 %v7531_v8  ;;  %v1186_v57 = vmax.f32 %v946_v21, 0.0  ;;  %v8651_v5 = vpack.c.bf16 %v1172_v58, %v1164_v24  ;;  %v1053_v42 = vadd.f32 %v1052_v61, %v8499_v51  ;;  %v1054_v8 = vpop.f32.mrb[61].mxu1  ;;  %v7541_v17 = vld [vmem:[#allocation7 + $0x5e8] ss:$16 sps:$4 sm:$0xff]   ;;  %v7558_v63 = vld [vmem:[#allocation7 + $0x644] ss:$16 sps:$4 sm:$0xff]  }
 0x219   :  { %v8645_v35 = vpack.c.bf16 %v1185_v59, %v1177_v15  ;;  %v1055_v11 = vadd.f32 %v1054_v8, %v8503_v23  ;;  %v1056_v14 = vpop.f32.mrb[62].mxu1  ;;  %v7547_v50 = vld [vmem:[#allocation7 + $0x608] ss:$16 sps:$4 sm:$0xff]   ;;  %v7556_v58 = vld [vmem:[#allocation7 + $0x640] ss:$16 sps:$4 sm:$0xff]  }
 0x21a   :  { %3064 = vmatpush1.bf16.msra.mxu0 %v7526_v54  ;;  %3516 = vmatpush1.bf16.msra.mxu1 %v7529_v6  ;;  %v8649_v3 = vpack.c.bf16 %v1186_v57, %v1178_v20  ;;  %v1179_v15 = vmax.f32 %v1053_v42, 0.0  ;;  %v1057_v16 = vadd.f32 %v1056_v14, %v8499_v51  ;;  %v1058_v18 = vpop.f32.mrb[63].mxu1  ;;  %v7546_v6 = vld [vmem:[#allocation7 + $0x604] ss:$16 sps:$4 sm:$0xff]   ;;  %v7549_v20 = vld [vmem:[#allocation7 + $0x60c] ss:$16 sps:$4 sm:$0xff]  }
 0x21b   :  { %3065 = vmatprep.subr.bf16.mxu0 %v7534_v62  ;;  %3517 = vmatprep.subr.bf16.mxu1 %v7537_v56  ;;  %v1180_v19 = vmax.f32 %v1055_v11, 0.0  ;;  %v1059_v54 = vadd.f32 %v1058_v18, %v8503_v23  ;;  %v7544_v51 = vld [vmem:[#allocation7 + $0x600] ss:$16 sps:$4 sm:$0xff]   ;;  %v7552_v23 = vld [vmem:[#allocation7 + $0x624] ss:$16 sps:$4 sm:$0xff]  }
 0x21c   :  { %v1187_v21 = vmax.f32 %v1057_v16, 0.0  ;;  %v7555_v56 = vld [vmem:[#allocation7 + $0x62c] ss:$16 sps:$4 sm:$0xff]   ;;  %v7553_v59 = vld [vmem:[#allocation7 + $0x628] ss:$16 sps:$4 sm:$0xff]  }
 0x21d   :  { %3027 = vmatmul.mubr.bf16.gmra.mrb[92].mxu0 %v8505_v30  ;;  %3479 = vmatmul.mubr.bf16.gmra.mrb[92].mxu1 %v8505_v30  ;;  %v1188_v30 = vmax.f32 %v1059_v54, 0.0  ;;  %v7561_v57 = vld [vmem:[#allocation7 + $0x64c] ss:$16 sps:$4 sm:$0xff]   ;;  %v7562_v61 = vld [vmem:[#allocation7 + $0x660] ss:$16 sps:$4 sm:$0xff]  }
 0x21e   :  { %3066 = vmatpush1.bf16.msra.mxu0 %v7532_v37  ;;  %3518 = vmatpush1.bf16.msra.mxu1 %v7535_v2  ;;  %v8661_v24 = vpack.c.bf16 %v1187_v21, %v1179_v15  ;;  %v7559_v37 = vld [vmem:[#allocation7 + $0x648] ss:$16 sps:$4 sm:$0xff]   ;;  %v7564_v2 = vld [vmem:[#allocation7 + $0x664] ss:$16 sps:$4 sm:$0xff]   ;;  %v7573_v42 = vld [vmem:[#allocation7 + $0x68c] ss:$16 sps:$4 sm:$0xff]  }
 0x21f   :  { %3067 = vmatprep.subr.bf16.mxu0 %v7540_v9  ;;  %3069 = vmatprep.mubr.bf16.mxu0 %v8511_v60  ;;  %v8663_v62 = vpack.c.bf16 %v1188_v30, %v1180_v19  ;;  %v7565_v9 = vld [vmem:[#allocation7 + $0x668] ss:$16 sps:$4 sm:$0xff]   ;;  %v7568_v8 = vld [vmem:[#allocation7 + $0x680] ss:$16 sps:$4 sm:$0xff]   ;;  %v7576_v11 = vld [vmem:[#allocation7 + $0x6a4] ss:$16 sps:$4 sm:$0xff]  }
 0x220   :  { %3519 = vmatprep.subr.bf16.mxu1 %v7543_v10  ;;  %3521 = vmatprep.mubr.bf16.mxu1 %v8511_v60  ;;  %v7550_v60 = vld [vmem:[#allocation7 + $0x620] ss:$16 sps:$4 sm:$0xff]   ;;  %v7571_v10 = vld [vmem:[#allocation7 + $0x688] ss:$16 sps:$4 sm:$0xff]   ;;  %v7585_v16 = vld [vmem:[#allocation7 + $0x6cc] ss:$16 sps:$4 sm:$0xff]  }
 0x221   :  { %v7574_v14 = vld [vmem:[#allocation7 + $0x6a0] ss:$16 sps:$4 sm:$0xff]   ;;  %v7577_v15 = vld [vmem:[#allocation7 + $0x6a8] ss:$16 sps:$4 sm:$0xff]   ;;  %v7600_v30 = vld [vmem:[#allocation7 + $0x724] ss:$16 sps:$4 sm:$0xff]  }
 0x222   :  { %3068 = vmatpush1.bf16.msra.mxu0 %v7538_v0  ;;  %3520 = vmatpush1.bf16.msra.mxu1 %v7541_v17  ;;  %v7580_v18 = vld [vmem:[#allocation7 + $0x6c0] ss:$16 sps:$4 sm:$0xff]   ;;  %v7583_v0 = vld [vmem:[#allocation7 + $0x6c8] ss:$16 sps:$4 sm:$0xff]   ;;  %v7588_v17 = vld [vmem:[#allocation7 + $0x6e4] ss:$16 sps:$4 sm:$0xff]  }
 0x223   :  { %3150 = vmatprep.subr.bf16.mxu0 %v7546_v6  ;;  %3602 = vmatprep.subr.bf16.mxu1 %v7549_v20  ;;  %v7586_v19 = vld [vmem:[#allocation7 + $0x6e0] ss:$16 sps:$4 sm:$0xff]   ;;  %v7589_v54 = vld [vmem:[#allocation7 + $0x6e8] ss:$16 sps:$4 sm:$0xff]   ;;  %v7597_v6 = vld [vmem:[#allocation7 + $0x70c] ss:$16 sps:$4 sm:$0xff]  }
 0x224   :  { %v7592_v20 = vld [vmem:[#allocation7 + $0x700] ss:$16 sps:$4 sm:$0xff]   ;;  %v7595_v21 = vld [vmem:[#allocation7 + $0x708] ss:$16 sps:$4 sm:$0xff]  }
 0x225   :  { %3070 = vmatmul.mubr.bf16.vlgmr.msra.gmra.mrb[64].mxu0 %v8507_v55  ;;  %3522 = vmatmul.mubr.bf16.vlgmr.msra.gmra.mrb[64].mxu1 %v8507_v55  ;;  %v7567_v55 = vld [vmem:[#allocation7 + $0x66c] ss:$16 sps:$4 sm:$0xff]  }
 0x226   :  { %3151 = vmatpush1.bf16.msra.mxu0 %v7544_v51  ;;  %3603 = vmatpush1.bf16.msra.mxu1 %v7547_v50  ;;  %v7598_v51 = vld [vmem:[#allocation7 + $0x720] ss:$16 sps:$4 sm:$0xff]   ;;  %v7601_v50 = vld [vmem:[#allocation7 + $0x728] ss:$16 sps:$4 sm:$0xff]  }
 0x227   :  { %3152 = vmatprep.subr.bf16.mxu0 %v7552_v23  ;;  %3079 = vmatprep.mubr.bf16.mxu0 %v8529_v4  ;;  %v7609_v23 = vld [vmem:[#allocation7 + $0x74c] ss:$16 sps:$4 sm:$0xff]  }
 0x228   :  { %3531 = vmatprep.mubr.bf16.mxu1 %v8529_v4  ;;  %3604 = vmatprep.subr.bf16.mxu1 %v7555_v56  ;;  %v7570_v4 = vld [vmem:[#allocation7 + $0x684] ss:$16 sps:$4 sm:$0xff]   ;;  %v7604_v56 = vld [vmem:[#allocation7 + $0x740] ss:$16 sps:$4 sm:$0xff]  }
 0x22a   :  { %3153 = vmatpush1.bf16.msra.mxu0 %v7550_v60  ;;  %3605 = vmatpush1.bf16.msra.mxu1 %v7553_v59  ;;  %v7607_v60 = vld [vmem:[#allocation7 + $0x748] ss:$16 sps:$4 sm:$0xff]   ;;  %v7612_v59 = vld [vmem:[#allocation7 + $0x764] ss:$16 sps:$4 sm:$0xff]  }
 0x22b   :  { %3154 = vmatprep.subr.bf16.mxu0 %v7558_v63  ;;  %3606 = vmatprep.subr.bf16.mxu1 %v7561_v57  ;;  %v7610_v63 = vld [vmem:[#allocation7 + $0x760] ss:$16 sps:$4 sm:$0xff]   ;;  %v7613_v57 = vld [vmem:[#allocation7 + $0x768] ss:$16 sps:$4 sm:$0xff]  }
 0x22d   :  { %3080 = vmatmul.mubr.bf16.gmra.mrb[68].mxu0 %v8525_v47  ;;  %3532 = vmatmul.mubr.bf16.gmra.mrb[68].mxu1 %v8525_v47  ;;  %v7579_v47 = vld [vmem:[#allocation7 + $0x6ac] ss:$16 sps:$4 sm:$0xff]  }
 0x22e   :  { %3155 = vmatpush1.bf16.msra.mxu0 %v7556_v58  ;;  %3607 = vmatpush1.bf16.msra.mxu1 %v7559_v37  ;;  %v7621_v58 = vld [vmem:[#allocation7 + $0x78c] ss:$16 sps:$4 sm:$0xff]   ;;  %v7616_v37 = vld [vmem:[#allocation7 + $0x780] ss:$16 sps:$4 sm:$0xff]  }
 0x22f   :  { %3156 = vmatprep.subr.bf16.mxu0 %v7564_v2  ;;  %3089 = vmatprep.mubr.bf16.mxu0 %v8549_v43  ;;  %v7619_v2 = vld [vmem:[#allocation7 + $0x788] ss:$16 sps:$4 sm:$0xff]  }
 0x230   :  { %3541 = vmatprep.mubr.bf16.mxu1 %v8549_v43  ;;  %3608 = vmatprep.subr.bf16.mxu1 %v7567_v55  ;;  %v7582_v43 = vld [vmem:[#allocation7 + $0x6c4] ss:$16 sps:$4 sm:$0xff]  }
 0x231   :  { %v7624_v55 = vld [vmem:[#allocation7 + $0x7a4] ss:$16 sps:$4 sm:$0xff]  }
 0x232   :  { %3157 = vmatpush1.bf16.msra.mxu0 %v7562_v61  ;;  %3609 = vmatpush1.bf16.msra.mxu1 %v7565_v9  ;;  %v7622_v61 = vld [vmem:[#allocation7 + $0x7a0] ss:$16 sps:$4 sm:$0xff]   ;;  %v7625_v9 = vld [vmem:[#allocation7 + $0x7a8] ss:$16 sps:$4 sm:$0xff]  }
 0x233   :  { %3158 = vmatprep.subr.bf16.mxu0 %v7570_v4  ;;  %3610 = vmatprep.subr.bf16.mxu1 %v7573_v42  ;;  %v7633_v4 = vld [vmem:[#allocation7 + $0x7cc] ss:$16 sps:$4 sm:$0xff]   ;;  %v7628_v42 = vld [vmem:[#allocation7 + $0x7c0] ss:$16 sps:$4 sm:$0xff]  }
 0x235   :  { %3090 = vmatmul.mubr.bf16.gmra.mrb[72].mxu0 %v8545_v26  ;;  %3542 = vmatmul.mubr.bf16.gmra.mrb[72].mxu1 %v8545_v26  ;;  %v7591_v26 = vld [vmem:[#allocation7 + $0x6ec] ss:$16 sps:$4 sm:$0xff]  }
 0x236   :  { %3159 = vmatpush1.bf16.msra.mxu0 %v7568_v8  ;;  %3611 = vmatpush1.bf16.msra.mxu1 %v7571_v10  ;;  %v7631_v8 = vld [vmem:[#allocation7 + $0x7c8] ss:$16 sps:$4 sm:$0xff]   ;;  %v7636_v10 = vld [vmem:[#allocation7 + $0x7e4] ss:$16 sps:$4 sm:$0xff]  }
 0x237   :  { %3160 = vmatprep.subr.bf16.mxu0 %v7576_v11  ;;  %3099 = vmatprep.mubr.bf16.mxu0 %v8569_v39  ;;  %v7634_v11 = vld [vmem:[#allocation7 + $0x7e0] ss:$16 sps:$4 sm:$0xff]  }
 0x238   :  { %3551 = vmatprep.mubr.bf16.mxu1 %v8569_v39  ;;  %3612 = vmatprep.subr.bf16.mxu1 %v7579_v47  ;;  %v7594_v39 = vld [vmem:[#allocation7 + $0x704] ss:$16 sps:$4 sm:$0xff]  }
 0x23a   :  { %3161 = vmatpush1.bf16.msra.mxu0 %v7574_v14  ;;  %3613 = vmatpush1.bf16.msra.mxu1 %v7577_v15 }
 0x23b   :  { %3162 = vmatprep.subr.bf16.mxu0 %v7582_v43  ;;  %3614 = vmatprep.subr.bf16.mxu1 %v7585_v16 }
 0x23d   :  { %3100 = vmatmul.mubr.bf16.gmra.mrb[76].mxu0 %v8565_v28  ;;  %3552 = vmatmul.mubr.bf16.gmra.mrb[76].mxu1 %v8565_v28  ;;  %v7603_v28 = vld [vmem:[#allocation7 + $0x72c] ss:$16 sps:$4 sm:$0xff]  }
 0x23e   :  { %3163 = vmatpush1.bf16.msra.mxu0 %v7580_v18  ;;  %3615 = vmatpush1.bf16.msra.mxu1 %v7583_v0 }
 0x23f   :  { %3164 = vmatprep.subr.bf16.mxu0 %v7588_v17  ;;  %3109 = vmatprep.mubr.bf16.mxu0 %v8589_v40 }
 0x240   :  { %3561 = vmatprep.mubr.bf16.mxu1 %v8589_v40  ;;  %3616 = vmatprep.subr.bf16.mxu1 %v7591_v26  ;;  %v7606_v40 = vld [vmem:[#allocation7 + $0x744] ss:$16 sps:$4 sm:$0xff]  }
 0x242   :  { %3165 = vmatpush1.bf16.msra.mxu0 %v7586_v19  ;;  %3617 = vmatpush1.bf16.msra.mxu1 %v7589_v54 }
 0x243   :  { %3166 = vmatprep.subr.bf16.mxu0 %v7594_v39  ;;  %3618 = vmatprep.subr.bf16.mxu1 %v7597_v6 }
 0x245   :  { %3110 = vmatmul.mubr.bf16.gmra.mrb[80].mxu0 %v8585_v7  ;;  %3562 = vmatmul.mubr.bf16.gmra.mrb[80].mxu1 %v8585_v7  ;;  %v7615_v7 = vld [vmem:[#allocation7 + $0x76c] ss:$16 sps:$4 sm:$0xff]  }
 0x246   :  { %3167 = vmatpush1.bf16.msra.mxu0 %v7592_v20  ;;  %3619 = vmatpush1.bf16.msra.mxu1 %v7595_v21 }
 0x247   :  { %3168 = vmatprep.subr.bf16.mxu0 %v7600_v30  ;;  %3119 = vmatprep.mubr.bf16.mxu0 %v8609_v22 }
 0x248   :  { %3571 = vmatprep.mubr.bf16.mxu1 %v8609_v22  ;;  %3620 = vmatprep.subr.bf16.mxu1 %v7603_v28  ;;  %v7618_v22 = vld [vmem:[#allocation7 + $0x784] ss:$16 sps:$4 sm:$0xff]  }
 0x24a   :  { %3169 = vmatpush1.bf16.msra.mxu0 %v7598_v51  ;;  %3621 = vmatpush1.bf16.msra.mxu1 %v7601_v50 }
 0x24b   :  { %3170 = vmatprep.subr.bf16.mxu0 %v7606_v40  ;;  %3622 = vmatprep.subr.bf16.mxu1 %v7609_v23 }
 0x24d   :  { %3120 = vmatmul.mubr.bf16.gmra.mrb[84].mxu0 %v8605_v31  ;;  %3572 = vmatmul.mubr.bf16.gmra.mrb[84].mxu1 %v8605_v31  ;;  %v7627_v31 = vld [vmem:[#allocation7 + $0x7ac] ss:$16 sps:$4 sm:$0xff]  }
 0x24e   :  { %3171 = vmatpush1.bf16.msra.mxu0 %v7604_v56  ;;  %3623 = vmatpush1.bf16.msra.mxu1 %v7607_v60 }
 0x24f   :  { %3172 = vmatprep.subr.bf16.mxu0 %v7612_v59  ;;  %3129 = vmatprep.mubr.bf16.mxu0 %v8629_v13 }
 0x250   :  { %3581 = vmatprep.mubr.bf16.mxu1 %v8629_v13  ;;  %3624 = vmatprep.subr.bf16.mxu1 %v7615_v7  ;;  %v7630_v13 = vld [vmem:[#allocation7 + $0x7c4] ss:$16 sps:$4 sm:$0xff]  }
 0x252   :  { %3173 = vmatpush1.bf16.msra.mxu0 %v7610_v63  ;;  %3625 = vmatpush1.bf16.msra.mxu1 %v7613_v57 }
 0x253   :  { %3174 = vmatprep.subr.bf16.mxu0 %v7618_v22  ;;  %3626 = vmatprep.subr.bf16.mxu1 %v7621_v58 }
 0x255   :  { %3130 = vmatmul.mubr.bf16.gmra.mrb[88].mxu0 %v8625_v49  ;;  %3582 = vmatmul.mubr.bf16.gmra.mrb[88].mxu1 %v8625_v49  ;;  %v7639_v49 = vld [vmem:[#allocation7 + $0x7ec] ss:$16 sps:$4 sm:$0xff]  }
 0x256   :  { %3175 = vmatpush1.bf16.msra.mxu0 %v7616_v37  ;;  %3627 = vmatpush1.bf16.msra.mxu1 %v7619_v2 }
 0x257   :  { %3176 = vmatprep.subr.bf16.mxu0 %v7624_v55  ;;  %3139 = vmatprep.mubr.bf16.mxu0 %v8649_v3 }
 0x258   :  { %3591 = vmatprep.mubr.bf16.mxu1 %v8649_v3  ;;  %3628 = vmatprep.subr.bf16.mxu1 %v7627_v31  ;;  %v7637_v3 = vld [vmem:[#allocation7 + $0x7e8] ss:$16 sps:$4 sm:$0xff]  }
 0x25a   :  { %3177 = vmatpush1.bf16.msra.mxu0 %v7622_v61  ;;  %3629 = vmatpush1.bf16.msra.mxu1 %v7625_v9 }
 0x25b   :  { %3178 = vmatprep.subr.bf16.mxu0 %v7630_v13  ;;  %3630 = vmatprep.subr.bf16.mxu1 %v7633_v4 }
 0x25d   :  { %3140 = vmatmul.mubr.bf16.gmra.mrb[92].mxu0 %v8645_v35  ;;  %3592 = vmatmul.mubr.bf16.gmra.mrb[92].mxu1 %v8645_v35 }
 0x25e   :  { %3179 = vmatpush1.bf16.msra.mxu0 %v7628_v42  ;;  %3182 = vmatprep.mubr.bf16.mxu0 %v8531_v52 }
 0x25f   :  { %3631 = vmatpush1.bf16.msra.mxu1 %v7631_v8  ;;  %3634 = vmatprep.mubr.bf16.mxu1 %v8531_v52 }
 0x260   :  { %3180 = vmatprep.subr.bf16.mxu0 %v7636_v10  ;;  %3632 = vmatprep.subr.bf16.mxu1 %v7639_v49 }
 0x262   :  { %3181 = vmatpush1.bf16.msra.mxu0 %v7634_v11 }
 0x263   :  { %3633 = vmatpush1.bf16.msra.mxu1 %v7637_v3 }
 0x265   :  { %3183 = vmatmul.mubr.bf16.vlgmr.msra.gmra.mrb[64].mxu0 %v8527_v33 }
 0x266   :  { %3635 = vmatmul.mubr.bf16.vlgmr.msra.gmra.mrb[64].mxu1 %v8527_v33  ;;  %3192 = vmatprep.mubr.bf16.mxu0 %v8551_v48  ;;  %v1509_v33 = vld [vmem:[#allocation8] sm:$0xf] }
 0x267   :  { %3644 = vmatprep.mubr.bf16.mxu1 %v8551_v48  ;;  %v8728_v52 = vrot.slane %v1509_v33, %v8362_v34  ;;  %v8734_v48 = vrot.slane %v1509_v33, %v8367_v36 }
 0x26d   :  { %3193 = vmatmul.mubr.bf16.gmra.mrb[68].mxu0 %v8547_v38 }
 0x26e   :  { %3645 = vmatmul.mubr.bf16.gmra.mrb[68].mxu1 %v8547_v38  ;;  %3202 = vmatprep.mubr.bf16.mxu0 %v8571_v46  ;;  %v8731_v38 = vrot.slane %v1509_v33, %v8379_v41 }
 0x26f   :  { %3654 = vmatprep.mubr.bf16.mxu1 %v8571_v46  ;;  %v8737_v46 = vrot.slane %v1509_v33, %v8383_v45 }
 0x275   :  { %3203 = vmatmul.mubr.bf16.gmra.mrb[72].mxu0 %v8567_v29 }
 0x276   :  { %3655 = vmatmul.mubr.bf16.gmra.mrb[72].mxu1 %v8567_v29  ;;  %3212 = vmatprep.mubr.bf16.mxu0 %v8591_v44 }
 0x277   :  { %3664 = vmatprep.mubr.bf16.mxu1 %v8591_v44 }
 0x27d   :  { %3213 = vmatmul.mubr.bf16.gmra.mrb[76].mxu0 %v8587_v25 }
 0x27e   :  { %3665 = vmatmul.mubr.bf16.gmra.mrb[76].mxu1 %v8587_v25  ;;  %3222 = vmatprep.mubr.bf16.mxu0 %v8611_v53 }
 0x27f   :  { %3674 = vmatprep.mubr.bf16.mxu1 %v8611_v53 }
 0x285   :  { %3223 = vmatmul.mubr.bf16.gmra.mrb[80].mxu0 %v8607_v27 }
 0x286   :  { %3675 = vmatmul.mubr.bf16.gmra.mrb[80].mxu1 %v8607_v27  ;;  %3232 = vmatprep.mubr.bf16.mxu0 %v8631_v1 }
 0x287   :  { %3684 = vmatprep.mubr.bf16.mxu1 %v8631_v1 }
 0x28d   :  { %3233 = vmatmul.mubr.bf16.gmra.mrb[84].mxu0 %v8627_v12 }
 0x28e   :  { %3685 = vmatmul.mubr.bf16.gmra.mrb[84].mxu1 %v8627_v12  ;;  %3242 = vmatprep.mubr.bf16.mxu0 %v8651_v5 }
 0x28f   :  { %3694 = vmatprep.mubr.bf16.mxu1 %v8651_v5 }
 0x295   :  { %3243 = vmatmul.mubr.bf16.gmra.mrb[88].mxu0 %v8647_v32 }
 0x296   :  { %3695 = vmatmul.mubr.bf16.gmra.mrb[88].mxu1 %v8647_v32  ;;  %3252 = vmatprep.mubr.bf16.mxu0 %v8663_v62 }
 0x297   :  { %3704 = vmatprep.mubr.bf16.mxu1 %v8663_v62 }
 0x29d   :  { %3253 = vmatmul.mubr.bf16.gmra.mrb[92].mxu0 %v8661_v24 }
 0x29e   :  { %3705 = vmatmul.mubr.bf16.gmra.mrb[92].mxu1 %v8661_v24 }
 0x338   :  { %v3184_v29 = vpop.f32.mrb[64].mxu0 }
 0x339   :  { %v8740_v25 = vadd.f32 %v3184_v29, %v8728_v52  ;;  %v3636_v44 = vpop.f32.mrb[64].mxu1  ;;  %v3186_v27 = vpop.f32.mrb[65].mxu0 }
 0x33a   :  { %v8743_v53 = vadd.f32 %v3636_v44, %v8731_v38  ;;  %v8746_v12 = vadd.f32 %v3186_v27, %v8734_v48  ;;  %v3638_v1 = vpop.f32.mrb[65].mxu1  ;;  %v3188_v35 = vpop.f32.mrb[66].mxu0 }
 0x33b   :  { %v10322_v32 = vmax.f32 %v8740_v25, 0.0  ;;  %v8750_v5 = vadd.f32 %v3188_v35, %v8728_v52  ;;  %v3640_v24 = vpop.f32.mrb[66].mxu1  ;;  %v3190_v62 = vpop.f32.mrb[67].mxu0  ;;  %v8754_v14 = vadd.f32 %v3638_v1, %v8737_v46 }
 0x33c   :  { %v10321_v47 = vmax.f32 %v8746_v12, 0.0  ;;  %v8757_v15 = vadd.f32 %v3640_v24, %v8731_v38  ;;  %v8760_v43 = vadd.f32 %v3190_v62, %v8734_v48  ;;  %v3642_v16 = vpop.f32.mrb[67].mxu1  ;;  %v10320_v0 = vmax.f32 %v8743_v53, 0.0 }
 0x33d   :  { %v10315_v18 = vmax.f32 %v8750_v5, 0.0  ;;  %v8770_v19 = vadd.f32 %v3642_v16, %v8737_v46  ;;  %v10317_v54 = vmax.f32 %v8754_v14, 0.0 }
 0x33e   :  { %v3781_v17 = vadd.f32 %v10321_v47, %v10322_v32  ;;  %v10312_v26 = vmax.f32 %v8760_v43, 0.0  ;;  %v10311_v39 = vmax.f32 %v8757_v15, 0.0 }
 0x33f   :  { %v10310_v7 = vmax.f32 %v8770_v19, 0.0 }
 0x340   :  { %v3786_v6 = vadd.f32 %v10312_v26, %v10315_v18  ;;  %v3194_v20 = vpop.f32.mrb[68].mxu0  ;;  %v3782_v21 = vadd.f32 %v3781_v17, %v10320_v0 }
 0x341   :  { %v8781_v30 = vadd.f32 %v3194_v20, %v8728_v52  ;;  %v3646_v28 = vpop.f32.mrb[68].mxu1  ;;  %v3196_v51 = vpop.f32.mrb[69].mxu0 }
 0x342   :  { %v8784_v50 = vadd.f32 %v3646_v28, %v8731_v38  ;;  %v8787_v40 = vadd.f32 %v3196_v51, %v8734_v48  ;;  %v3648_v23 = vpop.f32.mrb[69].mxu1  ;;  %v3198_v56 = vpop.f32.mrb[70].mxu0  ;;  %v3783_v60 = vadd.f32 %v3782_v21, %v10317_v54  ;;  %v3787_v59 = vadd.f32 %v3786_v6, %v10311_v39 }
 0x343   :  { %v10306_v63 = vmax.f32 %v8781_v30, 0.0  ;;  %v8796_v57 = vadd.f32 %v3198_v56, %v8728_v52  ;;  %v3650_v22 = vpop.f32.mrb[70].mxu1  ;;  %v3200_v58 = vpop.f32.mrb[71].mxu0  ;;  %v8800_v2 = vadd.f32 %v3648_v23, %v8737_v46 }
 0x344   :  { %v10305_v37 = vmax.f32 %v8787_v40, 0.0  ;;  %v8803_v55 = vadd.f32 %v3650_v22, %v8731_v38  ;;  %v8806_v31 = vadd.f32 %v3200_v58, %v8734_v48  ;;  %v3652_v61 = vpop.f32.mrb[71].mxu1  ;;  %3784 = vadd.xlane.f32.xlu0 %v3783_v60  ;;  %v10304_v13 = vmax.f32 %v8784_v50, 0.0 }
 0x345   :  { %v10299_v9 = vmax.f32 %v8796_v57, 0.0  ;;  %v3788_v8 = vadd.f32 %v3787_v59, %v10310_v7  ;;  %v8818_v10 = vadd.f32 %v3652_v61, %v8737_v46  ;;  %v10301_v49 = vmax.f32 %v8800_v2, 0.0 }
 0x346   :  { %v3791_v4 = vadd.f32 %v10305_v37, %v10306_v63  ;;  %v10296_v42 = vmax.f32 %v8806_v31, 0.0  ;;  %v10295_v11 = vmax.f32 %v8803_v55, 0.0 }
 0x347   :  { %v10291_v20 = vmax.f32 %v8818_v10, 0.0 }
 0x348   :  { %v3796_v3 = vadd.f32 %v10296_v42, %v10299_v9  ;;  %v3204_v33 = vpop.f32.mrb[72].mxu0  ;;  %3789 = vadd.xlane.f32.xlu0 %v3788_v8  ;;  %v3792_v29 = vadd.f32 %v3791_v4, %v10304_v13 }
 0x349   :  { %v8829_v44 = vadd.f32 %v3204_v33, %v8728_v52  ;;  %v3656_v27 = vpop.f32.mrb[72].mxu1  ;;  %v3206_v1 = vpop.f32.mrb[73].mxu0 }
 0x34a   :  { %v8832_v35 = vadd.f32 %v3656_v27, %v8731_v38  ;;  %v8835_v24 = vadd.f32 %v3206_v1, %v8734_v48  ;;  %v3658_v62 = vpop.f32.mrb[73].mxu1  ;;  %v3208_v16 = vpop.f32.mrb[74].mxu0  ;;  %v3793_v17 = vadd.f32 %v3792_v29, %v10301_v49  ;;  %v3797_v6 = vadd.f32 %v3796_v3, %v10295_v11 }
 0x34b   :  { %v10290_v21 = vmax.f32 %v8829_v44, 0.0  ;;  %v8844_v28 = vadd.f32 %v3208_v16, %v8728_v52  ;;  %v3660_v51 = vpop.f32.mrb[74].mxu1  ;;  %v3210_v23 = vpop.f32.mrb[75].mxu0  ;;  %v8848_v60 = vadd.f32 %v3658_v62, %v8737_v46 }
 0x34c   :  { %v10289_v56 = vmax.f32 %v8835_v24, 0.0  ;;  %v8851_v59 = vadd.f32 %v3660_v51, %v8731_v38  ;;  %v8854_v22 = vadd.f32 %v3210_v23, %v8734_v48  ;;  %v3662_v58 = vpop.f32.mrb[75].mxu1  ;;  %3794 = vadd.xlane.f32.xlu1 %v3793_v17  ;;  %v10294_v4 = vmax.f32 %v8832_v35, 0.0 }
 0x34d   :  { %v10293_v61 = vmax.f32 %v8844_v28, 0.0  ;;  %v3798_v33 = vadd.f32 %v3797_v6, %v10291_v20  ;;  %v8866_v29 = vadd.f32 %v3662_v58, %v8737_v46  ;;  %v10298_v27 = vmax.f32 %v8848_v60, 0.0 }
 0x34e   :  { %v3801_v8 = vadd.f32 %v10289_v56, %v10290_v21  ;;  %v10292_v3 = vmax.f32 %v8854_v22, 0.0  ;;  %v10297_v1 = vmax.f32 %v8851_v59, 0.0 }
 0x350   :  { %v3806_v62 = vadd.f32 %v10292_v3, %v10293_v61  ;;  %v3214_v16 = vpop.f32.mrb[76].mxu0  ;;  %3799 = vadd.xlane.f32.xlu1 %v3798_v33  ;;  %v3802_v17 = vadd.f32 %v3801_v8, %v10294_v4  ;;  %v10300_v8 = vmax.f32 %v8866_v29, 0.0 }
 0x351   :  { %v8877_v51 = vadd.f32 %v3214_v16, %v8728_v52  ;;  %v3666_v6 = vpop.f32.mrb[76].mxu1  ;;  %v3216_v23 = vpop.f32.mrb[77].mxu0 }
 0x352   :  { %v8880_v58 = vadd.f32 %v3666_v6, %v8731_v38  ;;  %v8883_v56 = vadd.f32 %v3216_v23, %v8734_v48  ;;  %v3668_v21 = vpop.f32.mrb[77].mxu1  ;;  %v3218_v20 = vpop.f32.mrb[78].mxu0  ;;  %v3803_v3 = vadd.f32 %v3802_v17, %v10298_v27  ;;  %v3807_v33 = vadd.f32 %v3806_v62, %v10297_v1 }
 0x353   :  { %v10303_v16 = vmax.f32 %v8877_v51, 0.0  ;;  %v8892_v61 = vadd.f32 %v3218_v20, %v8728_v52  ;;  %v3670_v6 = vpop.f32.mrb[78].mxu1  ;;  %v3220_v4 = vpop.f32.mrb[79].mxu0  ;;  %v8896_v11 = vadd.f32 %v3668_v21, %v8737_v46 }
 0x354   :  { %v10302_v23 = vmax.f32 %v8883_v56, 0.0  ;;  %v8899_v42 = vadd.f32 %v3670_v6, %v8731_v38  ;;  %v8902_v17 = vadd.f32 %v3220_v4, %v8734_v48  ;;  %v3672_v62 = vpop.f32.mrb[79].mxu1  ;;  %3804 = vadd.xlane.f32.xlu0 %v3803_v3  ;;  %v3808_v20 = vadd.f32 %v3807_v33, %v10300_v8 }
 0x355   :  { %v10308_v1 = vmax.f32 %v8892_v61, 0.0  ;;  %v10309_v27 = vmax.f32 %v8880_v58, 0.0  ;;  %v8914_v9 = vadd.f32 %v3672_v62, %v8737_v46  ;;  %v10314_v4 = vmax.f32 %v8896_v11, 0.0 }
 0x356   :  { %v3811_v21 = vadd.f32 %v10302_v23, %v10303_v16  ;;  %v10307_v6 = vmax.f32 %v8902_v17, 0.0  ;;  %3809 = vadd.xlane.f32.xlu1 %v3808_v20  ;;  %v10313_v3 = vmax.f32 %v8899_v42, 0.0 }
 0x358   :  { %v3816_v33 = vadd.f32 %v10307_v6, %v10308_v1  ;;  %v3224_v8 = vpop.f32.mrb[80].mxu0  ;;  %v3812_v49 = vadd.f32 %v3811_v21, %v10309_v27  ;;  %v10316_v21 = vmax.f32 %v8914_v9, 0.0 }
 0x359   :  { %v8925_v23 = vadd.f32 %v3224_v8, %v8728_v52  ;;  %v3676_v16 = vpop.f32.mrb[80].mxu1  ;;  %v3226_v62 = vpop.f32.mrb[81].mxu0 }
 0x35a   :  { %v8928_v20 = vadd.f32 %v3676_v16, %v8731_v38  ;;  %v8931_v13 = vadd.f32 %v3226_v62, %v8734_v48  ;;  %v3678_v37 = vpop.f32.mrb[81].mxu1  ;;  %v3228_v63 = vpop.f32.mrb[82].mxu0  ;;  %v3813_v6 = vadd.f32 %v3812_v49, %v10314_v4  ;;  %v3817_v1 = vadd.f32 %v3816_v33, %v10313_v3 }
 0x35b   :  { %v10319_v8 = vmax.f32 %v8925_v23, 0.0  ;;  %v8940_v27 = vadd.f32 %v3228_v63, %v8728_v52  ;;  %v3680_v16 = vpop.f32.mrb[82].mxu1  ;;  %v3230_v7 = vpop.f32.mrb[83].mxu0  ;;  %v8944_v39 = vadd.f32 %v3678_v37, %v8737_v46 }
 0x35c   :  { %v10318_v62 = vmax.f32 %v8931_v13, 0.0  ;;  %v8947_v26 = vadd.f32 %v3680_v16, %v8731_v38  ;;  %v8950_v49 = vadd.f32 %v3230_v7, %v8734_v48  ;;  %v3682_v33 = vpop.f32.mrb[83].mxu1  ;;  %3814 = vadd.xlane.f32.xlu0 %v3813_v6  ;;  %v3818_v63 = vadd.f32 %v3817_v1, %v10316_v21 }
 0x35d   :  { %v10324_v3 = vmax.f32 %v8940_v27, 0.0  ;;  %v10325_v4 = vmax.f32 %v8928_v20, 0.0  ;;  %v8962_v18 = vadd.f32 %v3682_v33, %v8737_v46  ;;  %v10333_v7 = vmax.f32 %v8944_v39, 0.0 }
 0x35e   :  { %v3821_v37 = vadd.f32 %v10318_v62, %v10319_v8  ;;  %v10323_v16 = vmax.f32 %v8950_v49, 0.0  ;;  %3819 = vadd.xlane.f32.xlu1 %v3818_v63  ;;  %v10332_v6 = vmax.f32 %v8947_v26, 0.0 }
 0x35f   :  { %10419 = vst [vmem:[#allocation24_spill] sm:$0xff] %v8962_v18 }
 0x360   :  { %v3826_v1 = vadd.f32 %v10323_v16, %v10324_v3  ;;  %v3234_v21 = vpop.f32.mrb[84].mxu0  ;;  %v3822_v54 = vadd.f32 %v3821_v37, %v10325_v4  ;;  %v10336_v37 = vmax.f32 %v8962_v18, 0.0 }
 0x361   :  { %v8973_v62 = vadd.f32 %v3234_v21, %v8728_v52  ;;  %v3686_v8 = vpop.f32.mrb[84].mxu1  ;;  %v3236_v33 = vpop.f32.mrb[85].mxu0 }
 0x362   :  { %v8976_v63 = vadd.f32 %v3686_v8, %v8731_v38  ;;  %v8979_v0 = vadd.f32 %v3236_v33, %v8734_v48  ;;  %v3688_v47 = vpop.f32.mrb[85].mxu1  ;;  %v3238_v32 = vpop.f32.mrb[86].mxu0  ;;  %v3823_v16 = vadd.f32 %v3822_v54, %v10333_v7  ;;  %v3827_v3 = vadd.f32 %v3826_v1, %v10332_v6 }
 0x363   :  { %10420 = vst [vmem:[#allocation25_spill] sm:$0xff] %v8973_v62  ;;  %v10339_v21 = vmax.f32 %v8973_v62, 0.0  ;;  %v8988_v4 = vadd.f32 %v3238_v32, %v8728_v52  ;;  %v3690_v8 = vpop.f32.mrb[86].mxu1  ;;  %v3240_v45 = vpop.f32.mrb[87].mxu0  ;;  %v8992_v34 = vadd.f32 %v3688_v47, %v8737_v46 }
 0x364   :  { %10421 = vst [vmem:[#allocation26_spill] sm:$0xff] %v8976_v63  ;;  %10422 = vst [vmem:[#allocation27_spill] sm:$0xff] %v8979_v0  ;;  %v10338_v33 = vmax.f32 %v8979_v0, 0.0  ;;  %v8995_v41 = vadd.f32 %v3690_v8, %v8731_v38  ;;  %v8998_v54 = vadd.f32 %v3240_v45, %v8734_v48  ;;  %v3692_v1 = vpop.f32.mrb[87].mxu1  ;;  %3824 = vadd.xlane.f32.xlu0 %v3823_v16  ;;  %v10345_v7 = vmax.f32 %v8976_v63, 0.0 }
 0x365   :  { %10423 = vst [vmem:[#allocation28_spill] sm:$0xff] %v8988_v4  ;;  %10424 = vst [vmem:[#allocation29_spill] sm:$0xff] %v8992_v34  ;;  %v10343_v6 = vmax.f32 %v8988_v4, 0.0  ;;  %v3828_v32 = vadd.f32 %v3827_v3, %v10336_v37  ;;  %v9010_v36 = vadd.f32 %v3692_v1, %v8737_v46 }
 0x366   :  { %10425 = vst [vmem:[#allocation30_spill] sm:$0xff] %v8995_v41  ;;  %10426 = vst [vmem:[#allocation31_spill] sm:$0xff] %v8998_v54  ;;  %v3831_v47 = vadd.f32 %v10338_v33, %v10339_v21  ;;  %v10342_v8 = vmax.f32 %v8998_v54, 0.0  ;;  %v10431_v54 = vmax.f32 %v8992_v34, 0.0 }
 0x367   :  { %10427 = vst [vmem:[#allocation32_spill] sm:$0xff] %v9010_v36  ;;  %3829 = vadd.xlane.f32.xlu1 %v3828_v32 }
 0x368   :  { %v3836_v3 = vadd.f32 %v10342_v8, %v10343_v6  ;;  %v3244_v37 = vpop.f32.mrb[88].mxu0  ;;  %v3832_v0 = vadd.f32 %v3831_v47, %v10345_v7  ;;  %v10432_v6 = vmax.f32 %v8995_v41, 0.0  ;;  %v10350_v47 = vmax.f32 %v9010_v36, 0.0 }
 0x369   :  { %v9021_v33 = vadd.f32 %v3244_v37, %v8728_v52  ;;  %v3696_v21 = vpop.f32.mrb[88].mxu1  ;;  %v3246_v1 = vpop.f32.mrb[89].mxu0 }
 0x36a   :  { %v9024_v32 = vadd.f32 %v3696_v21, %v8731_v38  ;;  %v9027_v45 = vadd.f32 %v3246_v1, %v8734_v48  ;;  %v3698_v16 = vpop.f32.mrb[89].mxu1  ;;  %v3248_v4 = vpop.f32.mrb[90].mxu0  ;;  %v3833_v8 = vadd.f32 %v3832_v0, %v10431_v54  ;;  %v3837_v63 = vadd.f32 %v3836_v3, %v10432_v6 }
 0x36b   :  { %10428 = vst [vmem:[#allocation33_spill] sm:$0xff] %v9021_v33  ;;  %v10353_v37 = vmax.f32 %v9021_v33, 0.0  ;;  %v9036_v7 = vadd.f32 %v3248_v4, %v8728_v52  ;;  %v3700_v21 = vpop.f32.mrb[90].mxu1  ;;  %v3250_v62 = vpop.f32.mrb[91].mxu0  ;;  %v9040_v18 = vadd.f32 %v3698_v16, %v8737_v46 }
 0x36c   :  { %10429 = vst [vmem:[#allocation34_spill] sm:$0xff] %v9024_v32  ;;  %10430 = vst [vmem:[#allocation35_spill] sm:$0xff] %v9027_v45  ;;  %v10352_v1 = vmax.f32 %v9027_v45, 0.0  ;;  %v9043_v34 = vadd.f32 %v3700_v21, %v8731_v38  ;;  %v9046_v0 = vadd.f32 %v3250_v62, %v8734_v48  ;;  %v3702_v6 = vpop.f32.mrb[91].mxu1  ;;  %3834 = vadd.xlane.f32.xlu0 %v3833_v8  ;;  %v10359_v3 = vmax.f32 %v9024_v32, 0.0 }
 0x36d   :  { %10433 = vst [vmem:[#allocation36_spill] sm:$0xff] %v9036_v7  ;;  %10434 = vst [vmem:[#allocation37_spill] sm:$0xff] %v9040_v18  ;;  %v10357_v54 = vmax.f32 %v9036_v7, 0.0  ;;  %v3838_v4 = vadd.f32 %v3837_v63, %v10350_v47  ;;  %v9058_v41 = vadd.f32 %v3702_v6, %v8737_v46 }
 0x36e   :  { %10435 = vst [vmem:[#allocation38_spill] sm:$0xff] %v9046_v0  ;;  %v3841_v16 = vadd.f32 %v10352_v1, %v10353_v37  ;;  %v10356_v21 = vmax.f32 %v9046_v0, 0.0  ;;  %v10436_v0 = vmax.f32 %v9040_v18, 0.0 }
 0x36f   :  { %3839 = vadd.xlane.f32.xlu1 %v3838_v4 }
 0x370   :  { %v3846_v63 = vadd.f32 %v10356_v21, %v10357_v54  ;;  %v3254_v47 = vpop.f32.mrb[92].mxu0  ;;  %v3842_v45 = vadd.f32 %v3841_v16, %v10359_v3  ;;  %v10437_v54 = vmax.f32 %v9043_v34, 0.0  ;;  %v10365_v16 = vmax.f32 %v9058_v41, 0.0 }
 0x371   :  { %v9069_v1 = vadd.f32 %v3254_v47, %v8728_v52  ;;  %v3706_v37 = vpop.f32.mrb[92].mxu1  ;;  %v3256_v6 = vpop.f32.mrb[93].mxu0 }
 0x372   :  { %v9072_v4 = vadd.f32 %v3706_v37, %v8731_v38  ;;  %v9075_v62 = vadd.f32 %v3256_v6, %v8734_v48  ;;  %v3708_v8 = vpop.f32.mrb[93].mxu1  ;;  %v3258_v7 = vpop.f32.mrb[94].mxu0  ;;  %v3843_v21 = vadd.f32 %v3842_v45, %v10436_v0  ;;  %v3847_v32 = vadd.f32 %v3846_v63, %v10437_v54 }
 0x373   :  { %v10364_v47 = vmax.f32 %v9069_v1, 0.0  ;;  %v9084_v3 = vadd.f32 %v3258_v7, %v8728_v52  ;;  %v3710_v37 = vpop.f32.mrb[94].mxu1  ;;  %v3260_v33 = vpop.f32.mrb[95].mxu0  ;;  %v9088_v36 = vadd.f32 %v3708_v8, %v8737_v46 }
 0x374   :  { %v10363_v6 = vmax.f32 %v9075_v62, 0.0  ;;  %v9091_v18 = vadd.f32 %v3710_v37, %v8731_v38  ;;  %v9094_v45 = vadd.f32 %v3260_v33, %v8734_v48  ;;  %v3712_v0 = vpop.f32.mrb[95].mxu1  ;;  %3844 = vadd.xlane.f32.xlu0 %v3843_v21  ;;  %v3848_v52 = vadd.f32 %v3847_v32, %v10365_v16  ;;  %v7645_v16 = vld [vmem:[#allocation10 + $0x14] ss:$8 sps:$4 sm:$0xff]  }
 0x375   :  { %v10367_v54 = vmax.f32 %v9084_v3, 0.0  ;;  %v10371_v7 = vmax.f32 %v9072_v4, 0.0  ;;  %v9106_v63 = vadd.f32 %v3712_v0, %v8737_v46  ;;  %v10368_v48 = vmax.f32 %v9088_v36, 0.0 }
 0x376   :  { %v3851_v8 = vadd.f32 %v10363_v6, %v10364_v47  ;;  %v10366_v38 = vmax.f32 %v9094_v45, 0.0  ;;  %3849 = vadd.xlane.f32.xlu1 %v3848_v52  ;;  %v10370_v33 = vmax.f32 %v9091_v18, 0.0  ;;  %v7640_v52 = vld [vmem:[#allocation10] ss:$8 sps:$4 sm:$0xff]   ;;  %v7642_v47 = vld [vmem:[#allocation10 + $0x4] ss:$8 sps:$4 sm:$0xff]  }
 0x377   :  { %v10369_v37 = vmax.f32 %v9106_v63, 0.0  ;;  %4796 = vmatprep.subr.bf16.mxu0 %v7642_v47  ;;  %v7660_v47 = vld [vmem:[#allocation10 + $0x64] ss:$8 sps:$4 sm:$0xff]  }
 0x378   :  { %v3856_v32 = vadd.f32 %v10366_v38, %v10367_v54  ;;  %v3852_v21 = vadd.f32 %v3851_v8, %v10371_v7  ;;  %4797 = vmatpush1.bf16.msra.mxu0 %v7640_v52  ;;  %v7643_v38 = vld [vmem:[#allocation10 + $0x10] ss:$8 sps:$4 sm:$0xff]   ;;  %v7648_v8 = vld [vmem:[#allocation10 + $0x24] ss:$8 sps:$4 sm:$0xff]   ;;  %v7646_v54 = vld [vmem:[#allocation10 + $0x20] ss:$8 sps:$4 sm:$0xff]  }
 0x379   :  { %4798 = vmatprep.subr.bf16.mxu0 %v7645_v16  ;;  %v7658_v52 = vld [vmem:[#allocation10 + $0x60] ss:$8 sps:$4 sm:$0xff]   ;;  %v7663_v16 = vld [vmem:[#allocation10 + $0x74] ss:$8 sps:$4 sm:$0xff]  }
 0x37a   :  { %v3853_v6 = vadd.f32 %v3852_v21, %v10368_v48  ;;  %v3857_v46 = vadd.f32 %v3856_v32, %v10370_v33  ;;  %v7651_v21 = vld [vmem:[#allocation10 + $0x34] ss:$8 sps:$4 sm:$0xff]   ;;  %v7649_v48 = vld [vmem:[#allocation10 + $0x30] ss:$8 sps:$4 sm:$0xff]   ;;  %v7652_v32 = vld [vmem:[#allocation10 + $0x40] ss:$8 sps:$4 sm:$0xff]  }
 0x37b   :  { %v10448_v33 = vmax.f32 %v8770_v19, 0.0 }
 0x37c   :  { %3854 = vadd.xlane.f32.xlu0 %v3853_v6  ;;  %v3858_v0 = vadd.f32 %v3857_v46, %v10369_v37  ;;  %4799 = vmatpush1.bf16.msra.mxu0 %v7643_v38  ;;  %v7654_v6 = vld [vmem:[#allocation10 + $0x44] ss:$8 sps:$4 sm:$0xff]   ;;  %v7657_v46 = vld [vmem:[#allocation10 + $0x54] ss:$8 sps:$4 sm:$0xff]   ;;  %v7661_v38 = vld [vmem:[#allocation10 + $0x70] ss:$8 sps:$4 sm:$0xff]  }
 0x37d   :  { %4800 = vmatprep.subr.bf16.mxu0 %v7648_v8  ;;  %v7666_v8 = vld [vmem:[#allocation10 + $0x84] ss:$8 sps:$4 sm:$0xff]  }
 0x37e   :  { %3859 = vadd.xlane.f32.xlu1 %v3858_v0  ;;  %v7655_v0 = vld [vmem:[#allocation10 + $0x50] ss:$8 sps:$4 sm:$0xff]  }
 0x380   :  { %4801 = vmatpush1.bf16.msra.mxu0 %v7646_v54  ;;  %v7664_v54 = vld [vmem:[#allocation10 + $0x80] ss:$8 sps:$4 sm:$0xff]  }
 0x381   :  { %4802 = vmatprep.subr.bf16.mxu0 %v7651_v21  ;;  %v7669_v21 = vld [vmem:[#allocation10 + $0x94] ss:$8 sps:$4 sm:$0xff]  }
 0x384   :  { %4803 = vmatpush1.bf16.msra.mxu0 %v7649_v48  ;;  %v7667_v48 = vld [vmem:[#allocation10 + $0x90] ss:$8 sps:$4 sm:$0xff]  }
 0x385   :  { %4804 = vmatprep.subr.bf16.mxu0 %v7654_v6 }
 0x388   :  { %4805 = vmatpush1.bf16.msra.mxu0 %v7652_v32 }
 0x389   :  { %4806 = vmatprep.subr.bf16.mxu0 %v7657_v46  ;;  %v10438_v46 = vmax.f32 %v8740_v25, 0.0 }
 0x38c   :  { %4807 = vmatpush1.bf16.msra.mxu0 %v7655_v0 }
 0x38d   :  { %4808 = vmatprep.subr.bf16.mxu0 %v7660_v47  ;;  %v10439_v47 = vmax.f32 %v8746_v12, 0.0 }
 0x390   :  { %4809 = vmatpush1.bf16.msra.mxu0 %v7658_v52 }
 0x391   :  { %4810 = vmatprep.subr.bf16.mxu0 %v7663_v16  ;;  %v10440_v16 = vmax.f32 %v8743_v53, 0.0 }
 0x394   :  { %4811 = vmatpush1.bf16.msra.mxu0 %v7661_v38 }
 0x395   :  { %4812 = vmatprep.subr.bf16.mxu0 %v7666_v8 }
 0x398   :  { %4813 = vmatpush1.bf16.msra.mxu0 %v7664_v54  ;;  %v10441_v54 = vmax.f32 %v8754_v14, 0.0 }
 0x399   :  { %4814 = vmatprep.subr.bf16.mxu0 %v7669_v21 }
 0x39c   :  { %4815 = vmatpush1.bf16.msra.mxu0 %v7667_v48 }
 0x3d1   :  { %v3785_v6 = vpop.xlane.xlu0 %3784 }
 0x3d2   :  { %v3862_v32 = vmul.f32 0.001953125, %v3785_v6  ;;  %v10442_v6 = vmax.f32 %v8750_v5, 0.0 }
 0x3d4   :  { %v9125_v0 = vsub.f32 %v10438_v46, %v3862_v32  ;;  %v9129_v52 = vsub.f32 %v10439_v47, %v3862_v32  ;;  %v9133_v38 = vsub.f32 %v10440_v16, %v3862_v32  ;;  %v9137_v37 = vsub.f32 %v10441_v54, %v3862_v32 }
 0x3d5   :  { %v3790_v8 = vpop.xlane.xlu0 %3789  ;;  %v10444_v46 = vmax.f32 %v8760_v43, 0.0  ;;  %v10446_v32 = vmax.f32 %v8757_v15, 0.0 }
 0x3d6   :  { %v3863_v21 = vmul.f32 0.001953125, %v3790_v8  ;;  %v3942_v48 = vmul.f32 %v9125_v0, %v9125_v0  ;;  %v3943_v25 = vmul.f32 %v9129_v52, %v9129_v52  ;;  %v3944_v12 = vmul.f32 %v9133_v38, %v9133_v38 }
 0x3d7   :  { %v3945_v54 = vmul.f32 %v9137_v37, %v9137_v37 }
 0x3d8   :  { %v9147_v53 = vsub.f32 %v10442_v6, %v3863_v21  ;;  %v9151_v47 = vsub.f32 %v10444_v46, %v3863_v21  ;;  %v4006_v14 = vadd.f32 %v3943_v25, %v3942_v48  ;;  %v9155_v16 = vsub.f32 %v10446_v32, %v3863_v21 }
 0x3d9   :  { %v3795_v8 = vpop.xlane.xlu1 %3794  ;;  %v9161_v7 = vsub.f32 %v10448_v33, %v3863_v21  ;;  %v10449_v25 = vmax.f32 %v8781_v30, 0.0  ;;  %v10450_v32 = vmax.f32 %v8787_v40, 0.0 }
 0x3da   :  { %10443 = vst [vmem:[#allocation39_spill] sm:$0xff] %v9147_v53  ;;  %10445 = vst [vmem:[#allocation40_spill] sm:$0xff] %v9151_v47  ;;  %v3864_v5 = vmul.f32 0.001953125, %v3795_v8  ;;  %v4007_v6 = vadd.f32 %v4006_v14, %v3944_v12  ;;  %v3946_v43 = vmul.f32 %v9147_v53, %v9147_v53  ;;  %v3947_v48 = vmul.f32 %v9151_v47, %v9151_v47 }
 0x3db   :  { %10447 = vst [vmem:[#allocation41_spill] sm:$0xff] %v9155_v16  ;;  %v3948_v15 = vmul.f32 %v9155_v16, %v9155_v16  ;;  %v3949_v14 = vmul.f32 %v9161_v7, %v9161_v7  ;;  %v10451_v8 = vmax.f32 %v8784_v50, 0.0  ;;  %v10452_v16 = vmax.f32 %v8800_v2, 0.0 }
 0x3dc   :  { %v9171_v46 = vsub.f32 %v10449_v25, %v3864_v5  ;;  %v9175_v19 = vsub.f32 %v10450_v32, %v3864_v5  ;;  %v4008_v33 = vadd.f32 %v4007_v6, %v3945_v54  ;;  %v4011_v21 = vadd.f32 %v3947_v48, %v3946_v43 }
 0x3dd   :  { %v3800_v12 = vpop.xlane.xlu1 %3799  ;;  %v9181_v53 = vsub.f32 %v10451_v8, %v3864_v5  ;;  %v9185_v47 = vsub.f32 %v10452_v16, %v3864_v5  ;;  %v10453_v50 = vmax.f32 %v8796_v57, 0.0  ;;  %v10454_v2 = vmax.f32 %v8806_v31, 0.0 }
 0x3de   :  { %v3865_v30 = vmul.f32 0.001953125, %v3800_v12  ;;  %4009 = vadd.xlane.f32.xlu0 %v4008_v33  ;;  %v4012_v25 = vadd.f32 %v4011_v21, %v3948_v15  ;;  %v3950_v40 = vmul.f32 %v9171_v46, %v9171_v46  ;;  %v3951_v54 = vmul.f32 %v9175_v19, %v9175_v19 }
 0x3df   :  { %v3952_v6 = vmul.f32 %v9181_v53, %v9181_v53  ;;  %v3953_v32 = vmul.f32 %v9185_v47, %v9185_v47  ;;  %v10455_v33 = vmax.f32 %v8803_v55, 0.0  ;;  %v10456_v12 = vmax.f32 %v8818_v10, 0.0 }
 0x3e0   :  { %v9195_v43 = vsub.f32 %v10453_v50, %v3865_v30  ;;  %v9199_v16 = vsub.f32 %v10454_v2, %v3865_v30  ;;  %v4013_v5 = vadd.f32 %v4012_v25, %v3949_v14  ;;  %v4016_v48 = vadd.f32 %v3951_v54, %v3950_v40 }
 0x3e1   :  { %v3805_v15 = vpop.xlane.xlu0 %3804  ;;  %v9205_v21 = vsub.f32 %v10455_v33, %v3865_v30  ;;  %v9209_v8 = vsub.f32 %v10456_v12, %v3865_v30  ;;  %v10457_v55 = vmax.f32 %v8829_v44, 0.0  ;;  %v10458_v10 = vmax.f32 %v8835_v24, 0.0 }
 0x3e2   :  { %v3866_v57 = vmul.f32 0.001953125, %v3805_v15  ;;  %4014 = vadd.xlane.f32.xlu1 %v4013_v5  ;;  %v4017_v50 = vadd.f32 %v4016_v48, %v3952_v6  ;;  %v3954_v31 = vmul.f32 %v9195_v43, %v9195_v43  ;;  %v3955_v14 = vmul.f32 %v9199_v16, %v9199_v16 }
 0x3e3   :  { %v3956_v25 = vmul.f32 %v9205_v21, %v9205_v21  ;;  %v3810_v54 = vpop.xlane.xlu1 %3809  ;;  %v3957_v48 = vmul.f32 %v9209_v8, %v9209_v8  ;;  %v10459_v15 = vmax.f32 %v8832_v35, 0.0  ;;  %v10460_v44 = vmax.f32 %v8848_v60, 0.0 }
 0x3e4   :  { %v9219_v40 = vsub.f32 %v10457_v55, %v3866_v57  ;;  %v9223_v30 = vsub.f32 %v10458_v10, %v3866_v57  ;;  %v4018_v2 = vadd.f32 %v4017_v50, %v3953_v32  ;;  %v4021_v6 = vadd.f32 %v3955_v14, %v3954_v31 }
 0x3e5   :  { %v3867_v5 = vmul.f32 0.001953125, %v3810_v54  ;;  %v9229_v33 = vsub.f32 %v10459_v15, %v3866_v57  ;;  %v9233_v55 = vsub.f32 %v10460_v44, %v3866_v57  ;;  %v10461_v50 = vmax.f32 %v8844_v28, 0.0 }
 0x3e6   :  { %4019 = vadd.xlane.f32.xlu0 %v4018_v2  ;;  %v4022_v12 = vadd.f32 %v4021_v6, %v3956_v25  ;;  %v3958_v24 = vmul.f32 %v9219_v40, %v9219_v40  ;;  %v3959_v32 = vmul.f32 %v9223_v30, %v9223_v30  ;;  %v10462_v35 = vmax.f32 %v8854_v22, 0.0 }
 0x3e7   :  { %v9241_v31 = vsub.f32 %v10461_v50, %v3867_v5  ;;  %v3960_v60 = vmul.f32 %v9229_v33, %v9229_v33  ;;  %v10463_v25 = vmax.f32 %v8851_v59, 0.0  ;;  %v10464_v6 = vmax.f32 %v8866_v29, 0.0 }
 0x3e8   :  { %v9245_v14 = vsub.f32 %v10462_v35, %v3867_v5  ;;  %v4023_v10 = vadd.f32 %v4022_v12, %v3957_v48  ;;  %v4026_v57 = vadd.f32 %v3959_v32, %v3958_v24  ;;  %v3961_v12 = vmul.f32 %v9233_v55, %v9233_v55 }
 0x3e9   :  { %v9251_v54 = vsub.f32 %v10463_v25, %v3867_v5  ;;  %v3815_v2 = vpop.xlane.xlu0 %3814  ;;  %v9255_v15 = vsub.f32 %v10464_v6, %v3867_v5  ;;  %v3962_v28 = vmul.f32 %v9241_v31, %v9241_v31  ;;  %v10465_v29 = vmax.f32 %v8877_v51, 0.0 }
 0x3ea   :  { %v3963_v22 = vmul.f32 %v9245_v14, %v9245_v14  ;;  %v3868_v48 = vmul.f32 0.001953125, %v3815_v2  ;;  %4024 = vadd.xlane.f32.xlu1 %v4023_v10  ;;  %v4027_v44 = vadd.f32 %v4026_v57, %v3960_v60  ;;  %v10466_v32 = vmax.f32 %v8883_v56, 0.0 }
 0x3eb   :  { %v3964_v59 = vmul.f32 %v9251_v54, %v9251_v54  ;;  %v3820_v35 = vpop.xlane.xlu1 %3819  ;;  %v10467_v10 = vmax.f32 %v8880_v58, 0.0  ;;  %v3965_v60 = vmul.f32 %v9255_v15, %v9255_v15  ;;  %v10469_v51 = vmax.f32 %v8896_v11, 0.0 }
 0x3ec   :  { %v4031_v24 = vadd.f32 %v3963_v22, %v3962_v28  ;;  %v9267_v5 = vsub.f32 %v10465_v29, %v3868_v48  ;;  %v9271_v50 = vsub.f32 %v10466_v32, %v3868_v48  ;;  %v4028_v25 = vadd.f32 %v4027_v44, %v3961_v12 }
 0x3ed   :  { %v9275_v2 = vsub.f32 %v10467_v10, %v3868_v48  ;;  %v3869_v6 = vmul.f32 0.001953125, %v3820_v35  ;;  %v9281_v28 = vsub.f32 %v10469_v51, %v3868_v48  ;;  %v10470_v58 = vmax.f32 %v8892_v61, 0.0  ;;  %v7670_v35 = vld [vmem:[#allocation10 + $0xa0] ss:$8 sps:$4 sm:$0xff]  }
 0x3ee   :  { %v4032_v57 = vadd.f32 %v4031_v24, %v3964_v59  ;;  %4029 = vadd.xlane.f32.xlu0 %v4028_v25  ;;  %v3966_v56 = vmul.f32 %v9267_v5, %v9267_v5  ;;  %v3967_v22 = vmul.f32 %v9271_v50, %v9271_v50  ;;  %v10471_v44 = vmax.f32 %v8902_v17, 0.0  ;;  %v7672_v25 = vld [vmem:[#allocation10 + $0xa4] ss:$8 sps:$4 sm:$0xff]  }
 0x3ef   :  { %10468 = vst [vmem:[#allocation42_spill] sm:$0xff] %v9275_v2  ;;  %v9289_v12 = vsub.f32 %v10470_v58, %v3869_v6  ;;  %v3968_v11 = vmul.f32 %v9275_v2, %v9275_v2  ;;  %v10472_v24 = vmax.f32 %v8899_v42, 0.0  ;;  %v10474_v61 = vmax.f32 %v8914_v9, 0.0  ;;  %4816 = vmatprep.subr.bf16.mxu0 %v7672_v25 }
 0x3f0   :  { %v9293_v29 = vsub.f32 %v10471_v44, %v3869_v6  ;;  %v4033_v59 = vadd.f32 %v4032_v57, %v3965_v60  ;;  %v4036_v48 = vadd.f32 %v3967_v22, %v3966_v56  ;;  %v3969_v42 = vmul.f32 %v9281_v28, %v9281_v28  ;;  %4817 = vmatpush1.bf16.msra.mxu0 %v7670_v35 }
 0x3f1   :  { %v9299_v32 = vsub.f32 %v10472_v24, %v3869_v6  ;;  %v3825_v10 = vpop.xlane.xlu0 %3824  ;;  %v9303_v51 = vsub.f32 %v10474_v61, %v3869_v6  ;;  %v3970_v17 = vmul.f32 %v9289_v12, %v9289_v12  ;;  %v10475_v9 = vmax.f32 %v8925_v23, 0.0 }
 0x3f2   :  { %4034 = vadd.xlane.f32.xlu1 %v4033_v59  ;;  %v3971_v60 = vmul.f32 %v9293_v29, %v9293_v29  ;;  %v3870_v57 = vmul.f32 0.001953125, %v3825_v10  ;;  %v4037_v56 = vadd.f32 %v4036_v48, %v3968_v11  ;;  %v10476_v44 = vmax.f32 %v8931_v13, 0.0  ;;  %v7673_v11 = vld [vmem:[#allocation10 + $0xb0] ss:$8 sps:$4 sm:$0xff]   ;;  %v7675_v48 = vld [vmem:[#allocation10 + $0xb4] ss:$8 sps:$4 sm:$0xff]  }
 0x3f3   :  { %10473 = vst [vmem:[#allocation43_spill] sm:$0xff] %v9299_v32  ;;  %v3972_v22 = vmul.f32 %v9299_v32, %v9299_v32  ;;  %v10477_v61 = vmax.f32 %v8928_v20, 0.0  ;;  %v3973_v35 = vmul.f32 %v9303_v51, %v9303_v51  ;;  %v10479_v23 = vmax.f32 %v8944_v39, 0.0  ;;  %4818 = vmatprep.subr.bf16.mxu0 %v7675_v48  ;;  %v10486_v48 = vld [vmem:[#allocation24_spill] sm:$0xff]  ;;  %v10495_v32 = vld [vmem:[#allocation26_spill] sm:$0xff] }
 0x3f4   :  { %v4041_v58 = vadd.f32 %v3971_v60, %v3970_v17  ;;  %v9315_v6 = vsub.f32 %v10475_v9, %v3870_v57  ;;  %v9319_v59 = vsub.f32 %v10476_v44, %v3870_v57  ;;  %v3830_v24 = vpop.xlane.xlu1 %3829  ;;  %v4038_v10 = vadd.f32 %v4037_v56, %v3969_v42  ;;  %4819 = vmatpush1.bf16.msra.mxu0 %v7673_v11 }
 0x3f5   :  { %v9323_v2 = vsub.f32 %v10477_v61, %v3870_v57  ;;  %v3871_v25 = vmul.f32 0.001953125, %v3830_v24  ;;  %v9329_v60 = vsub.f32 %v10479_v23, %v3870_v57  ;;  %v10481_v42 = vmax.f32 %v8940_v27, 0.0  ;;  %v7678_v61 = vld [vmem:[#allocation10 + $0xc4] ss:$8 sps:$4 sm:$0xff]  }
 0x3f6   :  { %v4042_v17 = vadd.f32 %v4041_v58, %v3972_v22  ;;  %4039 = vadd.xlane.f32.xlu0 %v4038_v10  ;;  %v3974_v13 = vmul.f32 %v9315_v6, %v9315_v6  ;;  %v3975_v20 = vmul.f32 %v9319_v59, %v9319_v59  ;;  %v10483_v9 = vmax.f32 %v8950_v49, 0.0  ;;  %v7676_v10 = vld [vmem:[#allocation10 + $0xc0] ss:$8 sps:$4 sm:$0xff]   ;;  %4820 = vmatprep.subr.bf16.mxu0 %v7678_v61 }
 0x3f7   :  { %10478 = vst [vmem:[#allocation44_spill] sm:$0xff] %v9323_v2  ;;  %10480 = vst [vmem:[#allocation45_spill] sm:$0xff] %v9329_v60  ;;  %v9337_v56 = vsub.f32 %v10481_v42, %v3871_v25  ;;  %v3976_v39 = vmul.f32 %v9323_v2, %v9323_v2  ;;  %v10484_v58 = vmax.f32 %v8947_v26, 0.0  ;;  %v10487_v23 = vmax.f32 %v10486_v48, 0.0 }
 0x3f8   :  { %v9341_v44 = vsub.f32 %v10483_v9, %v3871_v25  ;;  %v4043_v22 = vadd.f32 %v4042_v17, %v3973_v35  ;;  %v4046_v57 = vadd.f32 %v3975_v20, %v3974_v13  ;;  %v3977_v26 = vmul.f32 %v9329_v60, %v9329_v60  ;;  %4821 = vmatpush1.bf16.msra.mxu0 %v7676_v10  ;;  %v10489_v9 = vld [vmem:[#allocation25_spill] sm:$0xff] }
 0x3f9   :  { %10482 = vst [vmem:[#allocation46_spill] sm:$0xff] %v9337_v56  ;;  %v9347_v24 = vsub.f32 %v10484_v58, %v3871_v25  ;;  %v3835_v27 = vpop.xlane.xlu0 %3834  ;;  %v9351_v42 = vsub.f32 %v10487_v23, %v3871_v25  ;;  %v3978_v49 = vmul.f32 %v9337_v56, %v9337_v56  ;;  %v10490_v25 = vmax.f32 %v10489_v9, 0.0  ;;  %v10492_v58 = vld [vmem:[#allocation27_spill] sm:$0xff] }
 0x3fa   :  { %4044 = vadd.xlane.f32.xlu1 %v4043_v22  ;;  %v3979_v11 = vmul.f32 %v9341_v44, %v9341_v44  ;;  %v3872_v35 = vmul.f32 0.001953125, %v3835_v27  ;;  %v4047_v17 = vadd.f32 %v4046_v57, %v3976_v39  ;;  %v10493_v48 = vmax.f32 %v10492_v58, 0.0  ;;  %v7679_v39 = vld [vmem:[#allocation10 + $0xd0] ss:$8 sps:$4 sm:$0xff]   ;;  %v7681_v57 = vld [vmem:[#allocation10 + $0xd4] ss:$8 sps:$4 sm:$0xff]  }
 0x3fb   :  { %10485 = vst [vmem:[#allocation47_spill] sm:$0xff] %v9347_v24  ;;  %10488 = vst [vmem:[#allocation24_spill] sm:$0xff] %v9351_v42  ;;  %v3980_v13 = vmul.f32 %v9347_v24, %v9347_v24  ;;  %v10496_v56 = vmax.f32 %v10495_v32, 0.0  ;;  %v3981_v10 = vmul.f32 %v9351_v42, %v9351_v42  ;;  %4822 = vmatprep.subr.bf16.mxu0 %v7681_v57 }
 0x3fc   :  { %v4051_v20 = vadd.f32 %v3979_v11, %v3978_v49  ;;  %v9363_v22 = vsub.f32 %v10490_v25, %v3872_v35  ;;  %v9367_v23 = vsub.f32 %v10493_v48, %v3872_v35  ;;  %v3840_v2 = vpop.xlane.xlu1 %3839  ;;  %v4048_v27 = vadd.f32 %v4047_v17, %v3977_v26  ;;  %v10498_v11 = vld [vmem:[#allocation29_spill] sm:$0xff]  ;;  %4823 = vmatpush1.bf16.msra.mxu0 %v7679_v39 }
 0x3fd   :  { %v9371_v60 = vsub.f32 %v10496_v56, %v3872_v35  ;;  %v3873_v61 = vmul.f32 0.001953125, %v3840_v2  ;;  %v10499_v9 = vmax.f32 %v10498_v11, 0.0  ;;  %v10501_v56 = vld [vmem:[#allocation28_spill] sm:$0xff]  ;;  %v10504_v2 = vld [vmem:[#allocation31_spill] sm:$0xff] }
 0x3fe   :  { %10491 = vst [vmem:[#allocation25_spill] sm:$0xff] %v9363_v22  ;;  %10494 = vst [vmem:[#allocation27_spill] sm:$0xff] %v9367_v23  ;;  %v4052_v49 = vadd.f32 %v4051_v20, %v3980_v13  ;;  %4049 = vadd.xlane.f32.xlu0 %v4048_v27  ;;  %v3982_v58 = vmul.f32 %v9363_v22, %v9363_v22  ;;  %v3983_v32 = vmul.f32 %v9367_v23, %v9367_v23  ;;  %v10507_v27 = vld [vmem:[#allocation30_spill] sm:$0xff]  ;;  %v7684_v22 = vld [vmem:[#allocation10 + $0xe4] ss:$8 sps:$4 sm:$0xff]  }
 0x3ff   :  { %10497 = vst [vmem:[#allocation26_spill] sm:$0xff] %v9371_v60  ;;  %v9377_v25 = vsub.f32 %v10499_v9, %v3872_v35  ;;  %v10502_v26 = vmax.f32 %v10501_v56, 0.0  ;;  %v10505_v48 = vmax.f32 %v10504_v2, 0.0  ;;  %v3984_v35 = vmul.f32 %v9371_v60, %v9371_v60  ;;  %v10510_v56 = vld [vmem:[#allocation32_spill] sm:$0xff]  ;;  %4824 = vmatprep.subr.bf16.mxu0 %v7684_v22  ;;  %v10514_v60 = vld [vmem:[#allocation35_spill] sm:$0xff] }
 0x400   :  { %v4053_v13 = vadd.f32 %v4052_v49, %v3981_v10  ;;  %v4056_v20 = vadd.f32 %v3983_v32, %v3982_v58  ;;  %v10508_v11 = vmax.f32 %v10507_v27, 0.0  ;;  %v7682_v10 = vld [vmem:[#allocation10 + $0xe0] ss:$8 sps:$4 sm:$0xff]   ;;  %v7687_v27 = vld [vmem:[#allocation10 + $0xf4] ss:$8 sps:$4 sm:$0xff]  }
 0x401   :  { %10500 = vst [vmem:[#allocation29_spill] sm:$0xff] %v9377_v25  ;;  %v9385_v17 = vsub.f32 %v10502_v26, %v3873_v61  ;;  %v9389_v24 = vsub.f32 %v10505_v48, %v3873_v61  ;;  %v3845_v57 = vpop.xlane.xlu0 %3844  ;;  %v10511_v26 = vmax.f32 %v10510_v56, 0.0  ;;  %v3985_v58 = vmul.f32 %v9377_v25, %v9377_v25  ;;  %4825 = vmatpush1.bf16.msra.mxu0 %v7682_v10  ;;  %v10516_v25 = vld [vmem:[#allocation34_spill] sm:$0xff]  ;;  %v10519_v10 = vld [vmem:[#allocation37_spill] sm:$0xff] }
 0x402   :  { %v9395_v9 = vsub.f32 %v10508_v11, %v3873_v61  ;;  %4054 = vadd.xlane.f32.xlu1 %v4053_v13  ;;  %v3874_v49 = vmul.f32 0.001953125, %v3845_v57  ;;  %v4057_v32 = vadd.f32 %v4056_v20, %v3984_v35  ;;  %v10512_v11 = vld [vmem:[#allocation33_spill] sm:$0xff]  ;;  %v10517_v35 = vmax.f32 %v10516_v25, 0.0  ;;  %4826 = vmatprep.subr.bf16.mxu0 %v7687_v27  ;;  %v10521_v25 = vld [vmem:[#allocation36_spill] sm:$0xff] }
 0x403   :  { %10503 = vst [vmem:[#allocation28_spill] sm:$0xff] %v9385_v17  ;;  %10506 = vst [vmem:[#allocation31_spill] sm:$0xff] %v9389_v24  ;;  %v9399_v23 = vsub.f32 %v10511_v26, %v3873_v61  ;;  %v3986_v2 = vmul.f32 %v9385_v17, %v9385_v17  ;;  %v3987_v39 = vmul.f32 %v9389_v24, %v9389_v24  ;;  %v7685_v61 = vld [vmem:[#allocation10 + $0xf0] ss:$8 sps:$4 sm:$0xff]   ;;  %v10513_v56 = vmax.f32 %v10512_v11, 0.0  ;;  %v3850_v57 = vpop.xlane.xlu1 %3849 }
 0x404   :  { %10509 = vst [vmem:[#allocation30_spill] sm:$0xff] %v9395_v9  ;;  %v3988_v48 = vmul.f32 %v9395_v9, %v9395_v9  ;;  %v10515_v17 = vmax.f32 %v10514_v60, 0.0  ;;  %v4058_v42 = vadd.f32 %v4057_v32, %v3985_v58  ;;  %v9419_v22 = vsub.f32 %v10517_v35, %v3874_v49 }
 0x405   :  { %v4061_v13 = vadd.f32 %v3987_v39, %v3986_v2  ;;  %v9411_v26 = vsub.f32 %v10513_v56, %v3874_v49  ;;  %v3875_v20 = vmul.f32 0.001953125, %v3850_v57  ;;  %v3989_v2 = vmul.f32 %v9399_v23, %v9399_v23  ;;  %v10523_v57 = vld [vmem:[#allocation38_spill] sm:$0xff]  ;;  %4827 = vmatpush1.bf16.msra.mxu0 %v7685_v61 }
 0x406   :  { %v9415_v24 = vsub.f32 %v10515_v17, %v3874_v49  ;;  %10518 = vst [vmem:[#allocation32_spill] sm:$0xff] %v9419_v22  ;;  %4059 = vadd.xlane.f32.xlu0 %v4058_v42  ;;  %v10520_v11 = vmax.f32 %v10519_v10, 0.0  ;;  %v10522_v58 = vmax.f32 %v10521_v25, 0.0  ;;  %v10524_v35 = vmax.f32 %v10523_v57, 0.0  ;;  %v7690_v10 = vld [vmem:[#allocation10 + $0x104] ss:$8 sps:$4 sm:$0xff]  }
 0x407   :  { %v4062_v39 = vadd.f32 %v4061_v13, %v3988_v48  ;;  %v3990_v60 = vmul.f32 %v9411_v26, %v9411_v26  ;;  %v3992_v42 = vmul.f32 %v9419_v22, %v9419_v22  ;;  %v10525_v13 = vmax.f32 %v9043_v34, 0.0  ;;  %4909 = vmatprep.subr.bf16.mxu0 %v7690_v10 }
 0x408   :  { %v9425_v56 = vsub.f32 %v10520_v11, %v3874_v49  ;;  %v3991_v17 = vmul.f32 %v9415_v24, %v9415_v24  ;;  %v9433_v32 = vsub.f32 %v10522_v58, %v3875_v20  ;;  %v9437_v9 = vsub.f32 %v10524_v35, %v3875_v20 }
 0x409   :  { %v4063_v48 = vadd.f32 %v4062_v39, %v3989_v2  ;;  %v9443_v27 = vsub.f32 %v10525_v13, %v3875_v20  ;;  %v3855_v11 = vpop.xlane.xlu0 %3854  ;;  %v10527_v25 = vmax.f32 %v9058_v41, 0.0  ;;  %v10529_v41 = vmax.f32 %v9069_v1, 0.0 }
 0x40a   :  { %v4066_v49 = vadd.f32 %v3991_v17, %v3990_v60  ;;  %v3994_v57 = vmul.f32 %v9433_v32, %v9433_v32  ;;  %v3995_v61 = vmul.f32 %v9437_v9, %v9437_v9  ;;  %v3876_v2 = vmul.f32 0.001953125, %v3855_v11 }
 0x40b   :  { %10526 = vst [vmem:[#allocation33_spill] sm:$0xff] %v9443_v27  ;;  %4064 = vadd.xlane.f32.xlu1 %v4063_v48  ;;  %v9447_v58 = vsub.f32 %v10527_v25, %v3875_v20  ;;  %v3993_v39 = vmul.f32 %v9425_v56, %v9425_v56  ;;  %v3860_v60 = vpop.xlane.xlu1 %3859  ;;  %v3996_v17 = vmul.f32 %v9443_v27, %v9443_v27  ;;  %v10531_v48 = vmax.f32 %v9075_v62, 0.0 }
 0x40c   :  { %v4067_v34 = vadd.f32 %v4066_v49, %v3992_v42  ;;  %v4071_v35 = vadd.f32 %v3995_v61, %v3994_v57  ;;  %v9459_v20 = vsub.f32 %v10529_v41, %v3876_v2  ;;  %v3877_v25 = vmul.f32 0.001953125, %v3860_v60 }
 0x40d   :  { %10528 = vst [vmem:[#allocation35_spill] sm:$0xff] %v9447_v58  ;;  %v9463_v13 = vsub.f32 %v10531_v48, %v3876_v2  ;;  %v3997_v22 = vmul.f32 %v9447_v58, %v9447_v58  ;;  %v10533_v49 = vmax.f32 %v9072_v4, 0.0  ;;  %v10535_v57 = vmax.f32 %v9088_v36, 0.0 }
 0x40e   :  { %10530 = vst [vmem:[#allocation34_spill] sm:$0xff] %v9459_v20  ;;  %v4068_v11 = vadd.f32 %v4067_v34, %v3993_v39  ;;  %v4072_v42 = vadd.f32 %v4071_v35, %v3996_v17  ;;  %v10537_v1 = vmax.f32 %v9084_v3, 0.0  ;;  %v10539_v62 = vmax.f32 %v9094_v45, 0.0 }
 0x40f   :  { %10532 = vst [vmem:[#allocation37_spill] sm:$0xff] %v9463_v13  ;;  %v9469_v10 = vsub.f32 %v10533_v49, %v3876_v2  ;;  %v9473_v61 = vsub.f32 %v10535_v57, %v3876_v2  ;;  %v3998_v39 = vmul.f32 %v9459_v20, %v9459_v20  ;;  %v3999_v4 = vmul.f32 %v9463_v13, %v9463_v13 }
 0x410   :  { %v9477_v41 = vsub.f32 %v10537_v1, %v3877_v25  ;;  %v9481_v60 = vsub.f32 %v10539_v62, %v3877_v25  ;;  %4069 = vadd.xlane.f32.xlu0 %v4068_v11  ;;  %v4073_v34 = vadd.f32 %v4072_v42, %v3997_v22  ;;  %v10541_v2 = vmax.f32 %v9091_v18, 0.0 }
 0x411   :  { %10534 = vst [vmem:[#allocation36_spill] sm:$0xff] %v9469_v10  ;;  %10536 = vst [vmem:[#allocation38_spill] sm:$0xff] %v9473_v61  ;;  %v4000_v36 = vmul.f32 %v9469_v10, %v9469_v10  ;;  %v4076_v17 = vadd.f32 %v3999_v4, %v3998_v39  ;;  %v10543_v45 = vmax.f32 %v9106_v63, 0.0  ;;  %v4001_v22 = vmul.f32 %v9473_v61, %v9473_v61 }
 0x412   :  { %10538 = vst [vmem:[#allocation48_spill] sm:$0xff] %v9477_v41  ;;  %10540 = vst [vmem:[#allocation49_spill] sm:$0xff] %v9481_v60  ;;  %v9491_v3 = vsub.f32 %v10541_v2, %v3877_v25  ;;  %v4002_v48 = vmul.f32 %v9477_v41, %v9477_v41  ;;  %v4003_v11 = vmul.f32 %v9481_v60, %v9481_v60  ;;  %4074 = vadd.xlane.f32.xlu1 %v4073_v34  ;;  %v7736_v41 = vld [vmem:[#allocation11 + $0x40] sm:$0xff]   ;;  %v7738_v60 = vld [vmem:[#allocation11 + $0x48] sm:$0xff]  }
 0x413   :  { %v9495_v35 = vsub.f32 %v10543_v45, %v3877_v25  ;;  %v4077_v42 = vadd.f32 %v4076_v17, %v4000_v36  ;;  %6714 = vmatprep.subr.bf16.mxu1 %v7736_v41  ;;  %v7740_v41 = vld [vmem:[#allocation11 + $0x50] sm:$0xff]  }
 0x414   :  { %10542 = vst [vmem:[#allocation50_spill] sm:$0xff] %v9491_v3  ;;  %v4004_v18 = vmul.f32 %v9491_v3, %v9491_v3  ;;  %v4081_v49 = vadd.f32 %v4003_v11, %v4002_v48  ;;  %v3779_v48 = vld [vmem:[%s10277_s17] sm:$0xf] }
 0x415   :  { %10544 = vst [vmem:[#allocation51_spill] sm:$0xff] %v9495_v35  ;;  %v4078_v57 = vadd.f32 %v4077_v42, %v4001_v22  ;;  %v4005_v63 = vmul.f32 %v9495_v35, %v9495_v35  ;;  %v3780_v42 = vld [vmem:[%s10278_s18] sm:$0xf] }
 0x416   :  { %v4082_v25 = vadd.f32 %v4081_v49, %v4004_v18  ;;  %v10545_v18 = vld [vmem:[#allocation21_spill] sm:$0xff] }
 0x417   :  { %4079 = vadd.xlane.f32.xlu0 %v4078_v57  ;;  %v9514_v49 = vrot.slane %v3779_v48, %v10545_v18  ;;  %v10546_v57 = vld [vmem:[#allocation22_spill] sm:$0xff]  ;;  %v9530_v10 = vrot.slane %v3780_v42, %v10545_v18 }
 0x418   :  { %v4083_v1 = vadd.f32 %v4082_v25, %v4005_v63  ;;  %v9517_v63 = vrot.slane %v3779_v48, %v10546_v57 }
 0x41a   :  { %4084 = vadd.xlane.f32.xlu1 %v4083_v1 }
 0x46b   :  { %v4010_v62 = vpop.xlane.xlu0 %4009 }
 0x46c   :  { %v4086_v39 = vmul.f32 0.001953125, %v4010_v62  ;;  %v10547_v62 = vld [vmem:[#allocation20_spill] sm:$0xff] }
 0x46d   :  { %v9534_v35 = vrot.slane %v3780_v42, %v10547_v62 }
 0x46e   :  { %v4102_v4 = vadd.f32 1e-05, %v4086_v39  ;;  %v9520_v39 = vrot.slane %v3779_v48, %v10547_v62  ;;  %v10550_v62 = vld [vmem:[#allocation39_spill] sm:$0xff] }
 0x46f   :  { %v4015_v34 = vpop.xlane.xlu1 %4014 }
 0x470   :  { %7767 = vrsqrt.f32 %v4102_v4  ;;  %v4087_v2 = vmul.f32 0.001953125, %v4015_v34  ;;  %v10548_v4 = vld [vmem:[#allocation23_spill] sm:$0xff] }
 0x471   :  { %v9523_v34 = vrot.slane %v3779_v48, %v10548_v4  ;;  %v9537_v48 = vrot.slane %v3780_v42, %v10548_v4 }
 0x472   :  { %v4103_v45 = vadd.f32 1e-05, %v4087_v2 }
 0x473   :  { %v4020_v36 = vpop.xlane.xlu0 %4019 }
 0x474   :  { %7769 = vrsqrt.f32 %v4103_v45  ;;  %v4088_v17 = vmul.f32 0.001953125, %v4020_v36 }
 0x476   :  { %v4104_v3 = vadd.f32 1e-05, %v4088_v17 }
 0x477   :  { %v4025_v11 = vpop.xlane.xlu1 %4024 }
 0x478   :  { %7771 = vrsqrt.f32 %v4104_v3  ;;  %v4089_v22 = vmul.f32 0.001953125, %v4025_v11 }
 0x47a   :  { %v7768_v25 = vpop.eup %7767  ;;  %v4105_v1 = vadd.f32 1e-05, %v4089_v22 }
 0x47b   :  { %v4030_v3 = vpop.xlane.xlu0 %4029  ;;  %v4135_v2 = vmul.f32 %v7768_v25, %v9129_v52  ;;  %v4134_v45 = vmul.f32 %v7768_v25, %v9125_v0  ;;  %v4137_v36 = vmul.f32 %v7768_v25, %v9137_v37  ;;  %v4136_v17 = vmul.f32 %v7768_v25, %v9133_v38 }
 0x47c   :  { %7773 = vrsqrt.f32 %v4105_v1  ;;  %v4090_v11 = vmul.f32 0.001953125, %v4030_v3  ;;  %v9543_v1 = vrot.slane %v3780_v42, %v10546_v57  ;;  %v10551_v42 = vld [vmem:[#allocation41_spill] sm:$0xff] }
 0x47d   :  { %v4220_v22 = vmul.f32 %v9514_v49, %v4135_v2  ;;  %v4221_v52 = vmul.f32 %v9517_v63, %v4136_v17  ;;  %v4219_v38 = vmul.f32 %v9520_v39, %v4134_v45  ;;  %v4222_v25 = vmul.f32 %v9523_v34, %v4137_v36  ;;  %v10549_v2 = vld [vmem:[#allocation40_spill] sm:$0xff] }
 0x47e   :  { %v7770_v0 = vpop.eup %7769  ;;  %v4106_v61 = vadd.f32 1e-05, %v4090_v11  ;;  %v7737_v11 = vld [vmem:[#allocation11] sm:$0xff]  }
 0x47f   :  { %v4035_v37 = vpop.xlane.xlu1 %4034  ;;  %v4139_v18 = vmul.f32 %v7770_v0, %v10549_v2  ;;  %v4138_v27 = vmul.f32 %v7770_v0, %v10550_v62  ;;  %v4305_v4 = vadd.f32 %v9530_v10, %v4220_v22  ;;  %v4141_v17 = vmul.f32 %v7770_v0, %v9161_v7  ;;  %6715 = vmatpush3.bf16.msra.mxu1 %v7737_v11 }
 0x480   :  { %v4091_v3 = vmul.f32 0.001953125, %v4035_v37  ;;  %7775 = vrsqrt.f32 %v4106_v61  ;;  %v4140_v57 = vmul.f32 %v7770_v0, %v10551_v42  ;;  %v4304_v2 = vadd.f32 %v9534_v35, %v4219_v38  ;;  %6716 = vmatprep.subr.bf16.mxu1 %v7738_v60  ;;  %v7688_v42 = vld [vmem:[#allocation10 + $0x100] ss:$8 sps:$4 sm:$0xff]  }
 0x481   :  { %v4224_v45 = vmul.f32 %v9514_v49, %v4139_v18  ;;  %v4223_v36 = vmul.f32 %v9520_v39, %v4138_v27  ;;  %v4226_v62 = vmul.f32 %v9523_v34, %v4141_v17  ;;  %v9555_v61 = vadd.f32 %v9537_v48, %v4222_v25 }
 0x482   :  { %v4107_v20 = vadd.f32 1e-05, %v4091_v3  ;;  %v7772_v37 = vpop.eup %7771  ;;  %v9558_v7 = vadd.f32 %v9543_v1, %v4221_v52  ;;  %v7739_v3 = vld [vmem:[#allocation11 + $0x8] sm:$0xff]   ;;  %v4225_v52 = vmul.f32 %v9517_v63, %v4140_v57 }
 0x483   :  { %v4040_v22 = vpop.xlane.xlu0 %4039  ;;  %v4309_v18 = vadd.f32 %v9530_v10, %v4224_v45  ;;  %v4308_v27 = vadd.f32 %v9534_v35, %v4223_v36  ;;  %v4143_v0 = vmul.f32 %v7772_v37, %v9175_v19  ;;  %v4142_v17 = vmul.f32 %v7772_v37, %v9171_v46  ;;  %6717 = vmatpush3.bf16.msra.mxu1 %v7739_v3 }
 0x484   :  { %7777 = vrsqrt.f32 %v4107_v20  ;;  %v4092_v38 = vmul.f32 0.001953125, %v4040_v22  ;;  %v9565_v25 = vadd.f32 %v9537_v48, %v4226_v62  ;;  %v4145_v36 = vmul.f32 %v7772_v37, %v9185_v47  ;;  %v7693_v22 = vld [vmem:[#allocation10 + $0x114] ss:$8 sps:$4 sm:$0xff]   ;;  %6718 = vmatprep.subr.bf16.mxu1 %v7740_v41 }
 0x485   :  { %v4369_v20 = vpack.c.bf16 %v4309_v18, %v4305_v4  ;;  %v4368_v13 = vpack.c.bf16 %v4308_v27, %v4304_v2  ;;  %v4228_v45 = vmul.f32 %v9514_v49, %v4143_v0  ;;  %v4227_v46 = vmul.f32 %v9520_v39, %v4142_v17  ;;  %v7741_v47 = vld [vmem:[#allocation11 + $0x10] sm:$0xff]  }
 0x486   :  { %v7774_v19 = vpop.eup %7773  ;;  %v4108_v11 = vadd.f32 1e-05, %v4092_v38  ;;  %v4371_v62 = vpack.c.bf16 %v9565_v25, %v9555_v61  ;;  %v9574_v57 = vadd.f32 %v9543_v1, %v4225_v52  ;;  %v7742_v38 = vld [vmem:[#allocation11 + $0x58] sm:$0xff]   ;;  %v4230_v3 = vmul.f32 %v9523_v34, %v4145_v36 }
 0x487   :  { %v4045_v58 = vpop.xlane.xlu1 %4044  ;;  %4828 = vmatprep.mubr.bf16.mxu0 %v4369_v20  ;;  %v4147_v4 = vmul.f32 %v7774_v19, %v9199_v16  ;;  %v4146_v2 = vmul.f32 %v7774_v19, %v9195_v43  ;;  %v4313_v18 = vadd.f32 %v9530_v10, %v4228_v45  ;;  %v4149_v0 = vmul.f32 %v7774_v19, %v9209_v8  ;;  %v7743_v36 = vld [vmem:[#allocation11 + $0x18] sm:$0xff]  }
 0x488   :  { %v4093_v60 = vmul.f32 0.001953125, %v4045_v58  ;;  %7779 = vrsqrt.f32 %v4108_v11  ;;  %4829 = vmatmul.mubr.bf16.vlgmr.msra.gmra.mrb[96].mxu0 %v4368_v13  ;;  %v4370_v27 = vpack.c.bf16 %v9574_v57, %v9558_v7  ;;  %v7691_v58 = vld [vmem:[#allocation10 + $0x110] ss:$8 sps:$4 sm:$0xff]   ;;  %v7696_v13 = vld [vmem:[#allocation10 + $0x124] ss:$8 sps:$4 sm:$0xff]   ;;  %v4312_v20 = vadd.f32 %v9534_v35, %v4227_v46  ;;  %6719 = vmatpush3.bf16.msra.mxu1 %v7741_v47 }
 0x489   :  { %4910 = vmatpush1.bf16.msra.mxu0 %v7688_v42  ;;  %v4232_v16 = vmul.f32 %v9514_v49, %v4147_v4  ;;  %v4231_v43 = vmul.f32 %v9520_v39, %v4146_v2  ;;  %v4234_v45 = vmul.f32 %v9523_v34, %v4149_v0  ;;  %v4144_v8 = vmul.f32 %v7772_v37, %v9181_v53  ;;  %v7694_v0 = vld [vmem:[#allocation10 + $0x120] ss:$8 sps:$4 sm:$0xff]   ;;  %v7750_v57 = vld [vmem:[#allocation11 + $0x78] sm:$0xff]  }
 0x48a   :  { %v4109_v17 = vadd.f32 1e-05, %v4093_v60  ;;  %v7776_v52 = vpop.eup %7775  ;;  %4911 = vmatprep.subr.bf16.mxu0 %v7693_v22  ;;  %v4148_v41 = vmul.f32 %v7774_v19, %v9205_v21  ;;  %v9594_v46 = vadd.f32 %v9537_v48, %v4230_v3  ;;  %6720 = vmatprep.subr.bf16.mxu1 %v7742_v38  ;;  %v7744_v21 = vld [vmem:[#allocation11 + $0x60] sm:$0xff]  }
 0x48b   :  { %v4050_v42 = vpop.xlane.xlu0 %4049  ;;  %v4317_v11 = vadd.f32 %v9530_v10, %v4232_v16  ;;  %v4316_v60 = vadd.f32 %v9534_v35, %v4231_v43  ;;  %v4151_v4 = vmul.f32 %v7776_v52, %v9223_v30  ;;  %v4150_v2 = vmul.f32 %v7776_v52, %v9219_v40  ;;  %v7699_v40 = vld [vmem:[#allocation10 + $0x134] ss:$8 sps:$4 sm:$0xff]  }
 0x48c   :  { %7781 = vrsqrt.f32 %v4109_v17  ;;  %v4094_v22 = vmul.f32 0.001953125, %v4050_v42  ;;  %v9597_v53 = vadd.f32 %v9537_v48, %v4234_v45  ;;  %v4229_v47 = vmul.f32 %v9517_v63, %v4144_v8  ;;  %6721 = vmatpush3.bf16.msra.mxu1 %v7743_v36  ;;  %v7745_v8 = vld [vmem:[#allocation11 + $0x20] sm:$0xff]  }
 0x48d   :  { %4912 = vmatpush1.bf16.msra.mxu0 %v7691_v58  ;;  %v4373_v19 = vpack.c.bf16 %v4317_v11, %v4313_v18  ;;  %v4372_v17 = vpack.c.bf16 %v4316_v60, %v4312_v20  ;;  %v4236_v30 = vmul.f32 %v9514_v49, %v4151_v4  ;;  %v4235_v38 = vmul.f32 %v9520_v39, %v4150_v2  ;;  %v7746_v11 = vld [vmem:[#allocation11 + $0x68] sm:$0xff]   ;;  %v7697_v4 = vld [vmem:[#allocation10 + $0x130] ss:$8 sps:$4 sm:$0xff]  }
 0x48e   :  { %v7778_v37 = vpop.eup %7777  ;;  %v4110_v16 = vadd.f32 1e-05, %v4094_v22  ;;  %4913 = vmatprep.subr.bf16.mxu0 %v7696_v13  ;;  %v4375_v58 = vpack.c.bf16 %v9597_v53, %v9594_v46  ;;  %v4233_v20 = vmul.f32 %v9517_v63, %v4148_v41  ;;  %6722 = vmatprep.subr.bf16.mxu1 %v7744_v21  ;;  %v9612_v22 = vadd.f32 %v9543_v1, %v4229_v47  ;;  %v4464_v46 = vld [vmem:[%s10266_s6] sm:$0x3]  ;;  %v10583_v53 = vld [vmem:[#allocation20_spill] sm:$0xff] }
 0x48f   :  { %v4055_v43 = vpop.xlane.xlu1 %4054  ;;  %v4155_v3 = vmul.f32 %v7778_v37, %v9245_v14  ;;  %v4154_v45 = vmul.f32 %v7778_v37, %v9241_v31  ;;  %4838 = vmatprep.mubr.bf16.mxu0 %v4373_v19  ;;  %v4321_v18 = vadd.f32 %v9530_v10, %v4236_v30  ;;  %v4320_v31 = vadd.f32 %v9534_v35, %v4235_v38 }
 0x490   :  { %v4095_v42 = vmul.f32 0.001953125, %v4055_v43  ;;  %7783 = vrsqrt.f32 %v4110_v16  ;;  %4839 = vmatmul.mubr.bf16.gmra.mrb[100].mxu0 %v4372_v17  ;;  %v9615_v41 = vadd.f32 %v9543_v1, %v4233_v20  ;;  %v4153_v36 = vmul.f32 %v7776_v52, %v9233_v55  ;;  %v7702_v17 = vld [vmem:[#allocation10 + $0x144] ss:$8 sps:$4 sm:$0xff]   ;;  %6723 = vmatpush3.bf16.msra.mxu1 %v7745_v8 }
 0x491   :  { %v4240_v13 = vmul.f32 %v9514_v49, %v4155_v3  ;;  %v4239_v14 = vmul.f32 %v9520_v39, %v4154_v45  ;;  %4914 = vmatpush1.bf16.msra.mxu0 %v7694_v0  ;;  %v4157_v30 = vmul.f32 %v7778_v37, %v9255_v15  ;;  %v4152_v0 = vmul.f32 %v7776_v52, %v9229_v33  ;;  %v7748_v33 = vld [vmem:[#allocation11 + $0x70] sm:$0xff]  }
 0x492   :  { %v4111_v60 = vadd.f32 1e-05, %v4095_v42  ;;  %v9618_v2 = vpop.eup %7779  ;;  %4915 = vmatprep.subr.bf16.mxu0 %v7699_v40  ;;  %v4374_v43 = vpack.c.bf16 %v9615_v41, %v9612_v22  ;;  %v7747_v40 = vld [vmem:[#allocation11 + $0x28] sm:$0xff]   ;;  %v4238_v15 = vmul.f32 %v9523_v34, %v4153_v36  ;;  %6724 = vmatprep.subr.bf16.mxu1 %v7746_v11  ;;  %v4156_v8 = vmul.f32 %v7778_v37, %v9251_v54  ;;  %v7749_v37 = vld [vmem:[#allocation11 + $0x30] sm:$0xff]  }
 0x493   :  { %v4325_v19 = vadd.f32 %v9530_v10, %v4240_v13  ;;  %v4324_v21 = vadd.f32 %v9534_v35, %v4239_v14  ;;  %v4060_v47 = vpop.xlane.xlu0 %4059  ;;  %v4159_v16 = vmul.f32 %v9618_v2, %v9271_v50  ;;  %v4158_v55 = vmul.f32 %v9618_v2, %v9267_v5  ;;  %v7700_v42 = vld [vmem:[#allocation10 + $0x140] ss:$8 sps:$4 sm:$0xff]  }
 0x494   :  { %7785 = vrsqrt.f32 %v4111_v60  ;;  %v4096_v3 = vmul.f32 0.001953125, %v4060_v47  ;;  %v4242_v20 = vmul.f32 %v9523_v34, %v4157_v30  ;;  %v9642_v60 = vadd.f32 %v9537_v48, %v4238_v15  ;;  %6725 = vmatpush3.bf16.msra.mxu1 %v7747_v40  ;;  %v7703_v30 = vld [vmem:[#allocation10 + $0x150] ss:$8 sps:$4 sm:$0xff]  }
 0x495   :  { %v4377_v45 = vpack.c.bf16 %v4325_v19, %v4321_v18  ;;  %v4376_v38 = vpack.c.bf16 %v4324_v21, %v4320_v31  ;;  %4916 = vmatpush1.bf16.msra.mxu0 %v7697_v4  ;;  %v4244_v50 = vmul.f32 %v9514_v49, %v4159_v16  ;;  %v4243_v5 = vmul.f32 %v9520_v39, %v4158_v55  ;;  %v7705_v18 = vld [vmem:[#allocation10 + $0x154] ss:$8 sps:$4 sm:$0xff]   ;;  %v10584_v22 = vld [vmem:[#allocation21_spill] sm:$0xff] }
 0x496   :  { %v9631_v52 = vpop.eup %7781  ;;  %v4112_v13 = vadd.f32 1e-05, %v4096_v3  ;;  %4917 = vmatprep.subr.bf16.mxu0 %v7702_v17  ;;  %v9647_v54 = vadd.f32 %v9537_v48, %v4242_v20  ;;  %6726 = vmatprep.subr.bf16.mxu1 %v7748_v33  ;;  %v4241_v16 = vmul.f32 %v9517_v63, %v4156_v8  ;;  %v4161_v55 = vmul.f32 %v9618_v2, %v9281_v28 }
 0x497   :  { %4848 = vmatprep.mubr.bf16.mxu0 %v4377_v45  ;;  %v4163_v31 = vmul.f32 %v9631_v52, %v9293_v29  ;;  %v4162_v11 = vmul.f32 %v9631_v52, %v9289_v12  ;;  %v4329_v36 = vadd.f32 %v9530_v10, %v4244_v50  ;;  %v4328_v19 = vadd.f32 %v9534_v35, %v4243_v5  ;;  %v7708_v45 = vld [vmem:[#allocation10 + $0x164] ss:$8 sps:$4 sm:$0xff]  }
 0x498   :  { %v4065_v14 = vpop.xlane.xlu1 %4064  ;;  %7787 = vrsqrt.f32 %v4112_v13  ;;  %4849 = vmatmul.mubr.bf16.gmra.mrb[104].mxu0 %v4376_v38  ;;  %v4237_v12 = vmul.f32 %v9517_v63, %v4152_v0  ;;  %v4379_v47 = vpack.c.bf16 %v9647_v54, %v9642_v60  ;;  %v4165_v15 = vmul.f32 %v9631_v52, %v9303_v51  ;;  %6727 = vmatpush3.bf16.msra.mxu1 %v7749_v37  ;;  %v7706_v51 = vld [vmem:[#allocation10 + $0x160] ss:$8 sps:$4 sm:$0xff]   ;;  %v10552_v37 = vld [vmem:[#allocation46_spill] sm:$0xff] }
 0x499   :  { %v4097_v4 = vmul.f32 0.001953125, %v4065_v14  ;;  %v4248_v29 = vmul.f32 %v9514_v49, %v4163_v31  ;;  %v4247_v17 = vmul.f32 %v9520_v39, %v4162_v11  ;;  %4918 = vmatpush1.bf16.msra.mxu0 %v7700_v42  ;;  %v9671_v50 = vadd.f32 %v9543_v1, %v4241_v16  ;;  %6728 = vmatprep.subr.bf16.mxu1 %v7750_v57 }
 0x49a   :  { %v9657_v40 = vpop.eup %7783  ;;  %4919 = vmatprep.subr.bf16.mxu0 %v7705_v18  ;;  %v9662_v38 = vadd.f32 %v9543_v1, %v4237_v12  ;;  %v4246_v13 = vmul.f32 %v9523_v34, %v4161_v55  ;;  %v4250_v31 = vmul.f32 %v9523_v34, %v4165_v15  ;;  %v7709_v15 = vld [vmem:[#allocation10 + $0x170] ss:$8 sps:$4 sm:$0xff]   ;;  %v9874_v41 = vrot.slane %v4464_v46, %v10584_v22 }
 0x49b   :  { %v4113_v21 = vadd.f32 1e-05, %v4097_v4  ;;  %v4333_v3 = vadd.f32 %v9530_v10, %v4248_v29  ;;  %v4332_v0 = vadd.f32 %v9534_v35, %v4247_v17  ;;  %v4167_v42 = vmul.f32 %v9657_v40, %v9319_v59 }
 0x49c   :  { %v4166_v28 = vmul.f32 %v9657_v40, %v9315_v6  ;;  %v9686_v17 = vadd.f32 %v9537_v48, %v4246_v13  ;;  %v9691_v16 = vadd.f32 %v9537_v48, %v4250_v31  ;;  %v10571_v6 = vld [vmem:[#allocation48_spill] sm:$0xff] }
 0x49d   :  { %7789 = vrsqrt.f32 %v4113_v21  ;;  %v4070_v33 = vpop.xlane.xlu0 %4069  ;;  %v4381_v20 = vpack.c.bf16 %v4333_v3, %v4329_v36  ;;  %v4380_v8 = vpack.c.bf16 %v4332_v0, %v4328_v19  ;;  %4920 = vmatpush1.bf16.msra.mxu0 %v7703_v30  ;;  %v4252_v18 = vmul.f32 %v9514_v49, %v4167_v42  ;;  %v7711_v36 = vld [vmem:[#allocation10 + $0x174] ss:$8 sps:$4 sm:$0xff]  }
 0x49e   :  { %v4098_v5 = vmul.f32 0.001953125, %v4070_v33  ;;  %v9674_v14 = vpop.eup %7785  ;;  %v4251_v59 = vmul.f32 %v9520_v39, %v4166_v28  ;;  %4921 = vmatprep.subr.bf16.mxu0 %v7708_v45  ;;  %v10553_v3 = vld [vmem:[#allocation42_spill] sm:$0xff]  ;;  %v10554_v42 = vld [vmem:[#allocation43_spill] sm:$0xff] }
 0x49f   :  { %v4075_v4 = vpop.xlane.xlu1 %4074  ;;  %4858 = vmatprep.mubr.bf16.mxu0 %v4381_v20  ;;  %v4171_v19 = vmul.f32 %v9674_v14, %v9341_v44  ;;  %v4170_v29 = vmul.f32 %v9674_v14, %v10552_v37  ;;  %v4337_v21 = vadd.f32 %v9530_v10, %v4252_v18  ;;  %v4160_v45 = vmul.f32 %v9618_v2, %v10553_v3  ;;  %v7714_v18 = vld [vmem:[#allocation10 + $0x184] ss:$8 sps:$4 sm:$0xff]  }
 0x4a0   :  { %v4114_v11 = vadd.f32 1e-05, %v4098_v5  ;;  %v4099_v12 = vmul.f32 0.001953125, %v4075_v4  ;;  %v4336_v30 = vadd.f32 %v9534_v35, %v4251_v59  ;;  %4859 = vmatmul.mubr.bf16.gmra.mrb[108].mxu0 %v4380_v8  ;;  %v4164_v28 = vmul.f32 %v9631_v52, %v10554_v42  ;;  %v10555_v5 = vld [vmem:[#allocation45_spill] sm:$0xff]  ;;  %v10556_v59 = vld [vmem:[#allocation24_spill] sm:$0xff]  ;;  %v10557_v4 = vld [vmem:[#allocation27_spill] sm:$0xff] }
 0x4a1   :  { %v4256_v55 = vmul.f32 %v9514_v49, %v4171_v19  ;;  %v4255_v44 = vmul.f32 %v9520_v39, %v4170_v29  ;;  %4922 = vmatpush1.bf16.msra.mxu0 %v7706_v51  ;;  %v4169_v20 = vmul.f32 %v9657_v40, %v10555_v5  ;;  %v4245_v51 = vmul.f32 %v9517_v63, %v4160_v45  ;;  %v10558_v19 = vld [vmem:[#allocation25_spill] sm:$0xff] }
 0x4a2   :  { %7791 = vrsqrt.f32 %v4114_v11  ;;  %v4115_v0 = vadd.f32 1e-05, %v4099_v12  ;;  %v9703_v8 = vpop.eup %7787  ;;  %4923 = vmatprep.subr.bf16.mxu0 %v7711_v36  ;;  %v4173_v31 = vmul.f32 %v9674_v14, %v10556_v59  ;;  %v4249_v36 = vmul.f32 %v9517_v63, %v4164_v28 }
 0x4a3   :  { %v4341_v13 = vadd.f32 %v9530_v10, %v4256_v55  ;;  %v4340_v2 = vadd.f32 %v9534_v35, %v4255_v44  ;;  %v4175_v52 = vmul.f32 %v9703_v8, %v10557_v4  ;;  %v4174_v37 = vmul.f32 %v9703_v8, %v10558_v19 }
 0x4a4   :  { %7793 = vrsqrt.f32 %v4115_v0  ;;  %v4080_v11 = vpop.xlane.xlu0 %4079  ;;  %v9716_v44 = vadd.f32 %v9543_v1, %v4245_v51  ;;  %v7712_v0 = vld [vmem:[#allocation10 + $0x180] ss:$8 sps:$4 sm:$0xff]   ;;  %v9723_v59 = vadd.f32 %v9543_v1, %v4249_v36  ;;  %v4254_v28 = vmul.f32 %v9523_v34, %v4169_v20 }
 0x4a5   :  { %v4100_v29 = vmul.f32 0.001953125, %v4080_v11  ;;  %v4385_v12 = vpack.c.bf16 %v4341_v13, %v4337_v21  ;;  %v4384_v55 = vpack.c.bf16 %v4340_v2, %v4336_v30  ;;  %4924 = vmatpush1.bf16.msra.mxu0 %v7709_v15  ;;  %v4260_v42 = vmul.f32 %v9514_v49, %v4175_v52  ;;  %v7717_v30 = vld [vmem:[#allocation10 + $0x194] ss:$8 sps:$4 sm:$0xff]   ;;  %v10560_v15 = vld [vmem:[#allocation28_spill] sm:$0xff] }
 0x4a6   :  { %v4259_v5 = vmul.f32 %v9520_v39, %v4174_v37  ;;  %4925 = vmatprep.subr.bf16.mxu0 %v7714_v18  ;;  %v10559_v13 = vld [vmem:[#allocation31_spill] sm:$0xff]  ;;  %v4258_v20 = vmul.f32 %v9523_v34, %v4173_v31  ;;  %v10579_v61 = vpack.c.bf16 %v9723_v59, %v9716_v44 }
 0x4a7   :  { %v9718_v3 = vpop.eup %7789  ;;  %v4085_v45 = vpop.xlane.xlu1 %4084  ;;  %v4116_v11 = vadd.f32 1e-05, %v4100_v29  ;;  %4868 = vmatprep.mubr.bf16.mxu0 %v4385_v12  ;;  %v4345_v4 = vadd.f32 %v9530_v10, %v4260_v42  ;;  %v7715_v29 = vld [vmem:[#allocation10 + $0x190] ss:$8 sps:$4 sm:$0xff]   ;;  %v9738_v12 = vadd.f32 %v9537_v48, %v4254_v28  ;;  %v10561_v42 = vld [vmem:[#allocation44_spill] sm:$0xff] }
 0x4a8   :  { %v4101_v21 = vmul.f32 0.001953125, %v4085_v45  ;;  %v4179_v2 = vmul.f32 %v9718_v3, %v10559_v13  ;;  %v4178_v51 = vmul.f32 %v9718_v3, %v10560_v15  ;;  %v4344_v52 = vadd.f32 %v9534_v35, %v4259_v5  ;;  %4869 = vmatmul.mubr.bf16.gmra.mrb[112].mxu0 %v4384_v55  ;;  %v10562_v13 = vld [vmem:[#allocation47_spill] sm:$0xff] }
 0x4a9   :  { %7795 = vrsqrt.f32 %v4116_v11  ;;  %4926 = vmatpush1.bf16.msra.mxu0 %v7712_v0  ;;  %v9741_v45 = vadd.f32 %v9537_v48, %v4258_v20  ;;  %v4168_v5 = vmul.f32 %v9657_v40, %v10561_v42  ;;  %v4172_v31 = vmul.f32 %v9674_v14, %v10562_v13  ;;  %v7718_v42 = vld [vmem:[#allocation10 + $0x1a0] ss:$8 sps:$4 sm:$0xff]  }
 0x4aa   :  { %v4117_v37 = vadd.f32 1e-05, %v4101_v21  ;;  %v4264_v18 = vmul.f32 %v9514_v49, %v4179_v2  ;;  %v4263_v36 = vmul.f32 %v9520_v39, %v4178_v51  ;;  %4927 = vmatprep.subr.bf16.mxu0 %v7717_v30  ;;  %v7720_v21 = vld [vmem:[#allocation10 + $0x1a4] ss:$8 sps:$4 sm:$0xff]  }
 0x4ab   :  { %v10563_v2 = vld [vmem:[#allocation29_spill] sm:$0xff]  ;;  %v4253_v14 = vmul.f32 %v9517_v63, %v4168_v5  ;;  %v4257_v30 = vmul.f32 %v9517_v63, %v4172_v31  ;;  %v10569_v40 = vld [vmem:[#allocation32_spill] sm:$0xff]  ;;  %v10580_v7 = vpack.c.bf16 %v9741_v45, %v9738_v12 }
 0x4ac   :  { %v7792_v11 = vpop.eup %7791  ;;  %7797 = vrsqrt.f32 %v4117_v37  ;;  %v4349_v55 = vadd.f32 %v9530_v10, %v4264_v18  ;;  %v4348_v0 = vadd.f32 %v9534_v35, %v4263_v36  ;;  %v4177_v28 = vmul.f32 %v9703_v8, %v10563_v2 }
 0x4ad   :  { %v4183_v15 = vmul.f32 %v7792_v11, %v9415_v24  ;;  %v4182_v51 = vmul.f32 %v7792_v11, %v9411_v26  ;;  %v4181_v18 = vmul.f32 %v9718_v3, %v9399_v23  ;;  %4928 = vmatpush1.bf16.msra.mxu0 %v7715_v29  ;;  %v9762_v26 = vadd.f32 %v9543_v1, %v4253_v14 }
 0x4ae   :  { %v4389_v20 = vpack.c.bf16 %v4349_v55, %v4345_v4  ;;  %v4388_v37 = vpack.c.bf16 %v4348_v0, %v4344_v52  ;;  %v7794_v36 = vpop.eup %7793  ;;  %v4262_v2 = vmul.f32 %v9523_v34, %v4177_v28  ;;  %4929 = vmatprep.subr.bf16.mxu0 %v7720_v21  ;;  %v7723_v4 = vld [vmem:[#allocation10 + $0x1b4] ss:$8 sps:$4 sm:$0xff]   ;;  %v9768_v23 = vadd.f32 %v9543_v1, %v4257_v30 }
 0x4af   :  { %v4268_v13 = vmul.f32 %v9514_v49, %v4183_v15  ;;  %v4267_v24 = vmul.f32 %v9520_v39, %v4182_v51  ;;  %v4187_v52 = vmul.f32 %v7794_v36, %v9437_v9  ;;  %v4186_v5 = vmul.f32 %v7794_v36, %v9433_v32  ;;  %v10564_v9 = vld [vmem:[#allocation26_spill] sm:$0xff] }
 0x4b0   :  { %4878 = vmatprep.mubr.bf16.mxu0 %v4389_v20  ;;  %v4266_v55 = vmul.f32 %v9523_v34, %v4181_v18  ;;  %v4176_v32 = vmul.f32 %v9703_v8, %v10564_v9  ;;  %v7721_v15 = vld [vmem:[#allocation10 + $0x1b0] ss:$8 sps:$4 sm:$0xff]   ;;  %v9780_v51 = vadd.f32 %v9537_v48, %v4262_v2  ;;  %v4185_v30 = vmul.f32 %v7792_v11, %v9425_v56 }
 0x4b1   :  { %v4353_v29 = vadd.f32 %v9530_v10, %v4268_v13  ;;  %v4352_v31 = vadd.f32 %v9534_v35, %v4267_v24  ;;  %4879 = vmatmul.mubr.bf16.gmra.mrb[116].mxu0 %v4388_v37  ;;  %v4272_v0 = vmul.f32 %v9514_v49, %v4187_v52  ;;  %v4271_v28 = vmul.f32 %v9520_v39, %v4186_v5  ;;  %v10565_v20 = vld [vmem:[#allocation30_spill] sm:$0xff]  ;;  %v7726_v24 = vld [vmem:[#allocation10 + $0x1c4] ss:$8 sps:$4 sm:$0xff]   ;;  %v10566_v52 = vld [vmem:[#allocation35_spill] sm:$0xff] }
 0x4b2   :  { %4930 = vmatpush1.bf16.msra.mxu0 %v7718_v42  ;;  %v9783_v14 = vadd.f32 %v9537_v48, %v4266_v55  ;;  %v4180_v37 = vmul.f32 %v9718_v3, %v10565_v20  ;;  %v4261_v42 = vmul.f32 %v9517_v63, %v4176_v32  ;;  %v4189_v2 = vmul.f32 %v7794_v36, %v10566_v52  ;;  %v10567_v5 = vld [vmem:[#allocation37_spill] sm:$0xff]  ;;  %v10568_v55 = vld [vmem:[#allocation34_spill] sm:$0xff] }
 0x4b3   :  { %v7796_v18 = vpop.eup %7795  ;;  %4931 = vmatprep.subr.bf16.mxu0 %v7723_v4  ;;  %v4357_v13 = vadd.f32 %v9530_v10, %v4272_v0  ;;  %v4356_v8 = vadd.f32 %v9534_v35, %v4271_v28  ;;  %v4270_v28 = vmul.f32 %v9523_v34, %v4185_v30  ;;  %v4184_v32 = vmul.f32 %v7792_v11, %v10569_v40  ;;  %v7724_v52 = vld [vmem:[#allocation10 + $0x1c0] ss:$8 sps:$4 sm:$0xff]  }
 0x4b4   :  { %v4191_v9 = vmul.f32 %v7796_v18, %v10567_v5  ;;  %v4190_v21 = vmul.f32 %v7796_v18, %v10568_v55  ;;  %v4265_v56 = vmul.f32 %v9517_v63, %v4180_v37  ;;  %v9798_v0 = vadd.f32 %v9543_v1, %v4261_v42  ;;  %v10570_v5 = vld [vmem:[#allocation49_spill] sm:$0xff]  ;;  %v7729_v37 = vld [vmem:[#allocation10 + $0x1d4] ss:$8 sps:$4 sm:$0xff]  }
 0x4b5   :  { %v4393_v4 = vpack.c.bf16 %v4357_v13, %v4353_v29  ;;  %v4392_v19 = vpack.c.bf16 %v4356_v8, %v4352_v31  ;;  %v4274_v30 = vmul.f32 %v9523_v34, %v4189_v2  ;;  %v10572_v8 = vld [vmem:[#allocation33_spill] sm:$0xff]  ;;  %v10581_v25 = vpack.c.bf16 %v9768_v23, %v9762_v26 }
 0x4b6   :  { %v7798_v20 = vpop.eup %7797  ;;  %4932 = vmatpush1.bf16.msra.mxu0 %v7721_v15  ;;  %v4276_v55 = vmul.f32 %v9514_v49, %v4191_v9  ;;  %v4275_v29 = vmul.f32 %v9520_v39, %v4190_v21  ;;  %v4350_v13 = vadd.f32 %v9543_v1, %v4265_v56  ;;  %v4355_v15 = vadd.f32 %v9537_v48, %v4270_v28  ;;  %v7727_v9 = vld [vmem:[#allocation10 + $0x1d0] ss:$8 sps:$4 sm:$0xff]  }
 0x4b7   :  { %v4195_v33 = vmul.f32 %v7798_v20, %v10570_v5  ;;  %v4194_v3 = vmul.f32 %v7798_v20, %v10571_v6  ;;  %4888 = vmatprep.mubr.bf16.mxu0 %v4393_v4  ;;  %4933 = vmatprep.subr.bf16.mxu0 %v7726_v24  ;;  %v4359_v24 = vadd.f32 %v9537_v48, %v4274_v30  ;;  %v10576_v30 = vld [vmem:[#allocation50_spill] sm:$0xff] }
 0x4b8   :  { %v4361_v40 = vadd.f32 %v9530_v10, %v4276_v55  ;;  %v4390_v6 = vpack.c.bf16 %v4350_v13, %v9798_v0  ;;  %v4188_v42 = vmul.f32 %v7794_v36, %v10572_v8  ;;  %v4269_v21 = vmul.f32 %v9517_v63, %v4184_v32  ;;  %v10575_v36 = vld [vmem:[#allocation36_spill] sm:$0xff] }
 0x4b9   :  { %v4280_v11 = vmul.f32 %v9514_v49, %v4195_v33  ;;  %v4279_v31 = vmul.f32 %v9520_v39, %v4194_v3  ;;  %4889 = vmatmul.mubr.bf16.gmra.mrb[120].mxu0 %v4392_v19  ;;  %v10573_v33 = vld [vmem:[#allocation38_spill] sm:$0xff]  ;;  %v10574_v39 = vld [vmem:[#allocation51_spill] sm:$0xff]  ;;  %v7732_v19 = vld [vmem:[#allocation10 + $0x1e4] ss:$8 sps:$4 sm:$0xff]   ;;  %v4395_v4 = vpack.c.bf16 %v4359_v24, %v4355_v15  ;;  %v4192_v5 = vmul.f32 %v7796_v18, %v10575_v36 }
 0x4ba   :  { %4934 = vmatpush1.bf16.msra.mxu0 %v7724_v52  ;;  %v4193_v56 = vmul.f32 %v7796_v18, %v10573_v33  ;;  %v4197_v3 = vmul.f32 %v7798_v20, %v10574_v39  ;;  %v4273_v0 = vmul.f32 %v9517_v63, %v4188_v42  ;;  %v4354_v28 = vadd.f32 %v9543_v1, %v4269_v21  ;;  %v7735_v24 = vld [vmem:[#allocation10 + $0x1f4] ss:$8 sps:$4 sm:$0xff]   ;;  %v7733_v42 = vld [vmem:[#allocation10 + $0x1f0] ss:$8 sps:$4 sm:$0xff]  }
 0x4bb   :  { %v4365_v2 = vadd.f32 %v9530_v10, %v4280_v11  ;;  %v4364_v49 = vadd.f32 %v9534_v35, %v4279_v31  ;;  %4935 = vmatprep.subr.bf16.mxu0 %v7729_v37  ;;  %v4360_v55 = vadd.f32 %v9534_v35, %v4275_v29  ;;  %v4196_v11 = vmul.f32 %v7798_v20, %v10576_v30  ;;  %v7730_v31 = vld [vmem:[#allocation10 + $0x1e0] ss:$8 sps:$4 sm:$0xff]  }
 0x4bc   :  { %v4278_v52 = vmul.f32 %v9523_v34, %v4193_v56  ;;  %v4282_v10 = vmul.f32 %v9523_v34, %v4197_v3  ;;  %v4358_v13 = vadd.f32 %v9543_v1, %v4273_v0  ;;  %v4277_v37 = vmul.f32 %v9517_v63, %v4192_v5 }
 0x4bd   :  { %v4397_v32 = vpack.c.bf16 %v4365_v2, %v4361_v40  ;;  %v4396_v40 = vpack.c.bf16 %v4364_v49, %v4360_v55  ;;  %v4281_v34 = vmul.f32 %v9517_v63, %v4196_v11  ;;  %v10577_v63 = vpack.c.bf16 %v9671_v50, %v9662_v38 }
 0x4be   :  { %4936 = vmatpush1.bf16.msra.mxu0 %v7727_v9  ;;  %v4363_v15 = vadd.f32 %v9537_v48, %v4278_v52  ;;  %v4367_v18 = vadd.f32 %v9537_v48, %v4282_v10  ;;  %v4394_v8 = vpack.c.bf16 %v4358_v13, %v4354_v28  ;;  %v4362_v35 = vadd.f32 %v9543_v1, %v4277_v37 }
 0x4bf   :  { %4898 = vmatprep.mubr.bf16.mxu0 %v4397_v32  ;;  %4937 = vmatprep.subr.bf16.mxu0 %v7732_v19  ;;  %v4366_v20 = vadd.f32 %v9543_v1, %v4281_v34  ;;  %v10578_v1 = vpack.c.bf16 %v9691_v16, %v9686_v17 }
 0x4c0   :  { %v4399_v29 = vpack.c.bf16 %v4367_v18, %v4363_v15 }
 0x4c1   :  { %4899 = vmatmul.mubr.bf16.gmra.mrb[124].mxu0 %v4396_v40  ;;  %v4398_v48 = vpack.c.bf16 %v4366_v20, %v4362_v35 }
 0x4c2   :  { %4938 = vmatpush1.bf16.msra.mxu0 %v7730_v31  ;;  %4941 = vmatprep.mubr.bf16.mxu0 %v4371_v62  ;;  %v10582_v62 = vpack.c.bf16 %v9783_v14, %v9780_v51 }
 0x4c3   :  { %4939 = vmatprep.subr.bf16.mxu0 %v7735_v24 }
 0x4c6   :  { %4940 = vmatpush1.bf16.msra.mxu0 %v7733_v42 }
 0x4c9   :  { %4942 = vmatmul.mubr.bf16.vlgmr.msra.gmra.mrb[96].mxu0 %v4370_v27  ;;  %v7751_v27 = vld [vmem:[#allocation11 + $0x38] sm:$0xff]  }
 0x4ca   :  { %4951 = vmatprep.mubr.bf16.mxu0 %v4375_v58  ;;  %6729 = vmatpush3.bf16.msra.mxu1 %v7751_v27  ;;  %v9871_v58 = vrot.slane %v4464_v46, %v10583_v53 }
 0x4d1   :  { %4952 = vmatmul.mubr.bf16.gmra.mrb[100].mxu0 %v4374_v43 }
 0x4d2   :  { %4961 = vmatprep.mubr.bf16.mxu0 %v4379_v47 }
 0x4d9   :  { %4962 = vmatmul.mubr.bf16.gmra.mrb[104].mxu0 %v10577_v63 }
 0x4da   :  { %4971 = vmatprep.mubr.bf16.mxu0 %v10578_v1 }
 0x4e1   :  { %4972 = vmatmul.mubr.bf16.gmra.mrb[108].mxu0 %v10579_v61 }
 0x4e2   :  { %4981 = vmatprep.mubr.bf16.mxu0 %v10580_v7 }
 0x4e9   :  { %4982 = vmatmul.mubr.bf16.gmra.mrb[112].mxu0 %v10581_v25 }
 0x4ea   :  { %4991 = vmatprep.mubr.bf16.mxu0 %v10582_v62 }
 0x4f1   :  { %4992 = vmatmul.mubr.bf16.gmra.mrb[116].mxu0 %v4390_v6 }
 0x4f2   :  { %5001 = vmatprep.mubr.bf16.mxu0 %v4395_v4 }
 0x4f9   :  { %5002 = vmatmul.mubr.bf16.gmra.mrb[120].mxu0 %v4394_v8 }
 0x4fa   :  { %5011 = vmatprep.mubr.bf16.mxu0 %v4399_v29 }
 0x501   :  { %5012 = vmatmul.mubr.bf16.gmra.mrb[124].mxu0 %v4398_v48 }
 0x59c   :  { %v4943_v43 = vpop.f32.mrb[96].mxu0 }
 0x59d   :  { %v6983_v60 = vadd.f32 %v4943_v43, %v9871_v58  ;;  %v4945_v54 = vpop.f32.mrb[97].mxu0 }
 0x59e   :  { %v6984_v47 = vadd.f32 %v4945_v54, %v9874_v41  ;;  %v4947_v38 = vpop.f32.mrb[98].mxu0 }
 0x59f   :  { %v6985_v50 = vadd.f32 %v4947_v38, %v9871_v58  ;;  %v4949_v17 = vpop.f32.mrb[99].mxu0  ;;  %v5022_v44 = vmax.f32 %v6983_v60, 0.0 }
 0x5a0   :  { %v6986_v16 = vadd.f32 %v4949_v17, %v9874_v41  ;;  %v5023_v12 = vmax.f32 %v6984_v47, 0.0 }
 0x5a1   :  { %v5024_v59 = vmax.f32 %v6985_v50, 0.0 }
 0x5a2   :  { %v5025_v45 = vmax.f32 %v6986_v16, 0.0 }
 0x5a3   :  { %v5054_v26 = vpack.c.bf16 %v5024_v59, %v5022_v44 }
 0x5a4   :  { %v5055_v23 = vpack.c.bf16 %v5025_v45, %v5023_v12  ;;  %v4953_v51 = vpop.f32.mrb[100].mxu0 }
 0x5a5   :  { %v6987_v14 = vadd.f32 %v4953_v51, %v9871_v58  ;;  %v4955_v6 = vpop.f32.mrb[101].mxu0 }
 0x5a6   :  { %v6988_v21 = vadd.f32 %v4955_v6, %v9874_v41  ;;  %v4957_v9 = vpop.f32.mrb[102].mxu0  ;;  %5237 = vmatprep.mubr.bf16.mxu1 %v5055_v23 }
 0x5a7   :  { %v6989_v2 = vadd.f32 %v4957_v9, %v9871_v58  ;;  %v4959_v49 = vpop.f32.mrb[103].mxu0  ;;  %5238 = vmatmul.mubr.bf16.vlgmr.msra.gmra.mrb[96].mxu1 %v5054_v26  ;;  %v5026_v56 = vmax.f32 %v6987_v14, 0.0 }
 0x5a8   :  { %v6990_v33 = vadd.f32 %v4959_v49, %v9874_v41  ;;  %v5027_v3 = vmax.f32 %v6988_v21, 0.0 }
 0x5a9   :  { %v5028_v39 = vmax.f32 %v6989_v2, 0.0 }
 0x5aa   :  { %v5029_v19 = vmax.f32 %v6990_v33, 0.0 }
 0x5ab   :  { %v5056_v4 = vpack.c.bf16 %v5028_v39, %v5026_v56 }
 0x5ac   :  { %v5057_v0 = vpack.c.bf16 %v5029_v19, %v5027_v3  ;;  %v4963_v28 = vpop.f32.mrb[104].mxu0 }
 0x5ad   :  { %v6991_v36 = vadd.f32 %v4963_v28, %v9871_v58  ;;  %v4965_v5 = vpop.f32.mrb[105].mxu0 }
 0x5ae   :  { %v6992_v32 = vadd.f32 %v4965_v5, %v9874_v41  ;;  %v4967_v52 = vpop.f32.mrb[106].mxu0  ;;  %5245 = vmatprep.mubr.bf16.mxu1 %v5057_v0 }
 0x5af   :  { %v6993_v10 = vadd.f32 %v4967_v52, %v9871_v58  ;;  %v4969_v55 = vpop.f32.mrb[107].mxu0  ;;  %5246 = vmatmul.mubr.bf16.gmra.mrb[100].mxu1 %v5056_v4  ;;  %v5030_v30 = vmax.f32 %v6991_v36, 0.0 }
 0x5b0   :  { %v6994_v13 = vadd.f32 %v4969_v55, %v9874_v41  ;;  %v5031_v37 = vmax.f32 %v6992_v32, 0.0 }
 0x5b1   :  { %v5032_v11 = vmax.f32 %v6993_v10, 0.0 }
 0x5b2   :  { %v5033_v31 = vmax.f32 %v6994_v13, 0.0 }
 0x5b3   :  { %v5058_v15 = vpack.c.bf16 %v5032_v11, %v5030_v30 }
 0x5b4   :  { %v5059_v18 = vpack.c.bf16 %v5033_v31, %v5031_v37  ;;  %v4973_v40 = vpop.f32.mrb[108].mxu0 }
 0x5b5   :  { %v6995_v24 = vadd.f32 %v4973_v40, %v9871_v58  ;;  %v4975_v8 = vpop.f32.mrb[109].mxu0 }
 0x5b6   :  { %v6996_v34 = vadd.f32 %v4975_v8, %v9874_v41  ;;  %v4977_v35 = vpop.f32.mrb[110].mxu0  ;;  %5253 = vmatprep.mubr.bf16.mxu1 %v5059_v18 }
 0x5b7   :  { %v6997_v29 = vadd.f32 %v4977_v35, %v9871_v58  ;;  %v4979_v20 = vpop.f32.mrb[111].mxu0  ;;  %5254 = vmatmul.mubr.bf16.gmra.mrb[104].mxu1 %v5058_v15  ;;  %v5034_v48 = vmax.f32 %v6995_v24, 0.0 }
 0x5b8   :  { %v6998_v42 = vadd.f32 %v4979_v20, %v9874_v41  ;;  %v5035_v1 = vmax.f32 %v6996_v34, 0.0 }
 0x5b9   :  { %v5036_v63 = vmax.f32 %v6997_v29, 0.0 }
 0x5ba   :  { %v5037_v61 = vmax.f32 %v6998_v42, 0.0 }
 0x5bb   :  { %v5060_v7 = vpack.c.bf16 %v5036_v63, %v5034_v48 }
 0x5bc   :  { %v5061_v25 = vpack.c.bf16 %v5037_v61, %v5035_v1  ;;  %v4983_v62 = vpop.f32.mrb[112].mxu0  ;;  %v9908_v1 = vld [vmem:[#allocation13] ss:$0 sm:$0xff] }
 0x5bd   :  { %v6999_v57 = vadd.f32 %v4983_v62, %v9871_v58  ;;  %v4985_v27 = vpop.f32.mrb[113].mxu0 }
 0x5be   :  { %v7000_v46 = vadd.f32 %v4985_v27, %v9874_v41  ;;  %v4987_v53 = vpop.f32.mrb[114].mxu0  ;;  %5261 = vmatprep.mubr.bf16.mxu1 %v5061_v25 }
 0x5bf   :  { %v7001_v22 = vadd.f32 %v4987_v53, %v9871_v58  ;;  %v4989_v43 = vpop.f32.mrb[115].mxu0  ;;  %5262 = vmatmul.mubr.bf16.gmra.mrb[108].mxu1 %v5060_v7  ;;  %v5038_v54 = vmax.f32 %v6999_v57, 0.0 }
 0x5c0   :  { %v7002_v60 = vadd.f32 %v4989_v43, %v9874_v41  ;;  %v5039_v38 = vmax.f32 %v7000_v46, 0.0 }
 0x5c1   :  { %v5040_v47 = vmax.f32 %v7001_v22, 0.0 }
 0x5c2   :  { %v5041_v50 = vmax.f32 %v7002_v60, 0.0 }
 0x5c3   :  { %v5062_v17 = vpack.c.bf16 %v5040_v47, %v5038_v54 }
 0x5c4   :  { %v5063_v16 = vpack.c.bf16 %v5041_v50, %v5039_v38  ;;  %v4993_v44 = vpop.f32.mrb[116].mxu0 }
 0x5c5   :  { %v7003_v59 = vadd.f32 %v4993_v44, %v9871_v58  ;;  %v4995_v12 = vpop.f32.mrb[117].mxu0 }
 0x5c6   :  { %v7004_v45 = vadd.f32 %v4995_v12, %v9874_v41  ;;  %v4997_v26 = vpop.f32.mrb[118].mxu0  ;;  %5269 = vmatprep.mubr.bf16.mxu1 %v5063_v16 }
 0x5c7   :  { %v7005_v23 = vadd.f32 %v4997_v26, %v9871_v58  ;;  %v4999_v51 = vpop.f32.mrb[119].mxu0  ;;  %5270 = vmatmul.mubr.bf16.gmra.mrb[112].mxu1 %v5062_v17  ;;  %v5042_v6 = vmax.f32 %v7003_v59, 0.0 }
 0x5c8   :  { %v7006_v14 = vadd.f32 %v4999_v51, %v9874_v41  ;;  %v5043_v9 = vmax.f32 %v7004_v45, 0.0 }
 0x5c9   :  { %v5044_v21 = vmax.f32 %v7005_v23, 0.0 }
 0x5ca   :  { %v5045_v2 = vmax.f32 %v7006_v14, 0.0 }
 0x5cb   :  { %v5064_v49 = vpack.c.bf16 %v5044_v21, %v5042_v6 }
 0x5cc   :  { %v5065_v33 = vpack.c.bf16 %v5045_v2, %v5043_v9  ;;  %v5003_v56 = vpop.f32.mrb[120].mxu0 }
 0x5cd   :  { %v7007_v39 = vadd.f32 %v5003_v56, %v9871_v58  ;;  %v5005_v3 = vpop.f32.mrb[121].mxu0 }
 0x5ce   :  { %v7008_v19 = vadd.f32 %v5005_v3, %v9874_v41  ;;  %v5007_v4 = vpop.f32.mrb[122].mxu0  ;;  %5277 = vmatprep.mubr.bf16.mxu1 %v5065_v33 }
 0x5cf   :  { %v7009_v0 = vadd.f32 %v5007_v4, %v9871_v58  ;;  %v5009_v28 = vpop.f32.mrb[123].mxu0  ;;  %5278 = vmatmul.mubr.bf16.gmra.mrb[116].mxu1 %v5064_v49  ;;  %v5046_v5 = vmax.f32 %v7007_v39, 0.0 }
 0x5d0   :  { %v7010_v36 = vadd.f32 %v5009_v28, %v9874_v41  ;;  %v5047_v52 = vmax.f32 %v7008_v19, 0.0 }
 0x5d1   :  { %v5048_v32 = vmax.f32 %v7009_v0, 0.0 }
 0x5d2   :  { %v5049_v10 = vmax.f32 %v7010_v36, 0.0 }
 0x5d3   :  { %v5066_v55 = vpack.c.bf16 %v5048_v32, %v5046_v5 }
 0x5d4   :  { %v5067_v13 = vpack.c.bf16 %v5049_v10, %v5047_v52  ;;  %v5013_v30 = vpop.f32.mrb[124].mxu0 }
 0x5d5   :  { %v7011_v11 = vadd.f32 %v5013_v30, %v9871_v58  ;;  %v5015_v37 = vpop.f32.mrb[125].mxu0 }
 0x5d6   :  { %v7012_v31 = vadd.f32 %v5015_v37, %v9874_v41  ;;  %v5017_v15 = vpop.f32.mrb[126].mxu0  ;;  %5285 = vmatprep.mubr.bf16.mxu1 %v5067_v13 }
 0x5d7   :  { %v7013_v18 = vadd.f32 %v5017_v15, %v9871_v58  ;;  %v5019_v40 = vpop.f32.mrb[127].mxu0  ;;  %5286 = vmatmul.mubr.bf16.gmra.mrb[120].mxu1 %v5066_v55  ;;  %v5050_v8 = vmax.f32 %v7011_v11, 0.0 }
 0x5d8   :  { %v7014_v24 = vadd.f32 %v5019_v40, %v9874_v41  ;;  %v5051_v35 = vmax.f32 %v7012_v31, 0.0 }
 0x5d9   :  { %v5052_v34 = vmax.f32 %v7013_v18, 0.0 }
 0x5da   :  { %v5053_v29 = vmax.f32 %v7014_v24, 0.0 }
 0x5db   :  { %v5068_v20 = vpack.c.bf16 %v5052_v34, %v5050_v8 }
 0x5dc   :  { %v5069_v42 = vpack.c.bf16 %v5053_v29, %v5051_v35 }
 0x5de   :  { %5293 = vmatprep.mubr.bf16.mxu1 %v5069_v42 }
 0x5df   :  { %5294 = vmatmul.mubr.bf16.gmra.mrb[124].mxu1 %v5068_v20 }
 0x67a   :  { %v6730_v48 = vpop.f32.mrb[96].mxu1 }
 0x67b   :  { %v6731_v63 = vpop.f32.mrb[97].mxu1 }
 0x67c   :  { %v6732_v61 = vadd.f32 %v6731_v63, %v6730_v48  ;;  %v6733_v7 = vpop.f32.mrb[98].mxu1 }
 0x67d   :  { %v6734_v25 = vpop.f32.mrb[99].mxu1 }
 0x67e   :  { %v6735_v58 = vadd.f32 %v6734_v25, %v6733_v7  ;;  %v9911_v62 = vadd.f32 %v6732_v61, %v9908_v1 }
 0x680   :  { %v5302_v41 = vmax.f32 %v9911_v62, 0.0  ;;  %v9915_v57 = vadd.f32 %v6735_v58, %v9908_v1 }
 0x682   :  { %v6736_v27 = vpop.f32.mrb[100].mxu1  ;;  %5320 = vadd.xlane.f32.xlu0 %v5302_v41  ;;  %v5303_v46 = vmax.f32 %v9915_v57, 0.0 }
 0x683   :  { %v6737_v53 = vpop.f32.mrb[101].mxu1 }
 0x684   :  { %v6738_v22 = vadd.f32 %v6737_v53, %v6736_v27  ;;  %v6739_v43 = vpop.f32.mrb[102].mxu1  ;;  %5322 = vadd.xlane.f32.xlu1 %v5303_v46 }
 0x685   :  { %v6740_v60 = vpop.f32.mrb[103].mxu1 }
 0x686   :  { %v6741_v54 = vadd.f32 %v6740_v60, %v6739_v43  ;;  %v9923_v47 = vadd.f32 %v6738_v22, %v9908_v1 }
 0x688   :  { %v5304_v38 = vmax.f32 %v9923_v47, 0.0  ;;  %v9927_v50 = vadd.f32 %v6741_v54, %v9908_v1 }
 0x68a   :  { %v6742_v17 = vpop.f32.mrb[104].mxu1  ;;  %5324 = vadd.xlane.f32.xlu0 %v5304_v38  ;;  %v5305_v16 = vmax.f32 %v9927_v50, 0.0 }
 0x68b   :  { %v6743_v44 = vpop.f32.mrb[105].mxu1 }
 0x68c   :  { %v6744_v59 = vadd.f32 %v6743_v44, %v6742_v17  ;;  %v6745_v12 = vpop.f32.mrb[106].mxu1  ;;  %5326 = vadd.xlane.f32.xlu1 %v5305_v16 }
 0x68d   :  { %v6746_v45 = vpop.f32.mrb[107].mxu1 }
 0x68e   :  { %v6747_v26 = vadd.f32 %v6746_v45, %v6745_v12  ;;  %v9935_v23 = vadd.f32 %v6744_v59, %v9908_v1 }
 0x690   :  { %v5306_v51 = vmax.f32 %v9935_v23, 0.0  ;;  %v9939_v14 = vadd.f32 %v6747_v26, %v9908_v1  ;;  %v7752_v26 = vld [vmem:[%s10269_s9] sm:$0xff]   ;;  %v7753_v23 = vld [vmem:[%s10269_s9 + $0x8] sm:$0xff]  }
 0x691   :  { %6825 = vmatprep.subr.bf16.mxu1 %v7752_v26 }
 0x692   :  { %v6748_v6 = vpop.f32.mrb[108].mxu1  ;;  %5328 = vadd.xlane.f32.xlu0 %v5306_v51  ;;  %v5307_v21 = vmax.f32 %v9939_v14, 0.0  ;;  %6826 = vmatpush3.bf16.msra.mxu1 %v7752_v26  ;;  %v7757_v26 = vld [vmem:[%s10269_s9 + $0x28] sm:$0xff]  }
 0x693   :  { %v6749_v9 = vpop.f32.mrb[109].mxu1  ;;  %6827 = vmatprep.subr.bf16.mxu1 %v7753_v23 }
 0x694   :  { %v6750_v2 = vadd.f32 %v6749_v9, %v6748_v6  ;;  %v6751_v49 = vpop.f32.mrb[110].mxu1  ;;  %5330 = vadd.xlane.f32.xlu1 %v5307_v21 }
 0x695   :  { %v6752_v33 = vpop.f32.mrb[111].mxu1 }
 0x696   :  { %v6753_v56 = vadd.f32 %v6752_v33, %v6751_v49  ;;  %v9947_v39 = vadd.f32 %v6750_v2, %v9908_v1  ;;  %6828 = vmatpush3.bf16.msra.mxu1 %v7753_v23 }
 0x698   :  { %v5308_v3 = vmax.f32 %v9947_v39, 0.0  ;;  %v9951_v19 = vadd.f32 %v6753_v56, %v9908_v1 }
 0x69a   :  { %v6754_v4 = vpop.f32.mrb[112].mxu1  ;;  %5332 = vadd.xlane.f32.xlu0 %v5308_v3  ;;  %v5309_v0 = vmax.f32 %v9951_v19, 0.0 }
 0x69b   :  { %v6755_v28 = vpop.f32.mrb[113].mxu1 }
 0x69c   :  { %v6756_v36 = vadd.f32 %v6755_v28, %v6754_v4  ;;  %v6757_v5 = vpop.f32.mrb[114].mxu1  ;;  %5334 = vadd.xlane.f32.xlu1 %v5309_v0 }
 0x69d   :  { %v6758_v32 = vpop.f32.mrb[115].mxu1 }
 0x69e   :  { %v6759_v52 = vadd.f32 %v6758_v32, %v6757_v5  ;;  %v9959_v10 = vadd.f32 %v6756_v36, %v9908_v1 }
 0x6a0   :  { %v5310_v55 = vmax.f32 %v9959_v10, 0.0  ;;  %v9963_v13 = vadd.f32 %v6759_v52, %v9908_v1  ;;  %v7754_v10 = vld [vmem:[%s10269_s9 + $0x10] sm:$0xff]  }
 0x6a1   :  { %6829 = vmatprep.subr.bf16.mxu1 %v7754_v10 }
 0x6a2   :  { %v6760_v30 = vpop.f32.mrb[116].mxu1  ;;  %5336 = vadd.xlane.f32.xlu0 %v5310_v55  ;;  %v5311_v11 = vmax.f32 %v9963_v13, 0.0  ;;  %6830 = vmatpush3.bf16.msra.mxu1 %v7754_v10 }
 0x6a3   :  { %v6761_v37 = vpop.f32.mrb[117].mxu1 }
 0x6a4   :  { %v6762_v31 = vadd.f32 %v6761_v37, %v6760_v30  ;;  %v6763_v15 = vpop.f32.mrb[118].mxu1  ;;  %5338 = vadd.xlane.f32.xlu1 %v5311_v11 }
 0x6a5   :  { %v6764_v18 = vpop.f32.mrb[119].mxu1 }
 0x6a6   :  { %v6765_v40 = vadd.f32 %v6764_v18, %v6763_v15  ;;  %v9971_v24 = vadd.f32 %v6762_v31, %v9908_v1 }
 0x6a8   :  { %v5312_v8 = vmax.f32 %v9971_v24, 0.0  ;;  %v9975_v34 = vadd.f32 %v6765_v40, %v9908_v1 }
 0x6aa   :  { %v6766_v35 = vpop.f32.mrb[120].mxu1  ;;  %5340 = vadd.xlane.f32.xlu0 %v5312_v8  ;;  %v5313_v29 = vmax.f32 %v9975_v34, 0.0  ;;  %v7756_v34 = vld [vmem:[%s10269_s9 + $0x20] sm:$0xff]  }
 0x6ab   :  { %v6767_v20 = vpop.f32.mrb[121].mxu1 }
 0x6ac   :  { %v6768_v42 = vadd.f32 %v6767_v20, %v6766_v35  ;;  %v6769_v48 = vpop.f32.mrb[122].mxu1  ;;  %5342 = vadd.xlane.f32.xlu1 %v5313_v29 }
 0x6ad   :  { %v6770_v63 = vpop.f32.mrb[123].mxu1 }
 0x6ae   :  { %v6771_v61 = vadd.f32 %v6770_v63, %v6769_v48  ;;  %v9983_v7 = vadd.f32 %v6768_v42, %v9908_v1 }
 0x6b0   :  { %v5314_v25 = vmax.f32 %v9983_v7, 0.0  ;;  %v9987_v58 = vadd.f32 %v6771_v61, %v9908_v1 }
 0x6b2   :  { %v6772_v27 = vpop.f32.mrb[124].mxu1  ;;  %5344 = vadd.xlane.f32.xlu0 %v5314_v25  ;;  %v5315_v53 = vmax.f32 %v9987_v58, 0.0 }
 0x6b3   :  { %v6773_v22 = vpop.f32.mrb[125].mxu1 }
 0x6b4   :  { %v6774_v43 = vadd.f32 %v6773_v22, %v6772_v27  ;;  %v6775_v60 = vpop.f32.mrb[126].mxu1  ;;  %5346 = vadd.xlane.f32.xlu1 %v5315_v53 }
 0x6b5   :  { %v6776_v54 = vpop.f32.mrb[127].mxu1 }
 0x6b6   :  { %v6777_v17 = vadd.f32 %v6776_v54, %v6775_v60  ;;  %v9995_v44 = vadd.f32 %v6774_v43, %v9908_v1  ;;  %v7755_v54 = vld [vmem:[%s10269_s9 + $0x18] sm:$0xff]  }
 0x6b7   :  { %6831 = vmatprep.subr.bf16.mxu1 %v7755_v54 }
 0x6b8   :  { %v5316_v59 = vmax.f32 %v9995_v44, 0.0  ;;  %v9999_v12 = vadd.f32 %v6777_v17, %v9908_v1  ;;  %6832 = vmatpush3.bf16.msra.mxu1 %v7755_v54  ;;  %v10129_v44 = vld [vmem:[%s10271_s11] sm:$0xff]  }
 0x6b9   :  { %6833 = vmatprep.subr.bf16.mxu1 %v7756_v34 }
 0x6ba   :  { %5348 = vadd.xlane.f32.xlu0 %v5316_v59  ;;  %v5317_v45 = vmax.f32 %v9999_v12, 0.0 }
 0x6bc   :  { %5350 = vadd.xlane.f32.xlu1 %v5317_v45  ;;  %6834 = vmatpush3.bf16.msra.mxu1 %v7756_v34 }
 0x6bd   :  { %6835 = vmatprep.subr.bf16.mxu1 %v7757_v26 }
 0x6c0   :  { %6836 = vmatpush3.bf16.msra.mxu1 %v7757_v26 }
 0x70f   :  { %v5321_v6 = vpop.xlane.xlu0 %5320 }
 0x710   :  { %v5353_v9 = vmul.f32 0.0078125, %v5321_v6 }
 0x711   :  { %v5323_v2 = vpop.xlane.xlu1 %5322 }
 0x712   :  { %v10011_v1 = vsub.f32 %v5302_v41, %v5353_v9  ;;  %v5354_v49 = vmul.f32 0.0078125, %v5323_v2 }
 0x714   :  { %v10015_v33 = vsub.f32 %v5303_v46, %v5354_v49  ;;  %v5385_v56 = vmul.f32 %v10011_v1, %v10011_v1 }
 0x716   :  { %5401 = vadd.xlane.f32.xlu0 %v5385_v56  ;;  %v5386_v4 = vmul.f32 %v10015_v33, %v10015_v33  ;;  %v7758_v56 = vld [vmem:[%s10269_s9 + $0x30] sm:$0xff]  }
 0x717   :  { %v5325_v28 = vpop.xlane.xlu0 %5324  ;;  %6837 = vmatprep.subr.bf16.mxu1 %v7758_v56 }
 0x718   :  { %v5355_v36 = vmul.f32 0.0078125, %v5325_v28  ;;  %5403 = vadd.xlane.f32.xlu1 %v5386_v4  ;;  %6838 = vmatpush3.bf16.msra.mxu1 %v7758_v56 }
 0x719   :  { %v5327_v5 = vpop.xlane.xlu1 %5326 }
 0x71a   :  { %v10023_v62 = vsub.f32 %v5304_v38, %v5355_v36  ;;  %v5356_v41 = vmul.f32 0.0078125, %v5327_v5 }
 0x71c   :  { %v10027_v57 = vsub.f32 %v5305_v16, %v5356_v41  ;;  %v5387_v46 = vmul.f32 %v10023_v62, %v10023_v62 }
 0x71e   :  { %5405 = vadd.xlane.f32.xlu0 %v5387_v46  ;;  %v5388_v32 = vmul.f32 %v10027_v57, %v10027_v57 }
 0x71f   :  { %v5329_v52 = vpop.xlane.xlu0 %5328 }
 0x720   :  { %v5357_v30 = vmul.f32 0.0078125, %v5329_v52  ;;  %5407 = vadd.xlane.f32.xlu1 %v5388_v32 }
 0x721   :  { %v5331_v37 = vpop.xlane.xlu1 %5330 }
 0x722   :  { %v10035_v47 = vsub.f32 %v5306_v51, %v5357_v30  ;;  %v5358_v38 = vmul.f32 0.0078125, %v5331_v37 }
 0x724   :  { %v10039_v50 = vsub.f32 %v5307_v21, %v5358_v38  ;;  %v5389_v16 = vmul.f32 %v10035_v47, %v10035_v47 }
 0x726   :  { %5409 = vadd.xlane.f32.xlu0 %v5389_v16  ;;  %v5390_v31 = vmul.f32 %v10039_v50, %v10039_v50 }
 0x727   :  { %v5333_v15 = vpop.xlane.xlu0 %5332 }
 0x728   :  { %v5359_v18 = vmul.f32 0.0078125, %v5333_v15  ;;  %5411 = vadd.xlane.f32.xlu1 %v5390_v31 }
 0x729   :  { %v5335_v51 = vpop.xlane.xlu1 %5334 }
 0x72a   :  { %v10050_v14 = vsub.f32 %v5308_v3, %v5359_v18  ;;  %v5360_v21 = vmul.f32 0.0078125, %v5335_v51  ;;  %v10135_v51 = vld [vmem:[%s10279_s19] ss:$0 sm:$0xff] }
 0x72c   :  { %v10054_v40 = vsub.f32 %v5309_v0, %v5360_v21  ;;  %v5391_v35 = vmul.f32 %v10050_v14, %v10050_v14 }
 0x72e   :  { %5413 = vadd.xlane.f32.xlu0 %v5391_v35  ;;  %v5392_v20 = vmul.f32 %v10054_v40, %v10054_v40 }
 0x72f   :  { %v5337_v42 = vpop.xlane.xlu0 %5336 }
 0x730   :  { %v5361_v48 = vmul.f32 0.0078125, %v5337_v42  ;;  %5415 = vadd.xlane.f32.xlu1 %v5392_v20 }
 0x731   :  { %v5339_v39 = vpop.xlane.xlu1 %5338 }
 0x732   :  { %v10062_v3 = vsub.f32 %v5310_v55, %v5361_v48  ;;  %v5362_v63 = vmul.f32 0.0078125, %v5339_v39 }
 0x734   :  { %v10066_v19 = vsub.f32 %v5311_v11, %v5362_v63  ;;  %v5393_v0 = vmul.f32 %v10062_v3, %v10062_v3 }
 0x736   :  { %5417 = vadd.xlane.f32.xlu0 %v5393_v0  ;;  %v5394_v61 = vmul.f32 %v10066_v19, %v10066_v19 }
 0x737   :  { %v5341_v27 = vpop.xlane.xlu0 %5340 }
 0x738   :  { %v5363_v22 = vmul.f32 0.0078125, %v5341_v27  ;;  %5419 = vadd.xlane.f32.xlu1 %v5394_v61  ;;  %v10143_v27 = vld [vmem:[%s10280_s20] ss:$0 sm:$0xff] }
 0x739   :  { %v5343_v43 = vpop.xlane.xlu1 %5342 }
 0x73a   :  { %v10077_v55 = vsub.f32 %v5312_v8, %v5363_v22  ;;  %v5364_v13 = vmul.f32 0.0078125, %v5343_v43 }
 0x73c   :  { %v10081_v11 = vsub.f32 %v5313_v29, %v5364_v13  ;;  %v5395_v60 = vmul.f32 %v10077_v55, %v10077_v55 }
 0x73e   :  { %5421 = vadd.xlane.f32.xlu0 %v5395_v60  ;;  %v5396_v24 = vmul.f32 %v10081_v11, %v10081_v11 }
 0x73f   :  { %v5345_v8 = vpop.xlane.xlu0 %5344 }
 0x740   :  { %v5365_v29 = vmul.f32 0.0078125, %v5345_v8  ;;  %5423 = vadd.xlane.f32.xlu1 %v5396_v24 }
 0x741   :  { %v5347_v17 = vpop.xlane.xlu1 %5346 }
 0x742   :  { %v10098_v6 = vsub.f32 %v5314_v25, %v5365_v29  ;;  %v5366_v9 = vmul.f32 0.0078125, %v5347_v17 }
 0x744   :  { %v10102_v2 = vsub.f32 %v5315_v53, %v5366_v9  ;;  %v5397_v49 = vmul.f32 %v10098_v6, %v10098_v6  ;;  %v7759_v53 = vld [vmem:[%s10269_s9 + $0x38] sm:$0xff]  }
 0x745   :  { %6839 = vmatprep.subr.bf16.mxu1 %v7759_v53 }
 0x746   :  { %5425 = vadd.xlane.f32.xlu0 %v5397_v49  ;;  %v5398_v7 = vmul.f32 %v10102_v2, %v10102_v2  ;;  %6840 = vmatpush3.bf16.msra.mxu1 %v7759_v53 }
 0x747   :  { %v5349_v25 = vpop.xlane.xlu0 %5348  ;;  %6857 = vmatprep.subr.bf16.mxu1 %v10129_v44 }
 0x748   :  { %v5367_v4 = vmul.f32 0.0078125, %v5349_v25  ;;  %5427 = vadd.xlane.f32.xlu1 %v5398_v7 }
 0x749   :  { %v5351_v58 = vpop.xlane.xlu1 %5350 }
 0x74a   :  { %v10116_v28 = vsub.f32 %v5316_v59, %v5367_v4  ;;  %v5368_v36 = vmul.f32 0.0078125, %v5351_v58 }
 0x74c   :  { %v10120_v5 = vsub.f32 %v5317_v45, %v5368_v36  ;;  %v5399_v41 = vmul.f32 %v10116_v28, %v10116_v28 }
 0x74e   :  { %5429 = vadd.xlane.f32.xlu0 %v5399_v41  ;;  %v5400_v46 = vmul.f32 %v10120_v5, %v10120_v5 }
 0x750   :  { %5431 = vadd.xlane.f32.xlu1 %v5400_v46 }
 0x7a3   :  { %v5402_v59 = vpop.xlane.xlu0 %5401 }
 0x7a4   :  { %v5433_v12 = vmul.f32 0.0078125, %v5402_v59 }
 0x7a5   :  { %v5404_v45 = vpop.xlane.xlu1 %5403 }
 0x7a6   :  { %v5449_v32 = vadd.f32 1e-05, %v5433_v12  ;;  %v5434_v52 = vmul.f32 0.0078125, %v5404_v45 }
 0x7a8   :  { %7799 = vrsqrt.f32 %v5449_v32  ;;  %v5450_v30 = vadd.f32 1e-05, %v5434_v52 }
 0x7aa   :  { %7801 = vrsqrt.f32 %v5450_v30 }
 0x7ab   :  { %v5406_v37 = vpop.xlane.xlu0 %5405 }
 0x7ac   :  { %v5435_v38 = vmul.f32 0.0078125, %v5406_v37 }
 0x7ad   :  { %v5408_v16 = vpop.xlane.xlu1 %5407 }
 0x7ae   :  { %v5451_v31 = vadd.f32 1e-05, %v5435_v38  ;;  %v5436_v15 = vmul.f32 0.0078125, %v5408_v16 }
 0x7b0   :  { %7803 = vrsqrt.f32 %v5451_v31  ;;  %v5452_v18 = vadd.f32 1e-05, %v5436_v15 }
 0x7b2   :  { %v7800_v23 = vpop.eup %7799  ;;  %7805 = vrsqrt.f32 %v5452_v18 }
 0x7b3   :  { %v5410_v21 = vpop.xlane.xlu0 %5409  ;;  %v5481_v35 = vmul.f32 %v7800_v23, %v10011_v1 }
 0x7b4   :  { %v7802_v20 = vpop.eup %7801  ;;  %v5437_v42 = vmul.f32 0.0078125, %v5410_v21 }
 0x7b5   :  { %v5412_v48 = vpop.xlane.xlu1 %5411  ;;  %v5482_v39 = vmul.f32 %v7802_v20, %v10015_v33  ;;  %v5503_v63 = vmul.f32 %v10135_v51, %v5481_v35 }
 0x7b6   :  { %v5453_v0 = vadd.f32 1e-05, %v5437_v42  ;;  %v5438_v61 = vmul.f32 0.0078125, %v5412_v48 }
 0x7b7   :  { %v5504_v22 = vmul.f32 %v10135_v51, %v5482_v39  ;;  %v5525_v1 = vadd.f32 %v10143_v27, %v5503_v63 }
 0x7b8   :  { %7807 = vrsqrt.f32 %v5453_v0  ;;  %v5454_v43 = vadd.f32 1e-05, %v5438_v61 }
 0x7b9   :  { %v5526_v10 = vadd.f32 %v10143_v27, %v5504_v22 }
 0x7ba   :  { %v7804_v13 = vpop.eup %7803  ;;  %7809 = vrsqrt.f32 %v5454_v43 }
 0x7bb   :  { %v5483_v33 = vmul.f32 %v7804_v13, %v10023_v62  ;;  %v5414_v60 = vpop.xlane.xlu0 %5413  ;;  %v5541_v54 = vpack.c.bf16 %v5526_v10, %v5525_v1 }
 0x7bc   :  { %v7806_v24 = vpop.eup %7805  ;;  %v5439_v8 = vmul.f32 0.0078125, %v5414_v60 }
 0x7bd   :  { %v5505_v34 = vmul.f32 %v10135_v51, %v5483_v33  ;;  %v5484_v29 = vmul.f32 %v7806_v24, %v10027_v57  ;;  %v5416_v17 = vpop.xlane.xlu1 %5415  ;;  %6841 = vmatprep.mubr.bf16.mxu1 %v5541_v54  ;;  %v7761_v57 = vld [vmem:[%s10271_s11 + $0x8] sm:$0xff]  }
 0x7be   :  { %v5455_v26 = vadd.f32 1e-05, %v5439_v8  ;;  %v5440_v9 = vmul.f32 0.0078125, %v5416_v17 }
 0x7bf   :  { %v5506_v49 = vmul.f32 %v10135_v51, %v5484_v29  ;;  %v5527_v7 = vadd.f32 %v10143_v27, %v5505_v34 }
 0x7c0   :  { %7811 = vrsqrt.f32 %v5455_v26  ;;  %v5456_v56 = vadd.f32 1e-05, %v5440_v9 }
 0x7c1   :  { %v5528_v62 = vadd.f32 %v10143_v27, %v5506_v49 }
 0x7c2   :  { %v7808_v25 = vpop.eup %7807  ;;  %7813 = vrsqrt.f32 %v5456_v56 }
 0x7c3   :  { %v5418_v4 = vpop.xlane.xlu0 %5417  ;;  %v5542_v58 = vpack.c.bf16 %v5528_v62, %v5527_v7  ;;  %v5485_v53 = vmul.f32 %v7808_v25, %v10035_v47 }
 0x7c4   :  { %v7810_v36 = vpop.eup %7809  ;;  %v5441_v41 = vmul.f32 0.0078125, %v5418_v4 }
 0x7c5   :  { %v5420_v46 = vpop.xlane.xlu1 %5419  ;;  %6842 = vmatmul.mubr.bf16.vlgmr.msra.gmra.mrb[128].mxu1 %v5542_v58  ;;  %v5486_v59 = vmul.f32 %v7810_v36, %v10039_v50  ;;  %v5507_v12 = vmul.f32 %v10135_v51, %v5485_v53 }
 0x7c6   :  { %v5457_v45 = vadd.f32 1e-05, %v5441_v41  ;;  %v5442_v32 = vmul.f32 0.0078125, %v5420_v46  ;;  %6858 = vmatpush3.bf16.msra.mxu1 %v10129_v44 }
 0x7c7   :  { %v5508_v52 = vmul.f32 %v10135_v51, %v5486_v59  ;;  %6859 = vmatprep.subr.bf16.mxu1 %v7761_v57  ;;  %v5529_v30 = vadd.f32 %v10143_v27, %v5507_v12 }
 0x7c8   :  { %7815 = vrsqrt.f32 %v5457_v45  ;;  %v5458_v47 = vadd.f32 1e-05, %v5442_v32 }
 0x7c9   :  { %v5530_v37 = vadd.f32 %v10143_v27, %v5508_v52 }
 0x7ca   :  { %v7812_v38 = vpop.eup %7811  ;;  %7817 = vrsqrt.f32 %v5458_v47  ;;  %6860 = vmatpush3.bf16.msra.mxu1 %v7761_v57 }
 0x7cb   :  { %v5422_v16 = vpop.xlane.xlu0 %5421  ;;  %v5543_v50 = vpack.c.bf16 %v5530_v37, %v5529_v30  ;;  %v5487_v31 = vmul.f32 %v7812_v38, %v10050_v14 }
 0x7cc   :  { %v7814_v15 = vpop.eup %7813  ;;  %v5443_v18 = vmul.f32 0.0078125, %v5422_v16 }
 0x7cd   :  { %v5424_v23 = vpop.xlane.xlu1 %5423  ;;  %6845 = vmatprep.mubr.bf16.mxu1 %v5543_v50  ;;  %v5488_v44 = vmul.f32 %v7814_v15, %v10054_v40  ;;  %v5509_v21 = vmul.f32 %v10135_v51, %v5487_v31  ;;  %v7762_v15 = vld [vmem:[%s10271_s11 + $0x10] sm:$0xff]  }
 0x7ce   :  { %v5459_v35 = vadd.f32 1e-05, %v5443_v18  ;;  %v5444_v20 = vmul.f32 0.0078125, %v5424_v23  ;;  %6861 = vmatprep.subr.bf16.mxu1 %v7762_v15 }
 0x7cf   :  { %v5510_v42 = vmul.f32 %v10135_v51, %v5488_v44  ;;  %v5531_v39 = vadd.f32 %v10143_v27, %v5509_v21  ;;  %6862 = vmatpush3.bf16.msra.mxu1 %v7762_v15 }
 0x7d0   :  { %7819 = vrsqrt.f32 %v5459_v35  ;;  %v5460_v48 = vadd.f32 1e-05, %v5444_v20 }
 0x7d1   :  { %v5532_v63 = vadd.f32 %v10143_v27, %v5510_v42 }
 0x7d2   :  { %v7816_v0 = vpop.eup %7815  ;;  %7821 = vrsqrt.f32 %v5460_v48 }
 0x7d3   :  { %v5426_v14 = vpop.xlane.xlu0 %5425  ;;  %v5544_v61 = vpack.c.bf16 %v5532_v63, %v5531_v39  ;;  %v5489_v22 = vmul.f32 %v7816_v0, %v10062_v3 }
 0x7d4   :  { %v7818_v43 = vpop.eup %7817  ;;  %v5445_v40 = vmul.f32 0.0078125, %v5426_v14 }
 0x7d5   :  { %v5428_v1 = vpop.xlane.xlu1 %5427  ;;  %6846 = vmatmul.mubr.bf16.gmra.mrb[132].mxu1 %v5544_v61  ;;  %v5490_v10 = vmul.f32 %v7818_v43, %v10066_v19  ;;  %v5511_v13 = vmul.f32 %v10135_v51, %v5489_v22 }
 0x7d6   :  { %v5461_v33 = vadd.f32 1e-05, %v5445_v40  ;;  %v5446_v60 = vmul.f32 0.0078125, %v5428_v1 }
 0x7d7   :  { %v5512_v54 = vmul.f32 %v10135_v51, %v5490_v10  ;;  %v5533_v8 = vadd.f32 %v10143_v27, %v5511_v13 }
 0x7d8   :  { %7823 = vrsqrt.f32 %v5461_v33  ;;  %v5462_v24 = vadd.f32 1e-05, %v5446_v60 }
 0x7d9   :  { %v5534_v34 = vadd.f32 %v10143_v27, %v5512_v54 }
 0x7da   :  { %v7820_v29 = vpop.eup %7819  ;;  %7825 = vrsqrt.f32 %v5462_v24 }
 0x7db   :  { %v5430_v3 = vpop.xlane.xlu0 %5429  ;;  %v5545_v17 = vpack.c.bf16 %v5534_v34, %v5533_v8  ;;  %v5491_v26 = vmul.f32 %v7820_v29, %v10077_v55 }
 0x7dc   :  { %v7822_v9 = vpop.eup %7821  ;;  %v5447_v19 = vmul.f32 0.0078125, %v5430_v3 }
 0x7dd   :  { %v5432_v49 = vpop.xlane.xlu1 %5431  ;;  %6849 = vmatprep.mubr.bf16.mxu1 %v5545_v17  ;;  %v5492_v56 = vmul.f32 %v7822_v9, %v10081_v11  ;;  %v5513_v7 = vmul.f32 %v10135_v51, %v5491_v26 }
 0x7de   :  { %v5463_v62 = vadd.f32 1e-05, %v5447_v19  ;;  %v5448_v25 = vmul.f32 0.0078125, %v5432_v49 }
 0x7df   :  { %v5514_v4 = vmul.f32 %v10135_v51, %v5492_v56  ;;  %v5535_v53 = vadd.f32 %v10143_v27, %v5513_v7 }
 0x7e0   :  { %7827 = vrsqrt.f32 %v5463_v62  ;;  %v5464_v58 = vadd.f32 1e-05, %v5448_v25 }
 0x7e1   :  { %v5536_v57 = vadd.f32 %v10143_v27, %v5514_v4 }
 0x7e2   :  { %v7824_v36 = vpop.eup %7823  ;;  %7829 = vrsqrt.f32 %v5464_v58 }
 0x7e3   :  { %v5546_v55 = vpack.c.bf16 %v5536_v57, %v5535_v53  ;;  %v5493_v41 = vmul.f32 %v7824_v36, %v10098_v6 }
 0x7e4   :  { %v7826_v46 = vpop.eup %7825 }
 0x7e5   :  { %6850 = vmatmul.mubr.bf16.gmra.mrb[136].mxu1 %v5546_v55  ;;  %v5494_v11 = vmul.f32 %v7826_v46, %v10102_v2  ;;  %v5515_v59 = vmul.f32 %v10135_v51, %v5493_v41 }
 0x7e7   :  { %v5516_v12 = vmul.f32 %v10135_v51, %v5494_v11  ;;  %v5537_v45 = vadd.f32 %v10143_v27, %v5515_v59 }
 0x7e9   :  { %v5538_v32 = vadd.f32 %v10143_v27, %v5516_v12 }
 0x7ea   :  { %v7828_v52 = vpop.eup %7827 }
 0x7eb   :  { %v5547_v47 = vpack.c.bf16 %v5538_v32, %v5537_v45  ;;  %v5495_v30 = vmul.f32 %v7828_v52, %v10116_v28  ;;  %v7763_v28 = vld [vmem:[%s10271_s11 + $0x18] sm:$0xff]  }
 0x7ec   :  { %v7830_v37 = vpop.eup %7829  ;;  %6863 = vmatprep.subr.bf16.mxu1 %v7763_v28 }
 0x7ed   :  { %6853 = vmatprep.mubr.bf16.mxu1 %v5547_v47  ;;  %v5496_v6 = vmul.f32 %v7830_v37, %v10120_v5  ;;  %v5517_v38 = vmul.f32 %v10135_v51, %v5495_v30  ;;  %6864 = vmatpush3.bf16.msra.mxu1 %v7763_v28  ;;  %v7764_v5 = vld [vmem:[%s10273_s13] sm:$0xff]  }
 0x7ee   :  { %6881 = vmatprep.subr.bf16.mxu0 %v7764_v5 }
 0x7ef   :  { %v5518_v2 = vmul.f32 %v10135_v51, %v5496_v6  ;;  %v5539_v16 = vadd.f32 %v10143_v27, %v5517_v38  ;;  %6882 = vmatpush3.bf16.msra.mxu0 %v7764_v5  ;;  %v6671_v51 = vld [vmem:[%s10270_s10] ss:$0 sm:$0xff] }
 0x7f1   :  { %v5540_v50 = vadd.f32 %v10143_v27, %v5518_v2  ;;  %v7765_v2 = vld [vmem:[%s10273_s13 + $0x8] sm:$0xff]  }
 0x7f2   :  { %6883 = vmatprep.subr.bf16.mxu0 %v7765_v2 }
 0x7f3   :  { %v5548_v31 = vpack.c.bf16 %v5540_v50, %v5539_v16  ;;  %6884 = vmatpush3.bf16.msra.mxu0 %v7765_v2  ;;  %v6680_v16 = vld [vmem:[%s10272_s12] ss:$0 sm:$0xff] }
 0x7f5   :  { %6854 = vmatmul.mubr.bf16.gmra.mrb[140].mxu1 %v5548_v31 }
 0x898   :  { %v6843_v27 = vpop.f32.mrb[128].mxu1 }
 0x899   :  { %v5663_v18 = vadd.f32 %v6843_v27, %v6671_v51  ;;  %v5654_v23 = vpop.f32.mrb[129].mxu1 }
 0x89a   :  { %v5655_v44 = vadd.f32 %v6671_v51, %v5654_v23  ;;  %v6844_v21 = vpop.f32.mrb[130].mxu1 }
 0x89b   :  { %v5666_v35 = vadd.f32 %v6844_v21, %v6671_v51  ;;  %v5657_v20 = vpop.f32.mrb[131].mxu1  ;;  %v5719_v48 = vmax.f32 %v5663_v18, 0.0 }
 0x89c   :  { %v5658_v42 = vadd.f32 %v6671_v51, %v5657_v20  ;;  %v5717_v63 = vmax.f32 %v5655_v44, 0.0 }
 0x89d   :  { %v5720_v39 = vmax.f32 %v5666_v35, 0.0 }
 0x89e   :  { %v5718_v0 = vmax.f32 %v5658_v42, 0.0 }
 0x89f   :  { %v5734_v14 = vpack.c.bf16 %v5720_v39, %v5719_v48 }
 0x8a0   :  { %v5733_v61 = vpack.c.bf16 %v5718_v0, %v5717_v63 }
 0x8a2   :  { %6865 = vmatprep.mubr.msk.bf16.mxu1 %vm5780_vm0, %v5733_v61 }
 0x8a3   :  { %6866 = vmatmul.mubr.msk.bf16.vlgmr.msra.gmra.mrb[144].mxu1 %vm5780_vm0, %v5734_v14 }
 0x8a8   :  { %v6847_v22 = vpop.f32.mrb[132].mxu1 }
 0x8a9   :  { %v5679_v43 = vadd.f32 %v6847_v22, %v6671_v51  ;;  %v5670_v40 = vpop.f32.mrb[133].mxu1 }
 0x8aa   :  { %v5671_v1 = vadd.f32 %v6671_v51, %v5670_v40  ;;  %v6848_v10 = vpop.f32.mrb[134].mxu1 }
 0x8ab   :  { %v5682_v13 = vadd.f32 %v6848_v10, %v6671_v51  ;;  %v5673_v33 = vpop.f32.mrb[135].mxu1  ;;  %v5723_v54 = vmax.f32 %v5679_v43, 0.0 }
 0x8ac   :  { %v5674_v60 = vadd.f32 %v6671_v51, %v5673_v33  ;;  %v5721_v8 = vmax.f32 %v5671_v1, 0.0 }
 0x8ad   :  { %v5724_v24 = vmax.f32 %v5682_v13, 0.0 }
 0x8ae   :  { %v5722_v34 = vmax.f32 %v5674_v60, 0.0 }
 0x8af   :  { %v5736_v29 = vpack.c.bf16 %v5724_v24, %v5723_v54 }
 0x8b0   :  { %v5735_v3 = vpack.c.bf16 %v5722_v34, %v5721_v8 }
 0x8b2   :  { %6869 = vmatprep.mubr.msk.bf16.mxu1 %vm5780_vm0, %v5735_v3 }
 0x8b3   :  { %6870 = vmatmul.mubr.msk.bf16.gmra.mrb[148].mxu1 %vm5780_vm0, %v5736_v29 }
 0x8b8   :  { %v6851_v17 = vpop.f32.mrb[136].mxu1 }
 0x8b9   :  { %v5695_v26 = vadd.f32 %v6851_v17, %v6671_v51  ;;  %v5686_v9 = vpop.f32.mrb[137].mxu1 }
 0x8ba   :  { %v5687_v19 = vadd.f32 %v6671_v51, %v5686_v9  ;;  %v6852_v49 = vpop.f32.mrb[138].mxu1 }
 0x8bb   :  { %v5698_v56 = vadd.f32 %v6852_v49, %v6671_v51  ;;  %v5689_v7 = vpop.f32.mrb[139].mxu1  ;;  %v5727_v25 = vmax.f32 %v5695_v26, 0.0 }
 0x8bc   :  { %v5690_v62 = vadd.f32 %v6671_v51, %v5689_v7  ;;  %v5725_v58 = vmax.f32 %v5687_v19, 0.0 }
 0x8bd   :  { %v5728_v4 = vmax.f32 %v5698_v56, 0.0 }
 0x8be   :  { %v5726_v53 = vmax.f32 %v5690_v62, 0.0 }
 0x8bf   :  { %v5738_v57 = vpack.c.bf16 %v5728_v4, %v5727_v25 }
 0x8c0   :  { %v5737_v36 = vpack.c.bf16 %v5726_v53, %v5725_v58 }
 0x8c2   :  { %6873 = vmatprep.mubr.msk.bf16.mxu1 %vm5780_vm0, %v5737_v36 }
 0x8c3   :  { %6874 = vmatmul.mubr.msk.bf16.gmra.mrb[152].mxu1 %vm5780_vm0, %v5738_v57 }
 0x8c8   :  { %v6855_v55 = vpop.f32.mrb[140].mxu1 }
 0x8c9   :  { %v5711_v41 = vadd.f32 %v6855_v55, %v6671_v51  ;;  %v5702_v46 = vpop.f32.mrb[141].mxu1 }
 0x8ca   :  { %v5703_v11 = vadd.f32 %v6671_v51, %v5702_v46  ;;  %v6856_v59 = vpop.f32.mrb[142].mxu1 }
 0x8cb   :  { %v5714_v12 = vadd.f32 %v6856_v59, %v6671_v51  ;;  %v5705_v45 = vpop.f32.mrb[143].mxu1  ;;  %v5731_v52 = vmax.f32 %v5711_v41, 0.0 }
 0x8cc   :  { %v5706_v32 = vadd.f32 %v6671_v51, %v5705_v45  ;;  %v5729_v30 = vmax.f32 %v5703_v11, 0.0 }
 0x8cd   :  { %v5732_v47 = vmax.f32 %v5714_v12, 0.0 }
 0x8ce   :  { %v5730_v37 = vmax.f32 %v5706_v32, 0.0 }
 0x8cf   :  { %v5740_v6 = vpack.c.bf16 %v5732_v47, %v5731_v52  ;;  %v7766_v52 = vld [vmem:[%s10275_s15] sm:$0xff]  }
 0x8d0   :  { %v5739_v38 = vpack.c.bf16 %v5730_v37, %v5729_v30  ;;  %6901 = vmatprep.subr.bf16.mxu1 %v7766_v52  ;;  %v6693_v47 = vld [vmem:[%s10274_s14] ss:$0 sm:$0xff] }
 0x8d1   :  { %6902 = vmatpush3.bf16.msra.mxu1 %v7766_v52 }
 0x8d2   :  { %6877 = vmatprep.mubr.msk.bf16.mxu1 %vm5780_vm0, %v5739_v38 }
 0x8d3   :  { %6878 = vmatmul.mubr.msk.bf16.gmra.mrb[156].mxu1 %vm5780_vm0, %v5740_v6 }
 0x976   :  { %v6867_v50 = vpop.f32.mrb[144].mxu1 }
 0x977   :  { %v5848_v31 = vadd.f32 %v6867_v50, %v6680_v16  ;;  %v5839_v15 = vpop.f32.mrb[145].mxu1 }
 0x978   :  { %v5840_v28 = vadd.f32 %v6680_v16, %v5839_v15  ;;  %v6868_v5 = vpop.f32.mrb[146].mxu1 }
 0x979   :  { %v5851_v51 = vadd.f32 %v6868_v5, %v6680_v16  ;;  %v5842_v27 = vpop.f32.mrb[147].mxu1  ;;  %v5904_v23 = vmax.f32 %v5848_v31, 0.0 }
 0x97a   :  { %v5843_v18 = vadd.f32 %v6680_v16, %v5842_v27  ;;  %v5902_v21 = vmax.f32 %v5840_v28, 0.0 }
 0x97b   :  { %v5905_v44 = vmax.f32 %v5851_v51, 0.0 }
 0x97c   :  { %v5903_v35 = vmax.f32 %v5843_v18, 0.0 }
 0x97d   :  { %v5919_v20 = vpack.c.bf16 %v5905_v44, %v5904_v23 }
 0x97e   :  { %v5918_v42 = vpack.c.bf16 %v5903_v35, %v5902_v21 }
 0x980   :  { %6885 = vmatprep.mubr.msk.bf16.mxu0 %vm5949_vm1, %v5918_v42 }
 0x981   :  { %6886 = vmatmul.mubr.msk.bf16.vlgmr.msra.gmra.mrb[128].mxu0 %vm5949_vm1, %v5919_v20 }
 0x986   :  { %v6871_v48 = vpop.f32.mrb[148].mxu1 }
 0x987   :  { %v5864_v39 = vadd.f32 %v6871_v48, %v6680_v16  ;;  %v5855_v63 = vpop.f32.mrb[149].mxu1 }
 0x988   :  { %v5856_v0 = vadd.f32 %v6680_v16, %v5855_v63  ;;  %v6872_v14 = vpop.f32.mrb[150].mxu1 }
 0x989   :  { %v5867_v61 = vadd.f32 %v6872_v14, %v6680_v16  ;;  %v5858_v22 = vpop.f32.mrb[151].mxu1  ;;  %v5908_v40 = vmax.f32 %v5864_v39, 0.0 }
 0x98a   :  { %v5859_v43 = vadd.f32 %v6680_v16, %v5858_v22  ;;  %v5906_v10 = vmax.f32 %v5856_v0, 0.0 }
 0x98b   :  { %v5909_v1 = vmax.f32 %v5867_v61, 0.0 }
 0x98c   :  { %v5907_v13 = vmax.f32 %v5859_v43, 0.0 }
 0x98d   :  { %v5921_v33 = vpack.c.bf16 %v5909_v1, %v5908_v40 }
 0x98e   :  { %v5920_v60 = vpack.c.bf16 %v5907_v13, %v5906_v10 }
 0x990   :  { %6889 = vmatprep.mubr.msk.bf16.mxu0 %vm5949_vm1, %v5920_v60 }
 0x991   :  { %6890 = vmatmul.mubr.msk.bf16.gmra.mrb[132].mxu0 %vm5949_vm1, %v5921_v33 }
 0x996   :  { %v6875_v54 = vpop.f32.mrb[152].mxu1 }
 0x997   :  { %v5880_v24 = vadd.f32 %v6875_v54, %v6680_v16  ;;  %v5871_v8 = vpop.f32.mrb[153].mxu1 }
 0x998   :  { %v5872_v34 = vadd.f32 %v6680_v16, %v5871_v8  ;;  %v6876_v29 = vpop.f32.mrb[154].mxu1 }
 0x999   :  { %v5883_v3 = vadd.f32 %v6876_v29, %v6680_v16  ;;  %v5874_v17 = vpop.f32.mrb[155].mxu1  ;;  %v5912_v9 = vmax.f32 %v5880_v24, 0.0 }
 0x99a   :  { %v5875_v26 = vadd.f32 %v6680_v16, %v5874_v17  ;;  %v5910_v49 = vmax.f32 %v5872_v34, 0.0 }
 0x99b   :  { %v5913_v19 = vmax.f32 %v5883_v3, 0.0 }
 0x99c   :  { %v5911_v56 = vmax.f32 %v5875_v26, 0.0 }
 0x99d   :  { %v5923_v7 = vpack.c.bf16 %v5913_v19, %v5912_v9 }
 0x99e   :  { %v5922_v62 = vpack.c.bf16 %v5911_v56, %v5910_v49 }
 0x9a0   :  { %6893 = vmatprep.mubr.msk.bf16.mxu0 %vm5949_vm1, %v5922_v62 }
 0x9a1   :  { %6894 = vmatmul.mubr.msk.bf16.gmra.mrb[136].mxu0 %vm5949_vm1, %v5923_v7 }
 0x9a6   :  { %v6879_v25 = vpop.f32.mrb[156].mxu1 }
 0x9a7   :  { %v5896_v4 = vadd.f32 %v6879_v25, %v6680_v16  ;;  %v5887_v58 = vpop.f32.mrb[157].mxu1 }
 0x9a8   :  { %v5888_v53 = vadd.f32 %v6680_v16, %v5887_v58  ;;  %v6880_v57 = vpop.f32.mrb[158].mxu1 }
 0x9a9   :  { %v5899_v36 = vadd.f32 %v6880_v57, %v6680_v16  ;;  %v5890_v55 = vpop.f32.mrb[159].mxu1  ;;  %v5916_v46 = vmax.f32 %v5896_v4, 0.0 }
 0x9aa   :  { %v5891_v41 = vadd.f32 %v6680_v16, %v5890_v55  ;;  %v5914_v59 = vmax.f32 %v5888_v53, 0.0 }
 0x9ab   :  { %v5917_v11 = vmax.f32 %v5899_v36, 0.0 }
 0x9ac   :  { %v5915_v12 = vmax.f32 %v5891_v41, 0.0 }
 0x9ad   :  { %v5925_v45 = vpack.c.bf16 %v5917_v11, %v5916_v46  ;;  %v6704_v46 = vld [vmem:[%s10276_s16] ss:$0 sm:$0xff]  ;;  %s8033_s16 = smov [#allocation14]  }
 0x9ae   :  { %v5924_v32 = vpack.c.bf16 %v5915_v12, %v5914_v59  ;;  %s6253_s7 = sshll.u32 %s8033_s16, 4  ;;  %s6254_s7 = int_to_ptr.vmem [resolvable:$true] %s6253_s7 }
 0x9af   :  { %s7985_s1 = scalar_lea.vmem %s6254_s7, 2048  ;;  %p7990_p1 = scmp.lt.s32.totalorder %s6254_s7, %s6254_s7 }
 0x9b0   :  { %6897 = vmatprep.mubr.msk.bf16.mxu0 %vm5949_vm1, %v5924_v32  ;;  %p7986_p0 = scmp.ne.s32.totalorder %s6254_s7, %s7985_s1  ;;  %p7991_p2 = scmp.lt.s32.totalorder %s7985_s1, %s7985_s1 }
 0x9b1   :  { %6898 = vmatmul.mubr.msk.bf16.gmra.mrb[140].mxu0 %vm5949_vm1, %v5925_v45 }
 0x9b2   :  { %p7992_p3 = por %p7991_p2, %p7990_p1 }
 0x9b4   :  { %p7993_p4 = pnand %p7992_p3, %p7986_p0 }
 0xa54   :  { %v6887_v30 = vpop.f32.mrb[128].mxu0 }
 0xa55   :  { %v6017_v37 = vadd.f32 %v6887_v30, %v6693_v47  ;;  %v6008_v6 = vpop.f32.mrb[129].mxu0 }
 0xa56   :  { %v6009_v38 = vadd.f32 %v6693_v47, %v6008_v6  ;;  %v6888_v2 = vpop.f32.mrb[130].mxu0 }
 0xa57   :  { %v6020_v16 = vadd.f32 %v6888_v2, %v6693_v47  ;;  %v6011_v50 = vpop.f32.mrb[131].mxu0  ;;  %v6073_v15 = vmax.f32 %v6017_v37, 0.0 }
 0xa58   :  { %v6012_v31 = vadd.f32 %v6693_v47, %v6011_v50  ;;  %v6071_v5 = vmax.f32 %v6009_v38, 0.0 }
 0xa59   :  { %v6074_v28 = vmax.f32 %v6020_v16, 0.0 }
 0xa5a   :  { %v6072_v51 = vmax.f32 %v6012_v31, 0.0 }
 0xa5b   :  { %v6088_v27 = vpack.c.bf16 %v6074_v28, %v6073_v15 }
 0xa5c   :  { %v6087_v18 = vpack.c.bf16 %v6072_v51, %v6071_v5 }
 0xa5e   :  { %6903 = vmatprep.mubr.msk.bf16.mxu1 %vm6110_vm2, %v6087_v18 }
 0xa5f   :  { %6904 = vmatmul.mubr.msk.bf16.vlgmr.msra.gmra.mrb[160].mxu1 %vm6110_vm2, %v6088_v27 }
 0xa64   :  { %v6891_v23 = vpop.f32.mrb[132].mxu0 }
 0xa65   :  { %v6033_v44 = vadd.f32 %v6891_v23, %v6693_v47  ;;  %v6024_v21 = vpop.f32.mrb[133].mxu0 }
 0xa66   :  { %v6025_v35 = vadd.f32 %v6693_v47, %v6024_v21  ;;  %v6892_v20 = vpop.f32.mrb[134].mxu0 }
 0xa67   :  { %v6036_v42 = vadd.f32 %v6892_v20, %v6693_v47  ;;  %v6027_v48 = vpop.f32.mrb[135].mxu0  ;;  %v6077_v63 = vmax.f32 %v6033_v44, 0.0 }
 0xa68   :  { %v6028_v39 = vadd.f32 %v6693_v47, %v6027_v48  ;;  %v6075_v14 = vmax.f32 %v6025_v35, 0.0 }
 0xa69   :  { %v6078_v0 = vmax.f32 %v6036_v42, 0.0 }
 0xa6a   :  { %v6076_v61 = vmax.f32 %v6028_v39, 0.0 }
 0xa6b   :  { %v6090_v22 = vpack.c.bf16 %v6078_v0, %v6077_v63 }
 0xa6c   :  { %v6089_v43 = vpack.c.bf16 %v6076_v61, %v6075_v14 }
 0xa6e   :  { %6907 = vmatprep.mubr.msk.bf16.mxu1 %vm6110_vm2, %v6089_v43 }
 0xa6f   :  { %6908 = vmatmul.mubr.msk.bf16.gmra.mrb[164].mxu1 %vm6110_vm2, %v6090_v22 }
 0xa74   :  { %v6895_v40 = vpop.f32.mrb[136].mxu0 }
 0xa75   :  { %v6049_v1 = vadd.f32 %v6895_v40, %v6693_v47  ;;  %v6040_v10 = vpop.f32.mrb[137].mxu0 }
 0xa76   :  { %v6041_v13 = vadd.f32 %v6693_v47, %v6040_v10  ;;  %v6896_v33 = vpop.f32.mrb[138].mxu0 }
 0xa77   :  { %v6052_v60 = vadd.f32 %v6896_v33, %v6693_v47  ;;  %v6043_v54 = vpop.f32.mrb[139].mxu0  ;;  %v6081_v8 = vmax.f32 %v6049_v1, 0.0 }
 0xa78   :  { %v6044_v24 = vadd.f32 %v6693_v47, %v6043_v54  ;;  %v6079_v29 = vmax.f32 %v6041_v13, 0.0 }
 0xa79   :  { %v6082_v34 = vmax.f32 %v6052_v60, 0.0 }
 0xa7a   :  { %v6080_v3 = vmax.f32 %v6044_v24, 0.0 }
 0xa7b   :  { %v6092_v17 = vpack.c.bf16 %v6082_v34, %v6081_v8 }
 0xa7c   :  { %v6091_v26 = vpack.c.bf16 %v6080_v3, %v6079_v29 }
 0xa7e   :  { %6911 = vmatprep.mubr.msk.bf16.mxu1 %vm6110_vm2, %v6091_v26 }
 0xa7f   :  { %6912 = vmatmul.mubr.msk.bf16.gmra.mrb[168].mxu1 %vm6110_vm2, %v6092_v17 }
 0xa84   :  { %v6899_v9 = vpop.f32.mrb[140].mxu0 }
 0xa85   :  { %v6065_v19 = vadd.f32 %v6899_v9, %v6693_v47  ;;  %v6056_v49 = vpop.f32.mrb[141].mxu0 }
 0xa86   :  { %v6057_v56 = vadd.f32 %v6693_v47, %v6056_v49  ;;  %v6900_v7 = vpop.f32.mrb[142].mxu0 }
 0xa87   :  { %v6068_v62 = vadd.f32 %v6900_v7, %v6693_v47  ;;  %v6059_v25 = vpop.f32.mrb[143].mxu0  ;;  %v6085_v58 = vmax.f32 %v6065_v19, 0.0 }
 0xa88   :  { %v6060_v4 = vadd.f32 %v6693_v47, %v6059_v25  ;;  %v6083_v57 = vmax.f32 %v6057_v56, 0.0 }
 0xa89   :  { %v6086_v53 = vmax.f32 %v6068_v62, 0.0 }
 0xa8a   :  { %v6084_v36 = vmax.f32 %v6060_v4, 0.0 }
 0xa8b   :  { %v6094_v55 = vpack.c.bf16 %v6086_v53, %v6085_v58 }
 0xa8c   :  { %v6093_v41 = vpack.c.bf16 %v6084_v36, %v6083_v57 }
 0xa8e   :  { %6915 = vmatprep.mubr.msk.bf16.mxu1 %vm6110_vm2, %v6093_v41 }
 0xa8f   :  { %6916 = vmatmul.mubr.msk.bf16.gmra.mrb[172].mxu1 %vm6110_vm2, %v6094_v55 }
 0xb32   :  { %v6905_v11 = vpop.f32.mrb[160].mxu1 }
 0xb33   :  { %v6178_v59 = vadd.f32 %v6905_v11, %v6704_v46  ;;  %v6169_v12 = vpop.f32.mrb[161].mxu1 }
 0xb34   :  { %v6170_v45 = vadd.f32 %v6704_v46, %v6169_v12  ;;  %v6906_v32 = vpop.f32.mrb[162].mxu1 }
 0xb35   :  { %6234 = vst [vmem:[#allocation14 + $0x10] sm:$0xff] %v6178_v59  ;;  %v6181_v52 = vadd.f32 %v6906_v32, %v6704_v46  ;;  %v6172_v47 = vpop.f32.mrb[163].mxu1 }
 0xb36   :  { %6232 = vst [vmem:[#allocation14] sm:$0xff] %v6170_v45  ;;  %v6173_v30 = vadd.f32 %v6704_v46, %v6172_v47 }
 0xb37   :  { %6235 = vst [vmem:[#allocation14 + $0x18] sm:$0xff] %v6181_v52 }
 0xb38   :  { %6233 = vst [vmem:[#allocation14 + $0x8] sm:$0xff] %v6173_v30 }
 0xb42   :  { %v6909_v37 = vpop.f32.mrb[164].mxu1 }
 0xb43   :  { %v6194_v6 = vadd.f32 %v6909_v37, %v6704_v46  ;;  %v6185_v38 = vpop.f32.mrb[165].mxu1 }
 0xb44   :  { %v6186_v2 = vadd.f32 %v6704_v46, %v6185_v38  ;;  %v6910_v16 = vpop.f32.mrb[166].mxu1 }
 0xb45   :  { %6238 = vst [vmem:[#allocation14 + $0x30] sm:$0xff] %v6194_v6  ;;  %v6197_v50 = vadd.f32 %v6910_v16, %v6704_v46  ;;  %v6188_v31 = vpop.f32.mrb[167].mxu1 }
 0xb46   :  { %6236 = vst [vmem:[#allocation14 + $0x20] sm:$0xff] %v6186_v2  ;;  %v6189_v15 = vadd.f32 %v6704_v46, %v6188_v31 }
 0xb47   :  { %6239 = vst [vmem:[#allocation14 + $0x38] sm:$0xff] %v6197_v50 }
 0xb48   :  { %6237 = vst [vmem:[#allocation14 + $0x28] sm:$0xff] %v6189_v15 }
 0xb52   :  { %v6913_v28 = vpop.f32.mrb[168].mxu1 }
 0xb53   :  { %v6210_v5 = vadd.f32 %v6913_v28, %v6704_v46  ;;  %v6201_v51 = vpop.f32.mrb[169].mxu1 }
 0xb54   :  { %v6202_v27 = vadd.f32 %v6704_v46, %v6201_v51  ;;  %v6914_v18 = vpop.f32.mrb[170].mxu1 }
 0xb55   :  { %6242 = vst [vmem:[#allocation14 + $0x50] sm:$0xff] %v6210_v5  ;;  %v6213_v23 = vadd.f32 %v6914_v18, %v6704_v46  ;;  %v6204_v44 = vpop.f32.mrb[171].mxu1 }
 0xb56   :  { %6240 = vst [vmem:[#allocation14 + $0x40] sm:$0xff] %v6202_v27  ;;  %v6205_v21 = vadd.f32 %v6704_v46, %v6204_v44 }
 0xb57   :  { %6243 = vst [vmem:[#allocation14 + $0x58] sm:$0xff] %v6213_v23 }
 0xb58   :  { %6241 = vst [vmem:[#allocation14 + $0x48] sm:$0xff] %v6205_v21 }
 0xb62   :  { %v6917_v35 = vpop.f32.mrb[172].mxu1 }
 0xb63   :  { %v6226_v20 = vadd.f32 %v6917_v35, %v6704_v46  ;;  %v6217_v42 = vpop.f32.mrb[173].mxu1 }
 0xb64   :  { %v6218_v48 = vadd.f32 %v6704_v46, %v6217_v42  ;;  %v6918_v39 = vpop.f32.mrb[174].mxu1 }
 0xb65   :  { %6246 = vst [vmem:[#allocation14 + $0x70] sm:$0xff] %v6226_v20  ;;  %v6229_v63 = vadd.f32 %v6918_v39, %v6704_v46  ;;  %v6220_v0 = vpop.f32.mrb[175].mxu1 }
 0xb66   :  { %6244 = vst [vmem:[#allocation14 + $0x60] sm:$0xff] %v6218_v48  ;;  %v6221_v14 = vadd.f32 %v6704_v46, %v6220_v0 }
 0xb67   :  { %6247 = vst [vmem:[#allocation14 + $0x78] sm:$0xff] %v6229_v63 }
 0xb68   :  { %6245 = vst [vmem:[#allocation14 + $0x68] sm:$0xff] %v6221_v14 }
 0xb69   :  { %7996 = shalt.err (!%p7993_p4)
}
 0xb6a   :  { %s10585_s17 = sld [smem:[#allocation58_spill]] }
 0xb70   :  { %s7997_s18 = scalar_lea.hbm %s10585_s17, 2048 }
 0xb71   :  { %p7998_p5 = scmp.ne.s32.totalorder %s10585_s17, %s7997_s18  ;;  %p8001_p6 = scmp.lt.u32.totalorder %s7997_s18, %s10585_s17 }
 0xb73   :  { %p8003_p7 = pnand %p8001_p6, %p7998_p5 }
 0xb75   :  { %8006 = shalt.err (!%p8003_p7)
}
 0xb76   :  { %6259 = dma.vmem_to_hbm [thread:$0]  %s6254_s7, 2048, %s10585_s17, [#allocation4], %s8029_s25, %s8029_s25, %s8030_s2  }
 0xb77   :  { %8015 = dma.done.wait [#allocation4], 2048  }
 0xb78   :  { %8016 = vsyncadd [#allocation4], 4294965248 }
 0xb79   :  { %6263 = vsyncpa [#allocation3], 1 }
 0xb7a   :  { %6264 = vsyncpa [#allocation6], 1 }
 0xb7b   :  { %6265 = vsyncpa [#allocation9], 1 }
 0xb7c   :  { %6266 = vsyncpa [#allocation12], 1 }
 0xb7d   :  { %6267 = vsyncpa [#allocation4], 1 }

</bundles_post_ra>
